<compile_context>
chip_gen: v5e
topology: v5e:2x2
jax: 0.10.0
libtpu: 0.0.40
codegen_flags: <defaults>
</compile_context>

<pallas_src>
import jax
import jax.numpy as jnp
from jax.experimental import pallas as pl
from jax.experimental.pallas import tpu as pltpu


def graph_reason_kernel(x_ref, adj_ref, wself_ref, bself_ref, wedge_ref, bedge_ref, out_ref):
    # x_ref    : (Bt, Np, Dp)         f32   node embeddings (Bt batch elements)
    # adj_ref  : (Bt, Np, Np)         i32   edge-typed adjacency (value e+1 == edge type e)
    # wself_ref: (T, Dp, Dp)          bf16  per-iteration self weight
    # bself_ref: (T, 1, Dp)           f32   per-iteration self bias
    # wedge_ref: (T, Dp, E*Dp)        bf16  per-iteration edge weights stacked on last dim
    # bedge_ref: (T, 1, E*Dp)         f32   per-iteration edge biases stacked on last dim
    # out_ref  : (Bt, Np, (T+1)*Dp)   f32   [x, h1, ..., hT] concatenated on the last dim
    T = wself_ref.shape[0]
    Bt, Np, Dp = x_ref.shape
    E = wedge_ref.shape[2] // Dp

    hi = x_ref[...]                                  # (Bt, Np, Dp) f32
    out_ref[:, :, 0:Dp] = hi                         # slot 0: original embeddings

    # Hoisted adjacency preprocessing (adjacency-only, reused by every iteration).
    # Masks stay exact 0/1 (lossless in bf16); 1/deg stays f32 and is applied after
    # the aggregation matmul (review: no bf16 quantization of the normalization).
    adj = adj_ref[...]                               # (Bt, Np, Np) i32
    masks = []
    inv_degs = []
    for e in range(E):                               # static unroll over edge types
        m = adj == (e + 1)
        deg = jnp.maximum(jnp.sum(m.astype(jnp.float32), axis=-1, keepdims=True), 1.0)
        masks.append(m.astype(jnp.bfloat16))         # (Bt, Np, Np) exact 0/1
        inv_degs.append(1.0 / deg)                   # (Bt, Np, 1)  f32

    # TODO(synk): for large T switch this static unroll to lax.fori_loop (dynamic
    # weight-ref indexing + pl.ds output stores) to bound live ranges / code size.
    for t in range(T):
        hi_flat = hi.astype(jnp.bfloat16).reshape(Bt * Np, Dp)
        # self transform: one (Bt*Np, Dp) x (Dp, Dp) bf16 MXU matmul, f32 accumulate
        h = jnp.dot(hi_flat, wself_ref[t], preferred_element_type=jnp.float32) + bself_ref[t]
        # fused per-edge messages: one (Bt*Np, Dp) x (Dp, E*Dp) bf16 MXU matmul, f32 bias
        msg = jnp.dot(hi_flat, wedge_ref[t], preferred_element_type=jnp.float32) + bedge_ref[t]
        h = h.reshape(Bt, Np, Dp)
        msg = msg.reshape(Bt, Np, E * Dp)
        for e in range(E):                           # E back-to-back MXU pushes (cheap)
            msg_e = msg[:, :, e * Dp:(e + 1) * Dp].astype(jnp.bfloat16)  # lane-aligned slice
            agg = jnp.einsum('bmn,bnd->bmd', masks[e], msg_e,
                             preferred_element_type=jnp.float32)
            h = h + agg * inv_degs[e]                # f32 degree normalization
        hi = jnp.maximum(h, 0.0)                     # ReLU; dropout is identity (graph_drop=0)
        out_ref[:, :, (t + 1) * Dp:(t + 2) * Dp] = hi    # lane-dense unmasked column store


def _round_up(v, m):
    return ((v + m - 1) // m) * m


def _pick_batch_tile(B, Np):
    """Largest divisor of B keeping <= 512 MXU rows per grid step; prefer >= 2 grid
    steps (v7x has 2 TensorCores) when that still leaves >= 128 rows per step."""
    divisors = [d for d in range(1, B + 1) if B % d == 0]
    fitting = [d for d in divisors if d * Np <= 512]
    bt = max(fitting) if fitting else 1
    if B // bt == 1 and B > 1:
        smaller = [d for d in divisors if d < B and d * Np >= 128]
        if smaller:
            bt = max(smaller)
    return bt


def _vmem_capacity_bytes():
    try:
        cap = getattr(pltpu.get_tpu_info(), "vmem_capacity_bytes", None)
        if cap:
            return int(cap)
    except Exception:
        pass
    return 64 * 1024 * 1024   # conservative fallback: v7x per-TensorCore VMEM


def graph_reason_forward(nodes_embed, node_adj, w_self, b_self, w_edge, b_edge):
    B, N, D = nodes_embed.shape
    T = w_self.shape[0]
    E = w_edge.shape[1]

    # Pad features to a 128-lane multiple, nodes to an 8-sublane multiple. Padded
    # adjacency entries are 0 ("no edge") and padded weight/bias/feature columns are
    # 0, so padding never leaks into real rows/columns.
    Dp = _round_up(D, 128)
    Np = _round_up(N, 8)

    x = jnp.pad(nodes_embed, ((0, 0), (0, Np - N), (0, Dp - D)))
    adj = jnp.pad(node_adj, ((0, 0), (0, Np - N), (0, Np - N)))
    w_self_p = jnp.pad(w_self, ((0, 0), (0, Dp - D), (0, Dp - D))).astype(jnp.bfloat16)
    b_self_p = jnp.pad(b_self, ((0, 0), (0, 0), (0, Dp - D)))                        # f32
    w_edge_p = jnp.pad(w_edge, ((0, 0), (0, 0), (0, Dp - D), (0, Dp - D)))
    w_edge_stack = jnp.transpose(w_edge_p, (0, 2, 1, 3)).reshape(T, Dp, E * Dp)
    w_edge_stack = w_edge_stack.astype(jnp.bfloat16)                                 # (T, Dp, E*Dp)
    b_edge_p = jnp.pad(b_edge, ((0, 0), (0, 0), (0, 0), (0, Dp - D)))
    b_edge_stack = jnp.transpose(b_edge_p, (0, 2, 1, 3)).reshape(T, 1, E * Dp)       # f32

    bt = _pick_batch_tile(B, Np)

    # VMEM budget: double-buffered per-step blocks, weights counted twice to stay
    # safe under the double-buffered fallback, plus in-kernel temporaries.
    f32b, bf16b, i32b = 4, 2, 4
    weight_bytes = (T * Dp * Dp * bf16b + T * Dp * f32b
                    + T * Dp * E * Dp * bf16b + T * E * Dp * f32b)
    io_bytes = (bt * Np * Dp * f32b + bt * Np * Np * i32b
                + bt * Np * (T + 1) * Dp * f32b)
    temp_bytes = (E * bt * Np * (Np * (f32b + bf16b) + f32b)     # masks + inv_deg
                  + bt * Np * E * Dp * (f32b + bf16b)            # fused messages + bf16 slice
                  + 4 * bt * Np * Dp * f32b)                     # hi / h / agg temporaries
    vmem_needed = 2 * io_bytes + 2 * weight_bytes + temp_bytes + (1 << 20)
    vmem_limit = int(min(0.75 * _vmem_capacity_bytes(),
                         max(32 * 1024 * 1024, vmem_needed)))
    # TODO(synk): for very large graphs (N in the hundreds at D >= 512) add an
    # N-tiling / per-iteration output grid axis instead of raising the VMEM budget.

    def _pallas_call(single_buffer_consts):
        const_mode = (dict(pipeline_mode=pl.Buffered(buffer_count=1))
                      if single_buffer_consts else {})
        in_specs = [
            pl.BlockSpec((bt, Np, Dp), lambda b: (b, 0, 0)),
            pl.BlockSpec((bt, Np, Np), lambda b: (b, 0, 0)),
            pl.BlockSpec((T, Dp, Dp), lambda b: (0, 0, 0), **const_mode),
            pl.BlockSpec((T, 1, Dp), lambda b: (0, 0, 0), **const_mode),
            pl.BlockSpec((T, Dp, E * Dp), lambda b: (0, 0, 0), **const_mode),
            pl.BlockSpec((T, 1, E * Dp), lambda b: (0, 0, 0), **const_mode),
        ]
        return pl.pallas_call(
            graph_reason_kernel,
            out_shape=jax.ShapeDtypeStruct((B, Np, (T + 1) * Dp), jnp.float32),
            grid_spec=pltpu.PrefetchScalarGridSpec(
                num_scalar_prefetch=0,
                grid=(B // bt,),
                in_specs=in_specs,
                out_specs=pl.BlockSpec((bt, Np, (T + 1) * Dp), lambda b: (b, 0, 0)),
            ),
            compiler_params=pltpu.CompilerParams(
                dimension_semantics=("parallel",),
                vmem_limit_bytes=vmem_limit,
            ),
        )

    args = (x, adj, w_self_p, b_self_p, w_edge_stack, b_edge_stack)
    try:
        out_padded = _pallas_call(True)(*args)
    except Exception:
        # pl.Buffered(1) single-buffering of constant operands is not available on
        # every JAX version; fall back to default (double-buffered) pipelining.
        out_padded = _pallas_call(False)(*args)

    if Np == N and Dp == D:
        # Production path (D % 128 == 0, N % 8 == 0): kernel output IS the final layout.
        return out_padded
    # Demo / unaligned path: strip the padding rows and columns.
    out = out_padded[:, :N, :].reshape(B, N, T + 1, Dp)[..., :D]
    return out.reshape(B, N, (T + 1) * D)


def reference_forward(nodes_embed, node_adj, w_self, b_self, w_edge, b_edge):
    """Plain-JAX f32 reference mirroring the PyTorch forward, for a correctness check."""
    T, E = w_self.shape[0], w_edge.shape[1]
    hi = nodes_embed
    out = nodes_embed
    for t in range(T):
        h = jnp.einsum('bnd,de->bne', hi, w_self[t]) + b_self[t]
        for e in range(E):
            adj_e = (node_adj == (e + 1)).astype(jnp.float32)
            deg = jnp.clip(jnp.sum(adj_e, axis=-1, keepdims=True), 1.0, None)
            msg = jnp.einsum('bnd,de->bne', hi, w_edge[t, e]) + b_edge[t, e]
            h = h + jnp.einsum('bmn,bne->bme', adj_e, msg) / deg
        hi = jnp.maximum(h, 0.0)
        out = jnp.concatenate([out, hi], axis=-1)
    return out


if __name__ == "__main__":
    B, N, D = 2, 16, 32          # batch, num graph nodes, input_size
    E = 3                        # number of edge types (len(edges))
    ITERS = 2                    # reasoning iterations

    key = jax.random.PRNGKey(0)
    k1, k2, k3, k4, k5, k6 = jax.random.split(key, 6)

    nodes_embed = jax.random.normal(k1, (B, N, D), dtype=jnp.float32)
    node_adj = jax.random.randint(k2, (B, N, N), 0, E + 1, dtype=jnp.int32)

    scale = 1.0 / jnp.sqrt(jnp.float32(D))
    w_self = jax.random.normal(k3, (ITERS, D, D), dtype=jnp.float32) * scale
    b_self = jax.random.normal(k4, (ITERS, 1, D), dtype=jnp.float32) * 0.01
    w_edge = jax.random.normal(k5, (ITERS, E, D, D), dtype=jnp.float32) * scale
    b_edge = jax.random.normal(k6, (ITERS, E, 1, D), dtype=jnp.float32) * 0.01

    out = graph_reason_forward(nodes_embed, node_adj, w_self, b_self, w_edge, b_edge)
    out = jax.block_until_ready(out)

    ref = reference_forward(nodes_embed, node_adj, w_self, b_self, w_edge, b_edge)
    assert out.shape == (B, N, (ITERS + 1) * D), out.shape
    # Tolerance accounts for bf16 MXU operands (f32 accumulation, f32 normalization)
    # vs. the pure-f32 reference.
    assert jnp.allclose(out, ref, atol=5e-2, rtol=5e-2), "kernel/reference mismatch"

    print("KERNEL_OK")
</pallas_src>

<mosaic_0001>
module attributes {stable_mosaic.version = 11 : i64} {
  func.func @graph_reason_kernel(%arg0: i32, %arg1: memref<2x16x128xf32, #tpu.memory_space<vmem>>, %arg2: memref<2x16x16xi32, #tpu.memory_space<vmem>>, %arg3: memref<2x128x128xbf16, #tpu.memory_space<vmem>>, %arg4: memref<2x1x128xf32, #tpu.memory_space<vmem>>, %arg5: memref<2x128x384xbf16, #tpu.memory_space<vmem>>, %arg6: memref<2x1x384xf32, #tpu.memory_space<vmem>>, %arg7: memref<2x16x384xf32, #tpu.memory_space<vmem>>) attributes {dimension_semantics = [#tpu.dimension_semantics<parallel>], iteration_bounds = array<i64: 1>, scalar_prefetch = 0 : i64, scratch_operands = 0 : i64, tpu.core_type = #tpu.core_type<tc>, window_params = [{transform_indices = @transform_0, window_bounds = array<i64: 2, 16, 128>}, {transform_indices = @transform_1, window_bounds = array<i64: 2, 16, 16>}, {pipeline_mode = #tpu.pipeline_mode<synchronous>, transform_indices = @transform_2, window_bounds = array<i64: 2, 128, 128>}, {pipeline_mode = #tpu.pipeline_mode<synchronous>, transform_indices = @transform_3, window_bounds = array<i64: 2, 1, 128>}, {pipeline_mode = #tpu.pipeline_mode<synchronous>, transform_indices = @transform_4, window_bounds = array<i64: 2, 128, 384>}, {pipeline_mode = #tpu.pipeline_mode<synchronous>, transform_indices = @transform_5, window_bounds = array<i64: 2, 1, 384>}, {transform_indices = @transform_6, window_bounds = array<i64: 2, 16, 384>}]} {
    %c0 = arith.constant 0 : index
    %c0_0 = arith.constant 0 : index
    %c0_1 = arith.constant 0 : index
    %0 = vector.load %arg1[%c0, %c0_0, %c0_1] : memref<2x16x128xf32, #tpu.memory_space<vmem>>, vector<2x16x128xf32>
    %c0_2 = arith.constant 0 : index
    %c0_3 = arith.constant 0 : index
    %c0_4 = arith.constant 0 : index
    %1 = vector.load %arg7[%c0_2, %c0_3, %c0_4] : memref<2x16x384xf32, #tpu.memory_space<vmem>>, vector<2x16x128xf32>
    tpu.vector_store %arg7[%c0_2, %c0_3, %c0_4], %0 {strides = array<i32>} : memref<2x16x384xf32, #tpu.memory_space<vmem>>, vector<2x16x128xf32>,
    %c0_5 = arith.constant 0 : index
    %c0_6 = arith.constant 0 : index
    %c0_7 = arith.constant 0 : index
    %2 = vector.load %arg2[%c0_5, %c0_6, %c0_7] : memref<2x16x16xi32, #tpu.memory_space<vmem>>, vector<2x16x16xi32>
    %c1_i32 = arith.constant 1 : i32
    %3 = vector.broadcast %c1_i32 : i32 to vector<2x16x16xi32>
    %4 = arith.cmpi eq, %2, %3 : vector<2x16x16xi32>
    %5 = arith.extui %4 : vector<2x16x16xi1> to vector<2x16x16xi32>
    %6 = arith.sitofp %5 : vector<2x16x16xi32> to vector<2x16x16xf32>
    %cst = arith.constant dense<0.000000e+00> : vector<2x16xf32>
    %7 = vector.multi_reduction <add>, %6, %cst [2] : vector<2x16x16xf32> to vector<2x16xf32>
    %8 = vector.shape_cast %7 : vector<2x16xf32> to vector<2x16x1xf32>
    %cst_8 = arith.constant 1.000000e+00 : f32
    %9 = vector.broadcast %cst_8 : f32 to vector<2x16x1xf32>
    %10 = arith.maximumf %8, %9 : vector<2x16x1xf32>
    %11 = arith.extui %4 : vector<2x16x16xi1> to vector<2x16x16xi32>
    %12 = arith.sitofp %11 : vector<2x16x16xi32> to vector<2x16x16xf32>
    %13 = arith.truncf %12 : vector<2x16x16xf32> to vector<2x16x16xbf16>
    %cst_9 = arith.constant 1.000000e+00 : f32
    %14 = vector.broadcast %cst_9 : f32 to vector<2x16x1xf32>
    %15 = arith.divf %14, %10 : vector<2x16x1xf32>
    %c2_i32 = arith.constant 2 : i32
    %16 = vector.broadcast %c2_i32 : i32 to vector<2x16x16xi32>
    %17 = arith.cmpi eq, %2, %16 : vector<2x16x16xi32>
    %18 = arith.extui %17 : vector<2x16x16xi1> to vector<2x16x16xi32>
    %19 = arith.sitofp %18 : vector<2x16x16xi32> to vector<2x16x16xf32>
    %cst_10 = arith.constant dense<0.000000e+00> : vector<2x16xf32>
    %20 = vector.multi_reduction <add>, %19, %cst_10 [2] : vector<2x16x16xf32> to vector<2x16xf32>
    %21 = vector.shape_cast %20 : vector<2x16xf32> to vector<2x16x1xf32>
    %cst_11 = arith.constant 1.000000e+00 : f32
    %22 = vector.broadcast %cst_11 : f32 to vector<2x16x1xf32>
    %23 = arith.maximumf %21, %22 : vector<2x16x1xf32>
    %24 = arith.extui %17 : vector<2x16x16xi1> to vector<2x16x16xi32>
    %25 = arith.sitofp %24 : vector<2x16x16xi32> to vector<2x16x16xf32>
    %26 = arith.truncf %25 : vector<2x16x16xf32> to vector<2x16x16xbf16>
    %cst_12 = arith.constant 1.000000e+00 : f32
    %27 = vector.broadcast %cst_12 : f32 to vector<2x16x1xf32>
    %28 = arith.divf %27, %23 : vector<2x16x1xf32>
    %c3_i32 = arith.constant 3 : i32
    %29 = vector.broadcast %c3_i32 : i32 to vector<2x16x16xi32>
    %30 = arith.cmpi eq, %2, %29 : vector<2x16x16xi32>
    %31 = arith.extui %30 : vector<2x16x16xi1> to vector<2x16x16xi32>
    %32 = arith.sitofp %31 : vector<2x16x16xi32> to vector<2x16x16xf32>
    %cst_13 = arith.constant dense<0.000000e+00> : vector<2x16xf32>
    %33 = vector.multi_reduction <add>, %32, %cst_13 [2] : vector<2x16x16xf32> to vector<2x16xf32>
    %34 = vector.shape_cast %33 : vector<2x16xf32> to vector<2x16x1xf32>
    %cst_14 = arith.constant 1.000000e+00 : f32
    %35 = vector.broadcast %cst_14 : f32 to vector<2x16x1xf32>
    %36 = arith.maximumf %34, %35 : vector<2x16x1xf32>
    %37 = arith.extui %30 : vector<2x16x16xi1> to vector<2x16x16xi32>
    %38 = arith.sitofp %37 : vector<2x16x16xi32> to vector<2x16x16xf32>
    %39 = arith.truncf %38 : vector<2x16x16xf32> to vector<2x16x16xbf16>
    %cst_15 = arith.constant 1.000000e+00 : f32
    %40 = vector.broadcast %cst_15 : f32 to vector<2x16x1xf32>
    %41 = arith.divf %40, %36 : vector<2x16x1xf32>
    %42 = arith.truncf %0 : vector<2x16x128xf32> to vector<2x16x128xbf16>
    %43 = vector.shape_cast %42 : vector<2x16x128xbf16> to vector<32x128xbf16>
    %c0_16 = arith.constant 0 : index
    %c0_17 = arith.constant 0 : index
    %c0_18 = arith.constant 0 : index
    %44 = vector.load %arg3[%c0_16, %c0_17, %c0_18] : memref<2x128x128xbf16, #tpu.memory_space<vmem>>, vector<1x128x128xbf16>
    %45 = vector.shape_cast %44 : vector<1x128x128xbf16> to vector<128x128xbf16>
    %cst_19 = arith.constant dense<0.000000e+00> : vector<32x128xf32>
    %46 = tpu.matmul %43, %45, %cst_19 {dimension_numbers = #tpu.dot_dimension_numbers<[1], [0], [0], [1], [0, 0, 1, 1], [], []>} : vector<32x128xbf16>, vector<128x128xbf16>, vector<32x128xf32> -> vector<32x128xf32>
    %c0_20 = arith.constant 0 : index
    %c0_21 = arith.constant 0 : index
    %c0_22 = arith.constant 0 : index
    %47 = vector.load %arg4[%c0_20, %c0_21, %c0_22] : memref<2x1x128xf32, #tpu.memory_space<vmem>>, vector<1x1x128xf32>
    %48 = vector.shape_cast %47 : vector<1x1x128xf32> to vector<1x128xf32>
    %49 = vector.broadcast %48 : vector<1x128xf32> to vector<32x128xf32>
    %50 = arith.addf %46, %49 : vector<32x128xf32>
    %c0_23 = arith.constant 0 : index
    %c0_24 = arith.constant 0 : index
    %c0_25 = arith.constant 0 : index
    %51 = vector.load %arg5[%c0_23, %c0_24, %c0_25] : memref<2x128x384xbf16, #tpu.memory_space<vmem>>, vector<1x128x384xbf16>
    %52 = vector.shape_cast %51 : vector<1x128x384xbf16> to vector<128x384xbf16>
    %cst_26 = arith.constant dense<0.000000e+00> : vector<32x384xf32>
    %53 = tpu.matmul %43, %52, %cst_26 {dimension_numbers = #tpu.dot_dimension_numbers<[1], [0], [0], [1], [0, 0, 1, 1], [], []>} : vector<32x128xbf16>, vector<128x384xbf16>, vector<32x384xf32> -> vector<32x384xf32>
    %c0_27 = arith.constant 0 : index
    %c0_28 = arith.constant 0 : index
    %c0_29 = arith.constant 0 : index
    %54 = vector.load %arg6[%c0_27, %c0_28, %c0_29] : memref<2x1x384xf32, #tpu.memory_space<vmem>>, vector<1x1x384xf32>
    %55 = vector.shape_cast %54 : vector<1x1x384xf32> to vector<1x384xf32>
    %56 = vector.broadcast %55 : vector<1x384xf32> to vector<32x384xf32>
    %57 = arith.addf %53, %56 : vector<32x384xf32>
    %58 = vector.shape_cast %50 : vector<32x128xf32> to vector<2x16x128xf32>
    %59 = vector.shape_cast %57 : vector<32x384xf32> to vector<2x16x384xf32>
    %60 = vector.extract_strided_slice %59 {offsets = [0, 0, 0], sizes = [2, 16, 128], strides = [1, 1, 1]} : vector<2x16x384xf32> to vector<2x16x128xf32>
    %61 = arith.truncf %60 : vector<2x16x128xf32> to vector<2x16x128xbf16>
    "tpu.trace_start"() <{level = 10 : i32, message = "bmn,bnd->bmd"}> : () -> ()
    %cst_30 = arith.constant dense<0.000000e+00> : vector<2x16x128xf32>
    %62 = tpu.matmul %13, %61, %cst_30 {dimension_numbers = #tpu.dot_dimension_numbers<[2], [1], [1], [2], [0, 0, 0, 1, 1, 2], [0], [0]>} : vector<2x16x16xbf16>, vector<2x16x128xbf16>, vector<2x16x128xf32> -> vector<2x16x128xf32>
    "tpu.trace_stop"() : () -> ()
    %63 = vector.broadcast %15 : vector<2x16x1xf32> to vector<2x16x128xf32>
    %64 = arith.mulf %62, %63 : vector<2x16x128xf32>
    %65 = arith.addf %58, %64 : vector<2x16x128xf32>
    %66 = vector.extract_strided_slice %59 {offsets = [0, 0, 128], sizes = [2, 16, 128], strides = [1, 1, 1]} : vector<2x16x384xf32> to vector<2x16x128xf32>
    %67 = arith.truncf %66 : vector<2x16x128xf32> to vector<2x16x128xbf16>
    "tpu.trace_start"() <{level = 10 : i32, message = "bmn,bnd->bmd"}> : () -> ()
    %cst_31 = arith.constant dense<0.000000e+00> : vector<2x16x128xf32>
    %68 = tpu.matmul %26, %67, %cst_31 {dimension_numbers = #tpu.dot_dimension_numbers<[2], [1], [1], [2], [0, 0, 0, 1, 1, 2], [0], [0]>} : vector<2x16x16xbf16>, vector<2x16x128xbf16>, vector<2x16x128xf32> -> vector<2x16x128xf32>
    "tpu.trace_stop"() : () -> ()
    %69 = vector.broadcast %28 : vector<2x16x1xf32> to vector<2x16x128xf32>
    %70 = arith.mulf %68, %69 : vector<2x16x128xf32>
    %71 = arith.addf %65, %70 : vector<2x16x128xf32>
    %72 = vector.extract_strided_slice %59 {offsets = [0, 0, 256], sizes = [2, 16, 128], strides = [1, 1, 1]} : vector<2x16x384xf32> to vector<2x16x128xf32>
    %73 = arith.truncf %72 : vector<2x16x128xf32> to vector<2x16x128xbf16>
    "tpu.trace_start"() <{level = 10 : i32, message = "bmn,bnd->bmd"}> : () -> ()
    %cst_32 = arith.constant dense<0.000000e+00> : vector<2x16x128xf32>
    %74 = tpu.matmul %39, %73, %cst_32 {dimension_numbers = #tpu.dot_dimension_numbers<[2], [1], [1], [2], [0, 0, 0, 1, 1, 2], [0], [0]>} : vector<2x16x16xbf16>, vector<2x16x128xbf16>, vector<2x16x128xf32> -> vector<2x16x128xf32>
    "tpu.trace_stop"() : () -> ()
    %75 = vector.broadcast %41 : vector<2x16x1xf32> to vector<2x16x128xf32>
    %76 = arith.mulf %74, %75 : vector<2x16x128xf32>
    %77 = arith.addf %71, %76 : vector<2x16x128xf32>
    %cst_33 = arith.constant 0.000000e+00 : f32
    %78 = vector.broadcast %cst_33 : f32 to vector<2x16x128xf32>
    %79 = arith.maximumf %77, %78 : vector<2x16x128xf32>
    %c0_34 = arith.constant 0 : index
    %c0_35 = arith.constant 0 : index
    %c128 = arith.constant 128 : index
    %80 = vector.load %arg7[%c0_34, %c0_35, %c128] : memref<2x16x384xf32, #tpu.memory_space<vmem>>, vector<2x16x128xf32>
    tpu.vector_store %arg7[%c0_34, %c0_35, %c128], %79 {strides = array<i32>} : memref<2x16x384xf32, #tpu.memory_space<vmem>>, vector<2x16x128xf32>,
    %81 = arith.truncf %79 : vector<2x16x128xf32> to vector<2x16x128xbf16>
    %82 = vector.shape_cast %81 : vector<2x16x128xbf16> to vector<32x128xbf16>
    %c1 = arith.constant 1 : index
    %c0_36 = arith.constant 0 : index
    %c0_37 = arith.constant 0 : index
    %83 = vector.load %arg3[%c1, %c0_36, %c0_37] : memref<2x128x128xbf16, #tpu.memory_space<vmem>>, vector<1x128x128xbf16>
    %84 = vector.shape_cast %83 : vector<1x128x128xbf16> to vector<128x128xbf16>
    %cst_38 = arith.constant dense<0.000000e+00> : vector<32x128xf32>
    %85 = tpu.matmul %82, %84, %cst_38 {dimension_numbers = #tpu.dot_dimension_numbers<[1], [0], [0], [1], [0, 0, 1, 1], [], []>} : vector<32x128xbf16>, vector<128x128xbf16>, vector<32x128xf32> -> vector<32x128xf32>
    %c1_39 = arith.constant 1 : index
    %c0_40 = arith.constant 0 : index
    %c0_41 = arith.constant 0 : index
    %86 = vector.load %arg4[%c1_39, %c0_40, %c0_41] : memref<2x1x128xf32, #tpu.memory_space<vmem>>, vector<1x1x128xf32>
    %87 = vector.shape_cast %86 : vector<1x1x128xf32> to vector<1x128xf32>
    %88 = vector.broadcast %87 : vector<1x128xf32> to vector<32x128xf32>
    %89 = arith.addf %85, %88 : vector<32x128xf32>
    %c1_42 = arith.constant 1 : index
    %c0_43 = arith.constant 0 : index
    %c0_44 = arith.constant 0 : index
    %90 = vector.load %arg5[%c1_42, %c0_43, %c0_44] : memref<2x128x384xbf16, #tpu.memory_space<vmem>>, vector<1x128x384xbf16>
    %91 = vector.shape_cast %90 : vector<1x128x384xbf16> to vector<128x384xbf16>
    %cst_45 = arith.constant dense<0.000000e+00> : vector<32x384xf32>
    %92 = tpu.matmul %82, %91, %cst_45 {dimension_numbers = #tpu.dot_dimension_numbers<[1], [0], [0], [1], [0, 0, 1, 1], [], []>} : vector<32x128xbf16>, vector<128x384xbf16>, vector<32x384xf32> -> vector<32x384xf32>
    %c1_46 = arith.constant 1 : index
    %c0_47 = arith.constant 0 : index
    %c0_48 = arith.constant 0 : index
    %93 = vector.load %arg6[%c1_46, %c0_47, %c0_48] : memref<2x1x384xf32, #tpu.memory_space<vmem>>, vector<1x1x384xf32>
    %94 = vector.shape_cast %93 : vector<1x1x384xf32> to vector<1x384xf32>
    %95 = vector.broadcast %94 : vector<1x384xf32> to vector<32x384xf32>
    %96 = arith.addf %92, %95 : vector<32x384xf32>
    %97 = vector.shape_cast %89 : vector<32x128xf32> to vector<2x16x128xf32>
    %98 = vector.shape_cast %96 : vector<32x384xf32> to vector<2x16x384xf32>
    %99 = vector.extract_strided_slice %98 {offsets = [0, 0, 0], sizes = [2, 16, 128], strides = [1, 1, 1]} : vector<2x16x384xf32> to vector<2x16x128xf32>
    %100 = arith.truncf %99 : vector<2x16x128xf32> to vector<2x16x128xbf16>
    "tpu.trace_start"() <{level = 10 : i32, message = "bmn,bnd->bmd"}> : () -> ()
    %cst_49 = arith.constant dense<0.000000e+00> : vector<2x16x128xf32>
    %101 = tpu.matmul %13, %100, %cst_49 {dimension_numbers = #tpu.dot_dimension_numbers<[2], [1], [1], [2], [0, 0, 0, 1, 1, 2], [0], [0]>} : vector<2x16x16xbf16>, vector<2x16x128xbf16>, vector<2x16x128xf32> -> vector<2x16x128xf32>
    "tpu.trace_stop"() : () -> ()
    %102 = vector.broadcast %15 : vector<2x16x1xf32> to vector<2x16x128xf32>
    %103 = arith.mulf %101, %102 : vector<2x16x128xf32>
    %104 = arith.addf %97, %103 : vector<2x16x128xf32>
    %105 = vector.extract_strided_slice %98 {offsets = [0, 0, 128], sizes = [2, 16, 128], strides = [1, 1, 1]} : vector<2x16x384xf32> to vector<2x16x128xf32>
    %106 = arith.truncf %105 : vector<2x16x128xf32> to vector<2x16x128xbf16>
    "tpu.trace_start"() <{level = 10 : i32, message = "bmn,bnd->bmd"}> : () -> ()
    %cst_50 = arith.constant dense<0.000000e+00> : vector<2x16x128xf32>
    %107 = tpu.matmul %26, %106, %cst_50 {dimension_numbers = #tpu.dot_dimension_numbers<[2], [1], [1], [2], [0, 0, 0, 1, 1, 2], [0], [0]>} : vector<2x16x16xbf16>, vector<2x16x128xbf16>, vector<2x16x128xf32> -> vector<2x16x128xf32>
    "tpu.trace_stop"() : () -> ()
    %108 = vector.broadcast %28 : vector<2x16x1xf32> to vector<2x16x128xf32>
    %109 = arith.mulf %107, %108 : vector<2x16x128xf32>
    %110 = arith.addf %104, %109 : vector<2x16x128xf32>
    %111 = vector.extract_strided_slice %98 {offsets = [0, 0, 256], sizes = [2, 16, 128], strides = [1, 1, 1]} : vector<2x16x384xf32> to vector<2x16x128xf32>
    %112 = arith.truncf %111 : vector<2x16x128xf32> to vector<2x16x128xbf16>
    "tpu.trace_start"() <{level = 10 : i32, message = "bmn,bnd->bmd"}> : () -> ()
    %cst_51 = arith.constant dense<0.000000e+00> : vector<2x16x128xf32>
    %113 = tpu.matmul %39, %112, %cst_51 {dimension_numbers = #tpu.dot_dimension_numbers<[2], [1], [1], [2], [0, 0, 0, 1, 1, 2], [0], [0]>} : vector<2x16x16xbf16>, vector<2x16x128xbf16>, vector<2x16x128xf32> -> vector<2x16x128xf32>
    "tpu.trace_stop"() : () -> ()
    %114 = vector.broadcast %41 : vector<2x16x1xf32> to vector<2x16x128xf32>
    %115 = arith.mulf %113, %114 : vector<2x16x128xf32>
    %116 = arith.addf %110, %115 : vector<2x16x128xf32>
    %cst_52 = arith.constant 0.000000e+00 : f32
    %117 = vector.broadcast %cst_52 : f32 to vector<2x16x128xf32>
    %118 = arith.maximumf %116, %117 : vector<2x16x128xf32>
    %c0_53 = arith.constant 0 : index
    %c0_54 = arith.constant 0 : index
    %c256 = arith.constant 256 : index
    %119 = vector.load %arg7[%c0_53, %c0_54, %c256] : memref<2x16x384xf32, #tpu.memory_space<vmem>>, vector<2x16x128xf32>
    tpu.vector_store %arg7[%c0_53, %c0_54, %c256], %118 {strides = array<i32>} : memref<2x16x384xf32, #tpu.memory_space<vmem>>, vector<2x16x128xf32>,
    return
  }
  func.func @transform_0(%arg0: i32) -> (i32, i32, i32) {
    %c0_i32 = arith.constant 0 : i32
    %c0_i32_0 = arith.constant 0 : i32
    %c0_i32_1 = arith.constant 0 : i32
    return %arg0, %c0_i32, %c0_i32_0 : i32, i32, i32
  }
  func.func @transform_1(%arg0: i32) -> (i32, i32, i32) {
    %c0_i32 = arith.constant 0 : i32
    %c0_i32_0 = arith.constant 0 : i32
    %c0_i32_1 = arith.constant 0 : i32
    return %arg0, %c0_i32, %c0_i32_0 : i32, i32, i32
  }
  func.func @transform_2(%arg0: i32) -> (i32, i32, i32) {
    %c0_i32 = arith.constant 0 : i32
    %c0_i32_0 = arith.constant 0 : i32
    %c0_i32_1 = arith.constant 0 : i32
    %c0_i32_2 = arith.constant 0 : i32
    return %c0_i32, %c0_i32_0, %c0_i32_1 : i32, i32, i32
  }
  func.func @transform_3(%arg0: i32) -> (i32, i32, i32) {
    %c0_i32 = arith.constant 0 : i32
    %c0_i32_0 = arith.constant 0 : i32
    %c0_i32_1 = arith.constant 0 : i32
    %c0_i32_2 = arith.constant 0 : i32
    return %c0_i32, %c0_i32_0, %c0_i32_1 : i32, i32, i32
  }
  func.func @transform_4(%arg0: i32) -> (i32, i32, i32) {
    %c0_i32 = arith.constant 0 : i32
    %c0_i32_0 = arith.constant 0 : i32
    %c0_i32_1 = arith.constant 0 : i32
    %c0_i32_2 = arith.constant 0 : i32
    return %c0_i32, %c0_i32_0, %c0_i32_1 : i32, i32, i32
  }
  func.func @transform_5(%arg0: i32) -> (i32, i32, i32) {
    %c0_i32 = arith.constant 0 : i32
    %c0_i32_0 = arith.constant 0 : i32
    %c0_i32_1 = arith.constant 0 : i32
    %c0_i32_2 = arith.constant 0 : i32
    return %c0_i32, %c0_i32_0, %c0_i32_1 : i32, i32, i32
  }
  func.func @transform_6(%arg0: i32) -> (i32, i32, i32) {
    %c0_i32 = arith.constant 0 : i32
    %c0_i32_0 = arith.constant 0 : i32
    %c0_i32_1 = arith.constant 0 : i32
    return %arg0, %c0_i32, %c0_i32_0 : i32, i32, i32
  }
}

module attributes {stable_mosaic.version = 11 : i64} {
  func.func @graph_reason_kernel(%arg0: i32, %arg1: memref<2x16x128xf32, #tpu.memory_space<vmem>>, %arg2: memref<2x16x16xi32, #tpu.memory_space<vmem>>, %arg3: memref<2x128x128xbf16, #tpu.memory_space<vmem>>, %arg4: memref<2x1x128xf32, #tpu.memory_space<vmem>>, %arg5: memref<2x128x384xbf16, #tpu.memory_space<vmem>>, %arg6: memref<2x1x384xf32, #tpu.memory_space<vmem>>, %arg7: memref<2x16x384xf32, #tpu.memory_space<vmem>>) attributes {dimension_semantics = [#tpu.dimension_semantics<parallel>], iteration_bounds = array<i64: 1>, scalar_prefetch = 0 : i64, scratch_operands = 0 : i64, tpu.core_type = #tpu.core_type<tc>, window_params = [{transform_indices = @transform_0, window_bounds = array<i64: 2, 16, 128>}, {transform_indices = @transform_1, window_bounds = array<i64: 2, 16, 16>}, {pipeline_mode = #tpu.pipeline_mode<synchronous>, transform_indices = @transform_2, window_bounds = array<i64: 2, 128, 128>}, {pipeline_mode = #tpu.pipeline_mode<synchronous>, transform_indices = @transform_3, window_bounds = array<i64: 2, 1, 128>}, {pipeline_mode = #tpu.pipeline_mode<synchronous>, transform_indices = @transform_4, window_bounds = array<i64: 2, 128, 384>}, {pipeline_mode = #tpu.pipeline_mode<synchronous>, transform_indices = @transform_5, window_bounds = array<i64: 2, 1, 384>}, {transform_indices = @transform_6, window_bounds = array<i64: 2, 16, 384>}]} {
    %c0 = arith.constant 0 : index
    %c0_0 = arith.constant 0 : index
    %c0_1 = arith.constant 0 : index
    %0 = vector.load %arg1[%c0, %c0_0, %c0_1] : memref<2x16x128xf32, #tpu.memory_space<vmem>>, vector<2x16x128xf32>
    %c0_2 = arith.constant 0 : index
    %c0_3 = arith.constant 0 : index
    %c0_4 = arith.constant 0 : index
    %1 = vector.load %arg7[%c0_2, %c0_3, %c0_4] : memref<2x16x384xf32, #tpu.memory_space<vmem>>, vector<2x16x128xf32>
    tpu.vector_store %arg7[%c0_2, %c0_3, %c0_4], %0 {strides = array<i32>} : memref<2x16x384xf32, #tpu.memory_space<vmem>>, vector<2x16x128xf32>,
    %c0_5 = arith.constant 0 : index
    %c0_6 = arith.constant 0 : index
    %c0_7 = arith.constant 0 : index
    %2 = vector.load %arg2[%c0_5, %c0_6, %c0_7] : memref<2x16x16xi32, #tpu.memory_space<vmem>>, vector<2x16x16xi32>
    %c1_i32 = arith.constant 1 : i32
    %3 = vector.broadcast %c1_i32 : i32 to vector<2x16x16xi32>
    %4 = arith.cmpi eq, %2, %3 : vector<2x16x16xi32>
    %5 = arith.extui %4 : vector<2x16x16xi1> to vector<2x16x16xi32>
    %6 = arith.sitofp %5 : vector<2x16x16xi32> to vector<2x16x16xf32>
    %cst = arith.constant dense<0.000000e+00> : vector<2x16xf32>
    %7 = vector.multi_reduction <add>, %6, %cst [2] : vector<2x16x16xf32> to vector<2x16xf32>
    %8 = vector.shape_cast %7 : vector<2x16xf32> to vector<2x16x1xf32>
    %cst_8 = arith.constant 1.000000e+00 : f32
    %9 = vector.broadcast %cst_8 : f32 to vector<2x16x1xf32>
    %10 = arith.maximumf %8, %9 : vector<2x16x1xf32>
    %11 = arith.extui %4 : vector<2x16x16xi1> to vector<2x16x16xi32>
    %12 = arith.sitofp %11 : vector<2x16x16xi32> to vector<2x16x16xf32>
    %13 = arith.truncf %12 : vector<2x16x16xf32> to vector<2x16x16xbf16>
    %cst_9 = arith.constant 1.000000e+00 : f32
    %14 = vector.broadcast %cst_9 : f32 to vector<2x16x1xf32>
    %15 = arith.divf %14, %10 : vector<2x16x1xf32>
    %c2_i32 = arith.constant 2 : i32
    %16 = vector.broadcast %c2_i32 : i32 to vector<2x16x16xi32>
    %17 = arith.cmpi eq, %2, %16 : vector<2x16x16xi32>
    %18 = arith.extui %17 : vector<2x16x16xi1> to vector<2x16x16xi32>
    %19 = arith.sitofp %18 : vector<2x16x16xi32> to vector<2x16x16xf32>
    %cst_10 = arith.constant dense<0.000000e+00> : vector<2x16xf32>
    %20 = vector.multi_reduction <add>, %19, %cst_10 [2] : vector<2x16x16xf32> to vector<2x16xf32>
    %21 = vector.shape_cast %20 : vector<2x16xf32> to vector<2x16x1xf32>
    %cst_11 = arith.constant 1.000000e+00 : f32
    %22 = vector.broadcast %cst_11 : f32 to vector<2x16x1xf32>
    %23 = arith.maximumf %21, %22 : vector<2x16x1xf32>
    %24 = arith.extui %17 : vector<2x16x16xi1> to vector<2x16x16xi32>
    %25 = arith.sitofp %24 : vector<2x16x16xi32> to vector<2x16x16xf32>
    %26 = arith.truncf %25 : vector<2x16x16xf32> to vector<2x16x16xbf16>
    %cst_12 = arith.constant 1.000000e+00 : f32
    %27 = vector.broadcast %cst_12 : f32 to vector<2x16x1xf32>
    %28 = arith.divf %27, %23 : vector<2x16x1xf32>
    %c3_i32 = arith.constant 3 : i32
    %29 = vector.broadcast %c3_i32 : i32 to vector<2x16x16xi32>
    %30 = arith.cmpi eq, %2, %29 : vector<2x16x16xi32>
    %31 = arith.extui %30 : vector<2x16x16xi1> to vector<2x16x16xi32>
    %32 = arith.sitofp %31 : vector<2x16x16xi32> to vector<2x16x16xf32>
    %cst_13 = arith.constant dense<0.000000e+00> : vector<2x16xf32>
    %33 = vector.multi_reduction <add>, %32, %cst_13 [2] : vector<2x16x16xf32> to vector<2x16xf32>
    %34 = vector.shape_cast %33 : vector<2x16xf32> to vector<2x16x1xf32>
    %cst_14 = arith.constant 1.000000e+00 : f32
    %35 = vector.broadcast %cst_14 : f32 to vector<2x16x1xf32>
    %36 = arith.maximumf %34, %35 : vector<2x16x1xf32>
    %37 = arith.extui %30 : vector<2x16x16xi1> to vector<2x16x16xi32>
    %38 = arith.sitofp %37 : vector<2x16x16xi32> to vector<2x16x16xf32>
    %39 = arith.truncf %38 : vector<2x16x16xf32> to vector<2x16x16xbf16>
    %cst_15 = arith.constant 1.000000e+00 : f32
    %40 = vector.broadcast %cst_15 : f32 to vector<2x16x1xf32>
    %41 = arith.divf %40, %36 : vector<2x16x1xf32>
    %42 = arith.truncf %0 : vector<2x16x128xf32> to vector<2x16x128xbf16>
    %43 = vector.shape_cast %42 : vector<2x16x128xbf16> to vector<32x128xbf16>
    %c0_16 = arith.constant 0 : index
    %c0_17 = arith.constant 0 : index
    %c0_18 = arith.constant 0 : index
    %44 = vector.load %arg3[%c0_16, %c0_17, %c0_18] : memref<2x128x128xbf16, #tpu.memory_space<vmem>>, vector<1x128x128xbf16>
    %45 = vector.shape_cast %44 : vector<1x128x128xbf16> to vector<128x128xbf16>
    %cst_19 = arith.constant dense<0.000000e+00> : vector<32x128xf32>
    %46 = tpu.matmul %43, %45, %cst_19 {dimension_numbers = #tpu.dot_dimension_numbers<[1], [0], [0], [1], [0, 0, 1, 1], [], []>} : vector<32x128xbf16>, vector<128x128xbf16>, vector<32x128xf32> -> vector<32x128xf32>
    %c0_20 = arith.constant 0 : index
    %c0_21 = arith.constant 0 : index
    %c0_22 = arith.constant 0 : index
    %47 = vector.load %arg4[%c0_20, %c0_21, %c0_22] : memref<2x1x128xf32, #tpu.memory_space<vmem>>, vector<1x1x128xf32>
    %48 = vector.shape_cast %47 : vector<1x1x128xf32> to vector<1x128xf32>
    %49 = vector.broadcast %48 : vector<1x128xf32> to vector<32x128xf32>
    %50 = arith.addf %46, %49 : vector<32x128xf32>
    %c0_23 = arith.constant 0 : index
    %c0_24 = arith.constant 0 : index
    %c0_25 = arith.constant 0 : index
    %51 = vector.load %arg5[%c0_23, %c0_24, %c0_25] : memref<2x128x384xbf16, #tpu.memory_space<vmem>>, vector<1x128x384xbf16>
    %52 = vector.shape_cast %51 : vector<1x128x384xbf16> to vector<128x384xbf16>
    %cst_26 = arith.constant dense<0.000000e+00> : vector<32x384xf32>
    %53 = tpu.matmul %43, %52, %cst_26 {dimension_numbers = #tpu.dot_dimension_numbers<[1], [0], [0], [1], [0, 0, 1, 1], [], []>} : vector<32x128xbf16>, vector<128x384xbf16>, vector<32x384xf32> -> vector<32x384xf32>
    %c0_27 = arith.constant 0 : index
    %c0_28 = arith.constant 0 : index
    %c0_29 = arith.constant 0 : index
    %54 = vector.load %arg6[%c0_27, %c0_28, %c0_29] : memref<2x1x384xf32, #tpu.memory_space<vmem>>, vector<1x1x384xf32>
    %55 = vector.shape_cast %54 : vector<1x1x384xf32> to vector<1x384xf32>
    %56 = vector.broadcast %55 : vector<1x384xf32> to vector<32x384xf32>
    %57 = arith.addf %53, %56 : vector<32x384xf32>
    %58 = vector.shape_cast %50 : vector<32x128xf32> to vector<2x16x128xf32>
    %59 = vector.shape_cast %57 : vector<32x384xf32> to vector<2x16x384xf32>
    %60 = vector.extract_strided_slice %59 {offsets = [0, 0, 0], sizes = [2, 16, 128], strides = [1, 1, 1]} : vector<2x16x384xf32> to vector<2x16x128xf32>
    %61 = arith.truncf %60 : vector<2x16x128xf32> to vector<2x16x128xbf16>
    "tpu.trace_start"() <{level = 10 : i32, message = "bmn,bnd->bmd"}> : () -> ()
    %cst_30 = arith.constant dense<0.000000e+00> : vector<2x16x128xf32>
    %62 = tpu.matmul %13, %61, %cst_30 {dimension_numbers = #tpu.dot_dimension_numbers<[2], [1], [1], [2], [0, 0, 0, 1, 1, 2], [0], [0]>} : vector<2x16x16xbf16>, vector<2x16x128xbf16>, vector<2x16x128xf32> -> vector<2x16x128xf32>
    "tpu.trace_stop"() : () -> ()
    %63 = vector.broadcast %15 : vector<2x16x1xf32> to vector<2x16x128xf32>
    %64 = arith.mulf %62, %63 : vector<2x16x128xf32>
    %65 = arith.addf %58, %64 : vector<2x16x128xf32>
    %66 = vector.extract_strided_slice %59 {offsets = [0, 0, 128], sizes = [2, 16, 128], strides = [1, 1, 1]} : vector<2x16x384xf32> to vector<2x16x128xf32>
    %67 = arith.truncf %66 : vector<2x16x128xf32> to vector<2x16x128xbf16>
    "tpu.trace_start"() <{level = 10 : i32, message = "bmn,bnd->bmd"}> : () -> ()
    %cst_31 = arith.constant dense<0.000000e+00> : vector<2x16x128xf32>
    %68 = tpu.matmul %26, %67, %cst_31 {dimension_numbers = #tpu.dot_dimension_numbers<[2], [1], [1], [2], [0, 0, 0, 1, 1, 2], [0], [0]>} : vector<2x16x16xbf16>, vector<2x16x128xbf16>, vector<2x16x128xf32> -> vector<2x16x128xf32>
    "tpu.trace_stop"() : () -> ()
    %69 = vector.broadcast %28 : vector<2x16x1xf32> to vector<2x16x128xf32>
    %70 = arith.mulf %68, %69 : vector<2x16x128xf32>
    %71 = arith.addf %65, %70 : vector<2x16x128xf32>
    %72 = vector.extract_strided_slice %59 {offsets = [0, 0, 256], sizes = [2, 16, 128], strides = [1, 1, 1]} : vector<2x16x384xf32> to vector<2x16x128xf32>
    %73 = arith.truncf %72 : vector<2x16x128xf32> to vector<2x16x128xbf16>
    "tpu.trace_start"() <{level = 10 : i32, message = "bmn,bnd->bmd"}> : () -> ()
    %cst_32 = arith.constant dense<0.000000e+00> : vector<2x16x128xf32>
    %74 = tpu.matmul %39, %73, %cst_32 {dimension_numbers = #tpu.dot_dimension_numbers<[2], [1], [1], [2], [0, 0, 0, 1, 1, 2], [0], [0]>} : vector<2x16x16xbf16>, vector<2x16x128xbf16>, vector<2x16x128xf32> -> vector<2x16x128xf32>
    "tpu.trace_stop"() : () -> ()
    %75 = vector.broadcast %41 : vector<2x16x1xf32> to vector<2x16x128xf32>
    %76 = arith.mulf %74, %75 : vector<2x16x128xf32>
    %77 = arith.addf %71, %76 : vector<2x16x128xf32>
    %cst_33 = arith.constant 0.000000e+00 : f32
    %78 = vector.broadcast %cst_33 : f32 to vector<2x16x128xf32>
    %79 = arith.maximumf %77, %78 : vector<2x16x128xf32>
    %c0_34 = arith.constant 0 : index
    %c0_35 = arith.constant 0 : index
    %c128 = arith.constant 128 : index
    %80 = vector.load %arg7[%c0_34, %c0_35, %c128] : memref<2x16x384xf32, #tpu.memory_space<vmem>>, vector<2x16x128xf32>
    tpu.vector_store %arg7[%c0_34, %c0_35, %c128], %79 {strides = array<i32>} : memref<2x16x384xf32, #tpu.memory_space<vmem>>, vector<2x16x128xf32>,
    %81 = arith.truncf %79 : vector<2x16x128xf32> to vector<2x16x128xbf16>
    %82 = vector.shape_cast %81 : vector<2x16x128xbf16> to vector<32x128xbf16>
    %c1 = arith.constant 1 : index
    %c0_36 = arith.constant 0 : index
    %c0_37 = arith.constant 0 : index
    %83 = vector.load %arg3[%c1, %c0_36, %c0_37] : memref<2x128x128xbf16, #tpu.memory_space<vmem>>, vector<1x128x128xbf16>
    %84 = vector.shape_cast %83 : vector<1x128x128xbf16> to vector<128x128xbf16>
    %cst_38 = arith.constant dense<0.000000e+00> : vector<32x128xf32>
    %85 = tpu.matmul %82, %84, %cst_38 {dimension_numbers = #tpu.dot_dimension_numbers<[1], [0], [0], [1], [0, 0, 1, 1], [], []>} : vector<32x128xbf16>, vector<128x128xbf16>, vector<32x128xf32> -> vector<32x128xf32>
    %c1_39 = arith.constant 1 : index
    %c0_40 = arith.constant 0 : index
    %c0_41 = arith.constant 0 : index
    %86 = vector.load %arg4[%c1_39, %c0_40, %c0_41] : memref<2x1x128xf32, #tpu.memory_space<vmem>>, vector<1x1x128xf32>
    %87 = vector.shape_cast %86 : vector<1x1x128xf32> to vector<1x128xf32>
    %88 = vector.broadcast %87 : vector<1x128xf32> to vector<32x128xf32>
    %89 = arith.addf %85, %88 : vector<32x128xf32>
    %c1_42 = arith.constant 1 : index
    %c0_43 = arith.constant 0 : index
    %c0_44 = arith.constant 0 : index
    %90 = vector.load %arg5[%c1_42, %c0_43, %c0_44] : memref<2x128x384xbf16, #tpu.memory_space<vmem>>, vector<1x128x384xbf16>
    %91 = vector.shape_cast %90 : vector<1x128x384xbf16> to vector<128x384xbf16>
    %cst_45 = arith.constant dense<0.000000e+00> : vector<32x384xf32>
    %92 = tpu.matmul %82, %91, %cst_45 {dimension_numbers = #tpu.dot_dimension_numbers<[1], [0], [0], [1], [0, 0, 1, 1], [], []>} : vector<32x128xbf16>, vector<128x384xbf16>, vector<32x384xf32> -> vector<32x384xf32>
    %c1_46 = arith.constant 1 : index
    %c0_47 = arith.constant 0 : index
    %c0_48 = arith.constant 0 : index
    %93 = vector.load %arg6[%c1_46, %c0_47, %c0_48] : memref<2x1x384xf32, #tpu.memory_space<vmem>>, vector<1x1x384xf32>
    %94 = vector.shape_cast %93 : vector<1x1x384xf32> to vector<1x384xf32>
    %95 = vector.broadcast %94 : vector<1x384xf32> to vector<32x384xf32>
    %96 = arith.addf %92, %95 : vector<32x384xf32>
    %97 = vector.shape_cast %89 : vector<32x128xf32> to vector<2x16x128xf32>
    %98 = vector.shape_cast %96 : vector<32x384xf32> to vector<2x16x384xf32>
    %99 = vector.extract_strided_slice %98 {offsets = [0, 0, 0], sizes = [2, 16, 128], strides = [1, 1, 1]} : vector<2x16x384xf32> to vector<2x16x128xf32>
    %100 = arith.truncf %99 : vector<2x16x128xf32> to vector<2x16x128xbf16>
    "tpu.trace_start"() <{level = 10 : i32, message = "bmn,bnd->bmd"}> : () -> ()
    %cst_49 = arith.constant dense<0.000000e+00> : vector<2x16x128xf32>
    %101 = tpu.matmul %13, %100, %cst_49 {dimension_numbers = #tpu.dot_dimension_numbers<[2], [1], [1], [2], [0, 0, 0, 1, 1, 2], [0], [0]>} : vector<2x16x16xbf16>, vector<2x16x128xbf16>, vector<2x16x128xf32> -> vector<2x16x128xf32>
    "tpu.trace_stop"() : () -> ()
    %102 = vector.broadcast %15 : vector<2x16x1xf32> to vector<2x16x128xf32>
    %103 = arith.mulf %101, %102 : vector<2x16x128xf32>
    %104 = arith.addf %97, %103 : vector<2x16x128xf32>
    %105 = vector.extract_strided_slice %98 {offsets = [0, 0, 128], sizes = [2, 16, 128], strides = [1, 1, 1]} : vector<2x16x384xf32> to vector<2x16x128xf32>
    %106 = arith.truncf %105 : vector<2x16x128xf32> to vector<2x16x128xbf16>
    "tpu.trace_start"() <{level = 10 : i32, message = "bmn,bnd->bmd"}> : () -> ()
    %cst_50 = arith.constant dense<0.000000e+00> : vector<2x16x128xf32>
    %107 = tpu.matmul %26, %106, %cst_50 {dimension_numbers = #tpu.dot_dimension_numbers<[2], [1], [1], [2], [0, 0, 0, 1, 1, 2], [0], [0]>} : vector<2x16x16xbf16>, vector<2x16x128xbf16>, vector<2x16x128xf32> -> vector<2x16x128xf32>
    "tpu.trace_stop"() : () -> ()
    %108 = vector.broadcast %28 : vector<2x16x1xf32> to vector<2x16x128xf32>
    %109 = arith.mulf %107, %108 : vector<2x16x128xf32>
    %110 = arith.addf %104, %109 : vector<2x16x128xf32>
    %111 = vector.extract_strided_slice %98 {offsets = [0, 0, 256], sizes = [2, 16, 128], strides = [1, 1, 1]} : vector<2x16x384xf32> to vector<2x16x128xf32>
    %112 = arith.truncf %111 : vector<2x16x128xf32> to vector<2x16x128xbf16>
    "tpu.trace_start"() <{level = 10 : i32, message = "bmn,bnd->bmd"}> : () -> ()
    %cst_51 = arith.constant dense<0.000000e+00> : vector<2x16x128xf32>
    %113 = tpu.matmul %39, %112, %cst_51 {dimension_numbers = #tpu.dot_dimension_numbers<[2], [1], [1], [2], [0, 0, 0, 1, 1, 2], [0], [0]>} : vector<2x16x16xbf16>, vector<2x16x128xbf16>, vector<2x16x128xf32> -> vector<2x16x128xf32>
    "tpu.trace_stop"() : () -> ()
    %114 = vector.broadcast %41 : vector<2x16x1xf32> to vector<2x16x128xf32>
    %115 = arith.mulf %113, %114 : vector<2x16x128xf32>
    %116 = arith.addf %110, %115 : vector<2x16x128xf32>
    %cst_52 = arith.constant 0.000000e+00 : f32
    %117 = vector.broadcast %cst_52 : f32 to vector<2x16x128xf32>
    %118 = arith.maximumf %116, %117 : vector<2x16x128xf32>
    %c0_53 = arith.constant 0 : index
    %c0_54 = arith.constant 0 : index
    %c256 = arith.constant 256 : index
    %119 = vector.load %arg7[%c0_53, %c0_54, %c256] : memref<2x16x384xf32, #tpu.memory_space<vmem>>, vector<2x16x128xf32>
    tpu.vector_store %arg7[%c0_53, %c0_54, %c256], %118 {strides = array<i32>} : memref<2x16x384xf32, #tpu.memory_space<vmem>>, vector<2x16x128xf32>,
    return
  }
  func.func @transform_0(%arg0: i32) -> (i32, i32, i32) {
    %c0_i32 = arith.constant 0 : i32
    %c0_i32_0 = arith.constant 0 : i32
    %c0_i32_1 = arith.constant 0 : i32
    return %arg0, %c0_i32, %c0_i32_0 : i32, i32, i32
  }
  func.func @transform_1(%arg0: i32) -> (i32, i32, i32) {
    %c0_i32 = arith.constant 0 : i32
    %c0_i32_0 = arith.constant 0 : i32
    %c0_i32_1 = arith.constant 0 : i32
    return %arg0, %c0_i32, %c0_i32_0 : i32, i32, i32
  }
  func.func @transform_2(%arg0: i32) -> (i32, i32, i32) {
    %c0_i32 = arith.constant 0 : i32
    %c0_i32_0 = arith.constant 0 : i32
    %c0_i32_1 = arith.constant 0 : i32
    %c0_i32_2 = arith.constant 0 : i32
    return %c0_i32, %c0_i32_0, %c0_i32_1 : i32, i32, i32
  }
  func.func @transform_3(%arg0: i32) -> (i32, i32, i32) {
    %c0_i32 = arith.constant 0 : i32
    %c0_i32_0 = arith.constant 0 : i32
    %c0_i32_1 = arith.constant 0 : i32
    %c0_i32_2 = arith.constant 0 : i32
    return %c0_i32, %c0_i32_0, %c0_i32_1 : i32, i32, i32
  }
  func.func @transform_4(%arg0: i32) -> (i32, i32, i32) {
    %c0_i32 = arith.constant 0 : i32
    %c0_i32_0 = arith.constant 0 : i32
    %c0_i32_1 = arith.constant 0 : i32
    %c0_i32_2 = arith.constant 0 : i32
    return %c0_i32, %c0_i32_0, %c0_i32_1 : i32, i32, i32
  }
  func.func @transform_5(%arg0: i32) -> (i32, i32, i32) {
    %c0_i32 = arith.constant 0 : i32
    %c0_i32_0 = arith.constant 0 : i32
    %c0_i32_1 = arith.constant 0 : i32
    %c0_i32_2 = arith.constant 0 : i32
    return %c0_i32, %c0_i32_0, %c0_i32_1 : i32, i32, i32
  }
  func.func @transform_6(%arg0: i32) -> (i32, i32, i32) {
    %c0_i32 = arith.constant 0 : i32
    %c0_i32_0 = arith.constant 0 : i32
    %c0_i32_1 = arith.constant 0 : i32
    return %arg0, %c0_i32, %c0_i32_0 : i32, i32, i32
  }
}

</mosaic_0001>

<bundles_post_ra>
// kernel: tpu_custom_call.1
= control target key start
LH: loop header
LB: loop body
LE: loop exit
PB: predicated region body
PF: predicated region fallthrough
CT: control target
= control target key end

     0   :  { %11 = vsyncpa [#allocation3], 0  ;;  %s2617_s0 = inlined_call_operand.hbm [shape: f32[2,16,128], index: 0, kind: input, shape index: {}]   ;;  %s2618_s1 = inlined_call_operand.hbm [shape: s32[2,16,16], index: 1, kind: input, shape index: {}]   ;;  %s2619_s2 = inlined_call_operand.hbm [shape: bf16[2,128,128], index: 2, kind: input, shape index: {}]   ;;  %s2620_s3 = inlined_call_operand.vmem [shape: f32[2,1,128], index: 3, kind: input, shape index: {}]   ;;  %s2621_s4 = inlined_call_operand.hbm [shape: bf16[2,128,384], index: 4, kind: input, shape index: {}]   ;;  %s2622_s5 = inlined_call_operand.hbm [shape: f32[2,1,384], index: 5, kind: input, shape index: {}]   ;;  %s2623_s6 = inlined_call_operand.hbm [shape: f32[2,16,384], index: 6, kind: output, shape index: {}]  }
   0x1   :  { %12 = vsyncpa [#allocation6], 0 }
   0x2   :  { %13 = vsyncpa [#allocation9], 0 }
   0x3   :  { %14 = vsyncpa [#allocation4], 0  ;;  %s32_s23 = sshll.u32 %s2618_s1, 4  ;;  %s1989_s24 = smov [#allocation5]   ;;  %s33_s23 = int_to_ptr.hbm [resolvable:$true] %s32_s23 }
   0x4   :  { %s34_s25 = sshll.u32 %s1989_s24, 4  ;;  %s60_s28 = sshll.u32 %s2621_s4, 4  ;;  %s35_s25 = int_to_ptr.vmem [resolvable:$true] %s34_s25  ;;  %s61_s28 = int_to_ptr.hbm [resolvable:$true] %s60_s28 }
   0x5   :  { %s1990_s29 = smov 128   ;;  %s1991_s30 = smov 8  }
   0x6   :  { %40 = dma.hbm_to_vmem [thread:$0]  %s33_s23, 512, %s35_s25, [#allocation6], %s1990_s29, %s1990_s29, %s1991_s30  }
   0x7   :  { %s1992_s7 = smov [#allocation8]   ;;  %s1993_s9 = smov 192  }
   0x8   :  { %s62_s8 = sshll.u32 %s1992_s7, 4  ;;  %s1994_s10 = smov 12   ;;  %s63_s8 = int_to_ptr.vmem [resolvable:$true] %s62_s8 }
   0x9   :  { %68 = dma.hbm_to_vmem [thread:$0]  %s61_s28, 6144, %s63_s8, [#allocation9], %s1993_s9, %s1993_s9, %s1994_s10  }
   0xa   :  { %s19_s12 = sshll.u32 %s2617_s0, 4  ;;  %s1995_s13 = smov [#allocation2]   ;;  %s20_s12 = int_to_ptr.hbm [resolvable:$true] %s19_s12 }
   0xb   :  { %s21_s14 = sshll.u32 %s1995_s13, 4  ;;  %s45_s16 = sshll.u32 %s2619_s2, 4  ;;  %s22_s14 = int_to_ptr.vmem [resolvable:$true] %s21_s14  ;;  %s46_s16 = int_to_ptr.hbm [resolvable:$true] %s45_s16 }
   0xc   :  { %27 = dma.hbm_to_vmem [thread:$0]  %s20_s12, 512, %s22_s14, [#allocation3], %s1990_s29, %s1990_s29, %s1991_s30  }
   0xd   :  { %s1996_s17 = smov [#allocation7]   ;;  %s1997_s19 = smov 64  }
   0xe   :  { %s47_s18 = sshll.u32 %s1996_s17, 4  ;;  %s1998_s20 = smov 4   ;;  %s48_s18 = int_to_ptr.vmem [resolvable:$true] %s47_s18 }
   0xf   :  { %53 = dma.hbm_to_vmem [thread:$0]  %s46_s16, 2048, %s48_s18, [#allocation6], %s1997_s19, %s1997_s19, %s1998_s20  }
  0x10   :  { %s73_s0 = sshll.u32 %s2622_s5, 4  ;;  %s1999_s23 = smov [#allocation10]   ;;  %s74_s0 = int_to_ptr.hbm [resolvable:$true] %s73_s0 }
  0x11   :  { %s75_s24 = sshll.u32 %s1999_s23, 4  ;;  %s2000_s25 = smov 48   ;;  %s76_s24 = int_to_ptr.vmem [resolvable:$true] %s75_s24 }
  0x12   :  { %s2001_s26 = smov 3  }
  0x13   :  { %81 = dma.hbm_to_vmem [thread:$0]  %s74_s0, 96, %s76_s24, [#allocation9], %s2000_s25, %s2000_s25, %s2001_s26  }
  0x14   :  { %1981 = dma.done.wait [#allocation3], 512  }
  0x15   :  { %1982 = vsyncadd [#allocation3], 4294966784 }
  0x16   :  { %1983 = dma.done.wait [#allocation6], 2560  }
  0x17   :  { %1984 = vsyncadd [#allocation6], 4294964736 }
  0x18   :  { %1985 = dma.done.wait [#allocation9], 6240  }
  0x19   :  { %1986 = vsyncadd [#allocation9], 4294961056  ;;  %v1579_v0 = vld [vmem:[#allocation8 + $0xa8] sm:$0xf]  ;;  %v1760_v1 = vld [vmem:[#allocation8 + $0xb0] sm:$0xf0] }
  0x1a   :  { %v1759_v2 = vld [vmem:[#allocation8 + $0xac] sm:$0xf]  ;;  %v1580_v3 = vor.u32 %v1760_v1, %v1579_v0  ;;  %v1581_v4 = vld [vmem:[#allocation8 + $0xb4] sm:$0xf0]  ;;  %v1587_v5 = vld [vmem:[#allocation8 + $0xb0] sm:$0xf] }
  0x1b   :  { %v1761_v6 = vld [vmem:[#allocation8 + $0xb8] sm:$0xf0]  ;;  %v1584_v7 = vor.u32 %v1759_v2, %v1581_v4  ;;  %v1567_v9 = vld [vmem:[#allocation8 + $0x90] sm:$0xf]  ;;  %v1756_v11 = vld [vmem:[#allocation8 + $0x94] sm:$0xf] }
  0x1c   :  { %v1588_v8 = vor.u32 %v1761_v6, %v1587_v5  ;;  %v1757_v10 = vld [vmem:[#allocation8 + $0x98] sm:$0xf0]  ;;  %663 = vmatpush.bf16.msra.mxu1 %v1580_v3  ;;  %v1569_v13 = vld [vmem:[#allocation8 + $0x9c] sm:$0xf0]  ;;  %v1575_v14 = vld [vmem:[#allocation8 + $0x98] sm:$0xf] }
  0x1d   :  { %v1568_v12 = vor.u32 %v1757_v10, %v1567_v9  ;;  %v1758_v15 = vld [vmem:[#allocation8 + $0xa0] sm:$0xf0]  ;;  %682 = vmatpush.bf16.msra.mxu2 %v1584_v7  ;;  %v1572_v16 = vor.u32 %v1756_v11, %v1569_v13  ;;  %v1555_v18 = vld [vmem:[#allocation8 + $0x78] sm:$0xf]  ;;  %v1753_v20 = vld [vmem:[#allocation8 + $0x7c] sm:$0xf] }
  0x1e   :  { %701 = vmatpush.bf16.msra.mxu3 %v1588_v8  ;;  %v1576_v17 = vor.u32 %v1758_v15, %v1575_v14  ;;  %v1754_v19 = vld [vmem:[#allocation8 + $0x80] sm:$0xf0]  ;;  %v1557_v21 = vld [vmem:[#allocation8 + $0x84] sm:$0xf0]  ;;  %v1563_v22 = vld [vmem:[#allocation8 + $0x80] sm:$0xf] }
  0x1f   :  { %v1755_v23 = vld [vmem:[#allocation8 + $0x88] sm:$0xf0]  ;;  %v1556_v24 = vor.u32 %v1754_v19, %v1555_v18  ;;  %v1560_v25 = vor.u32 %v1753_v20, %v1557_v21  ;;  %v1543_v27 = vld [vmem:[#allocation8 + $0x60] sm:$0xf]  ;;  %v1750_v29 = vld [vmem:[#allocation8 + $0x64] sm:$0xf] }
  0x20   :  { %664 = vmatpush.bf16.msra.mxu1 %v1568_v12  ;;  %v1564_v26 = vor.u32 %v1755_v23, %v1563_v22  ;;  %v1751_v28 = vld [vmem:[#allocation8 + $0x68] sm:$0xf0]  ;;  %v1545_v30 = vld [vmem:[#allocation8 + $0x6c] sm:$0xf0]  ;;  %v1551_v31 = vld [vmem:[#allocation8 + $0x68] sm:$0xf] }
  0x21   :  { %683 = vmatpush.bf16.msra.mxu2 %v1572_v16  ;;  %v1752_v32 = vld [vmem:[#allocation8 + $0x70] sm:$0xf0]  ;;  %v1544_v33 = vor.u32 %v1751_v28, %v1543_v27  ;;  %v1548_v34 = vor.u32 %v1750_v29, %v1545_v30  ;;  %v1531_v36 = vld [vmem:[#allocation8 + $0x48] sm:$0xf]  ;;  %v1747_v38 = vld [vmem:[#allocation8 + $0x4c] sm:$0xf] }
  0x22   :  { %702 = vmatpush.bf16.msra.mxu3 %v1576_v17  ;;  %v1552_v35 = vor.u32 %v1752_v32, %v1551_v31  ;;  %v1748_v37 = vld [vmem:[#allocation8 + $0x50] sm:$0xf0]  ;;  %v1533_v39 = vld [vmem:[#allocation8 + $0x54] sm:$0xf0]  ;;  %v1539_v40 = vld [vmem:[#allocation8 + $0x50] sm:$0xf] }
  0x23   :  { %v1749_v41 = vld [vmem:[#allocation8 + $0x58] sm:$0xf0]  ;;  %v1519_v42 = vld [vmem:[#allocation8 + $0x30] sm:$0xf]  ;;  %v1532_v43 = vor.u32 %v1748_v37, %v1531_v36  ;;  %v1744_v45 = vld [vmem:[#allocation8 + $0x34] sm:$0xf]  ;;  %v1536_v47 = vor.u32 %v1747_v38, %v1533_v39 }
  0x24   :  { %665 = vmatpush.bf16.msra.mxu1 %v1556_v24  ;;  %v1745_v44 = vld [vmem:[#allocation8 + $0x38] sm:$0xf0]  ;;  %v1521_v46 = vld [vmem:[#allocation8 + $0x3c] sm:$0xf0]  ;;  %v1540_v48 = vor.u32 %v1749_v41, %v1539_v40  ;;  %v1527_v49 = vld [vmem:[#allocation8 + $0x38] sm:$0xf] }
  0x25   :  { %684 = vmatpush.bf16.msra.mxu2 %v1560_v25  ;;  %v1746_v50 = vld [vmem:[#allocation8 + $0x40] sm:$0xf0]  ;;  %v104_v52 = vld [vmem:[#allocation2 + $0x8] sm:$0xff]  ;;  %v1507_v53 = vld [vmem:[#allocation8 + $0x18] sm:$0xf]  ;;  %v1520_v55 = vor.u32 %v1745_v44, %v1519_v42  ;;  %v1524_v59 = vor.u32 %v1744_v45, %v1521_v46  ;;  %v2002_v31 = vmov 0.0  }
  0x26   :  { %703 = vmatpush.bf16.msra.mxu3 %v1564_v26  ;;  %v103_v51 = vld [vmem:[#allocation2] sm:$0xff]  ;;  %108 = vst [vmem:[#allocation11 + $0x18] sm:$0xff] %v104_v52  ;;  %v105_v54 = vld [vmem:[#allocation2 + $0x10] sm:$0xff]  ;;  %v106_v57 = vld [vmem:[#allocation2 + $0x18] sm:$0xff]  ;;  %v1528_v60 = vor.u32 %v1746_v50, %v1527_v49  ;;  %v393_v3 = vpack.c.bf16 %v104_v52, %v104_v52  ;;  %vm127_vm1 = vcmask 130048   ;;  %s1434_s8 = sshll.u32 %s2623_s6, 4  ;;  %s1435_s8 = int_to_ptr.hbm [resolvable:$true] %s1434_s8 }
  0x27   :  { %107 = vst [vmem:[#allocation11] sm:$0xff] %v103_v51  ;;  %v1742_v56 = vld [vmem:[#allocation8 + $0x20] sm:$0xf0]  ;;  %v1737_v58 = vld [vmem:[#allocation7 + $0x38] sm:$0xff]  ;;  %v1509_v62 = vld [vmem:[#allocation8 + $0x24] sm:$0xf0]  ;;  %v392_v2 = vpack.c.bf16 %v103_v51, %v103_v51  ;;  %v394_v23 = vpack.c.bf16 %v105_v54, %v105_v54  ;;  %v395_v24 = vpack.c.bf16 %v106_v57, %v106_v57 }
  0x28   :  { %666 = vmatpush.bf16.msra.mxu1 %v1544_v33  ;;  %109 = vst [vmem:[#allocation11 + $0x30] sm:$0xff] %v105_v54  ;;  %v1741_v61 = vld [vmem:[#allocation8 + $0x1c] sm:$0xf]  ;;  %v1515_v63 = vld [vmem:[#allocation8 + $0x20] sm:$0xf]  ;;  %476 = vmatpush.bf16.msra.mxu0 %v1737_v58  ;;  %v1736_v1 = vld [vmem:[#allocation7 + $0x30] sm:$0xff]  ;;  %v1508_v4 = vor.u32 %v1742_v56, %v1507_v53  ;;  %v421_v15 = vunpack.c.l.b16 %v393_v3 }
  0x29   :  { %685 = vmatpush.bf16.msra.mxu2 %v1548_v34  ;;  %110 = vst [vmem:[#allocation11 + $0x48] sm:$0xff] %v106_v57  ;;  %v1743_v0 = vld [vmem:[#allocation8 + $0x28] sm:$0xf0]  ;;  %v1495_v5 = vld [vmem:[#allocation8] sm:$0xf]  ;;  %v1512_v6 = vor.u32 %v1741_v61, %v1509_v62  ;;  %v420_v14 = vunpack.c.l.b16 %v392_v2  ;;  %v1733_v21 = vld [vmem:[#allocation7 + $0x18] sm:$0xff]  ;;  %v422_v26 = vunpack.c.l.b16 %v394_v23  ;;  %v423_v27 = vunpack.c.l.b16 %v395_v24 }
  0x2a   :  { %704 = vmatpush.bf16.msra.mxu3 %v1552_v35  ;;  %v1516_v7 = vor.u32 %v1743_v0, %v1515_v63  ;;  %v1739_v8 = vld [vmem:[#allocation8 + $0x8] sm:$0xf0]  ;;  %v1738_v9 = vld [vmem:[#allocation8 + $0x4] sm:$0xf]  ;;  %v1497_v10 = vld [vmem:[#allocation8 + $0xc] sm:$0xf0] }
  0x2b   :  { %v1503_v11 = vld [vmem:[#allocation8 + $0x8] sm:$0xf]  ;;  %v1740_v12 = vld [vmem:[#allocation8 + $0x10] sm:$0xf0]  ;;  %v1496_v16 = vor.u32 %v1739_v8, %v1495_v5  ;;  %v1500_v17 = vor.u32 %v1738_v9, %v1497_v10  ;;  %v1734_v19 = vld [vmem:[#allocation7 + $0x20] sm:$0xff]  ;;  %v424_v20 = vpack.c.b16 %v421_v15, %v420_v14  ;;  %v425_v29 = vpack.c.b16 %v423_v27, %v422_v26  ;;  %s2004_s9 = smov 384  }
  0x2c   :  { %667 = vmatpush.bf16.msra.mxu1 %v1532_v43  ;;  %477 = vmatpush.bf16.msra.mxu0 %v1736_v1  ;;  %v1735_v13 = vld [vmem:[#allocation7 + $0x28] sm:$0xff]  ;;  %v1504_v18 = vor.u32 %v1740_v12, %v1503_v11  ;;  %v1732_v22 = vld [vmem:[#allocation7 + $0x10] sm:$0xff]  ;;  %v1730_v28 = vld [vmem:[#allocation7] sm:$0xff]  ;;  %s2005_s10 = smov 24  }
  0x2d   :  { %686 = vmatpush.bf16.msra.mxu2 %v1536_v47  ;;  %v1731_v25 = vld [vmem:[#allocation7 + $0x8] sm:$0xff]  ;;  %v111_v30 = vld [vmem:[#allocation5] sm:$0xff]  ;;  %v113_v45 = vld [vmem:[#allocation5 + $0x10] sm:$0xff] }
  0x2e   :  { %705 = vmatpush.bf16.msra.mxu3 %v1540_v48  ;;  %vm115_vm0 = vcmp.eq.s32.totalorder %v111_v30, 1  ;;  %vm208_vm2 = vcmp.eq.s32.totalorder %v111_v30, 2  ;;  %vm300_vm3 = vcmp.eq.s32.totalorder %v111_v30, 3  ;;  %v112_v36 = vld [vmem:[#allocation5 + $0x8] sm:$0xff]  ;;  %vm117_vm7 = vcmp.eq.s32.totalorder %v113_v45, 1  ;;  %v114_v48 = vld [vmem:[#allocation5 + $0x18] sm:$0xff] }
  0x2f   :  { %v2056_v32 = vsel %vm115_vm0, 1.0, %v2002_v31  ;;  %v2060_v34 = vsel %vm208_vm2, 1.0, %v2002_v31  ;;  %v2064_v37 = vsel %vm300_vm3, 1.0, %v2002_v31  ;;  %vm116_vm4 = vcmp.eq.s32.totalorder %v112_v36, 1  ;;  %v527_v51 = vld [vmem:[#allocation10] sm:$0x7] }
  0x30   :  { %668 = vmatpush.bf16.msra.mxu1 %v1520_v55  ;;  %478 = vmatpush.bf16.msra.mxu0 %v1735_v13  ;;  %v128_v33 = vsel %vm127_vm1, %v2056_v32, 0.0  ;;  %v220_v35 = vsel %vm127_vm1, %v2060_v34, 0.0  ;;  %v312_v38 = vsel %vm127_vm1, %v2064_v37, 0.0  ;;  %v1450_v39 = vsel %vm116_vm4, 1.0, %v2002_v31 }
  0x31   :  { %687 = vmatpush.bf16.msra.mxu2 %v1524_v59  ;;  %129 = vadd.xlane.f32.xlu0 %v128_v33  ;;  %v131_v40 = vsel %vm127_vm1, %v1450_v39, 0.0  ;;  %vm209_vm5 = vcmp.eq.s32.totalorder %v112_v36, 2  ;;  %vm301_vm6 = vcmp.eq.s32.totalorder %v112_v36, 3  ;;  %v2077_v46 = vsel %vm117_vm7, 1.0, %v2002_v31 }
  0x32   :  { %706 = vmatpush.bf16.msra.mxu3 %v1528_v60  ;;  %221 = vadd.xlane.f32.xlu1 %v220_v35  ;;  %v2069_v41 = vsel %vm209_vm5, 1.0, %v2002_v31  ;;  %v2073_v43 = vsel %vm301_vm6, 1.0, %v2002_v31  ;;  %v134_v47 = vsel %vm127_vm1, %v2077_v46, 0.0  ;;  %vm210_vm8 = vcmp.eq.s32.totalorder %v113_v45, 2 }
  0x33   :  { %313 = vadd.xlane.f32.xlu2 %v312_v38  ;;  %v223_v42 = vsel %vm127_vm1, %v2069_v41, 0.0  ;;  %v315_v44 = vsel %vm127_vm1, %v2073_v43, 0.0  ;;  %vm118_vm9 = vcmp.eq.s32.totalorder %v114_v48, 1  ;;  %v2081_v49 = vsel %vm210_vm8, 1.0, %v2002_v31 }
  0x34   :  { %669 = vmatpush.bf16.msra.mxu1 %v1508_v4  ;;  %479 = vmatpush.bf16.msra.mxu0 %v1734_v19  ;;  %v2083_v50 = vsel %vm118_vm9, 1.0, %v2002_v31  ;;  %v226_v52 = vsel %vm127_vm1, %v2081_v49, 0.0  ;;  %v2089_v55 = vperm.slane %v527_v51, 0  ;;  %vm211_vm10 = vcmp.eq.s32.totalorder %v114_v48, 2 }
  0x35   :  { %688 = vmatpush.bf16.msra.mxu2 %v1512_v6  ;;  %v137_v53 = vsel %vm127_vm1, %v2083_v50, 0.0  ;;  %v2091_v56 = vsel %vm211_vm10, 1.0, %v2002_v31  ;;  %vm303_vm11 = vcmp.eq.s32.totalorder %v114_v48, 3  ;;  %vm302_vm12 = vcmp.eq.s32.totalorder %v113_v45, 3 }
  0x36   :  { %707 = vmatpush.bf16.msra.mxu3 %v1516_v7  ;;  %v229_v57 = vsel %vm127_vm1, %v2091_v56, 0.0  ;;  %v2096_v59 = vsel %vm303_vm11, 1.0, %v2002_v31  ;;  %v2098_v60 = vsel %vm302_vm12, 1.0, %v2002_v31  ;;  %v2100_v61 = vperm.slane %v527_v51, 2 }
  0x37   :  { %v321_v62 = vsel %vm127_vm1, %v2096_v59, 0.0  ;;  %v318_v63 = vsel %vm127_vm1, %v2098_v60, 0.0  ;;  %v2106_v2 = vperm.slane %v527_v51, 1  ;;  %v144_v4 = vpack.c.bf16 %v2056_v32, %v2056_v32 }
  0x38   :  { %670 = vmatpush.bf16.msra.mxu1 %v1496_v16  ;;  %480 = vmatpush.bf16.msra.mxu0 %v1733_v21  ;;  %v145_v5 = vpack.c.bf16 %v1450_v39, %v1450_v39  ;;  %v236_v16 = vpack.c.bf16 %v2060_v34, %v2060_v34  ;;  %v328_v38 = vpack.c.bf16 %v2064_v37, %v2064_v37 }
  0x39   :  { %689 = vmatpush.bf16.msra.mxu2 %v1500_v17  ;;  %132 = vadd.xlane.f32.xlu0 %v131_v40  ;;  %v726_v11 = vunpack.c.l.b16 %v144_v4  ;;  %v329_v40 = vpack.c.bf16 %v2073_v43, %v2073_v43  ;;  %v146_v45 = vpack.c.bf16 %v2077_v46, %v2077_v46  ;;  %v239_v4 = vpack.c.bf16 %v2091_v56, %v2091_v56 }
  0x3a   :  { %708 = vmatpush.bf16.msra.mxu3 %v1504_v18  ;;  %224 = vadd.xlane.f32.xlu1 %v223_v42  ;;  %v727_v12 = vunpack.c.l.b16 %v145_v5 }
  0x3b   :  { %671 = vmatmul.bf16.vlgmr.msra.gmra.mxu1 %v424_v20  ;;  %316 = vadd.xlane.f32.xlu2 %v315_v44 }
  0x3c   :  { %690 = vmatmul.bf16.vlgmr.msra.gmra.mxu2 %v424_v20  ;;  %481 = vmatpush.bf16.msra.mxu0 %v1732_v22 }
  0x3d   :  { %709 = vmatmul.bf16.vlgmr.msra.gmra.mxu3 %v424_v20 }
  0x40   :  { %482 = vmatpush.bf16.msra.mxu0 %v1731_v25  ;;  %v2119_v25 = vpack.c.b16 %v727_v12, %v726_v11 }
  0x41   :  { %135 = vadd.xlane.f32.xlu0 %v134_v47  ;;  %v147_v47 = vpack.c.bf16 %v2083_v50, %v2083_v50  ;;  %v238_v50 = vpack.c.bf16 %v2081_v49, %v2081_v49 }
  0x42   :  { %138 = vadd.xlane.f32.xlu1 %v137_v53  ;;  %v863_v53 = vunpack.c.l.b16 %v329_v40 }
  0x43   :  { %227 = vadd.xlane.f32.xlu2 %v226_v52  ;;  %v862_v52 = vunpack.c.l.b16 %v328_v38  ;;  %v822_v12 = vunpack.c.l.b16 %v238_v50  ;;  %v1793_v38 = vld [vmem:[#allocation8 + $0x178] sm:$0xf0]  ;;  %v1786_v50 = vld [vmem:[#allocation8 + $0x140] sm:$0xf0] }
  0x44   :  { %483 = vmatpush.bf16.msra.mxu0 %v1730_v28 }
  0x47   :  { %484 = vmatmul.bf16.vlgmr.msra.gmra.mxu0 %v424_v20  ;;  %v237_v20 = vpack.c.bf16 %v2069_v41, %v2069_v41 }
  0x49   :  { %230 = vadd.xlane.f32.xlu0 %v229_v57  ;;  %v795_v30 = vunpack.c.l.b16 %v237_v20  ;;  %v754_v57 = vunpack.c.l.b16 %v146_v45  ;;  %v1789_v45 = vld [vmem:[#allocation8 + $0x158] sm:$0xf0] }
  0x4a   :  { %319 = vadd.xlane.f32.xlu1 %v318_v63 }
  0x4b   :  { %676 = vmatmul.bf16.gmra.mxu1 %v425_v29  ;;  %322 = vadd.xlane.f32.xlu2 %v321_v62 }
  0x4c   :  { %695 = vmatmul.bf16.gmra.mxu2 %v425_v29 }
  0x4d   :  { %714 = vmatmul.bf16.gmra.mxu3 %v425_v29 }
  0x57   :  { %489 = vmatmul.bf16.gmra.mxu0 %v425_v29  ;;  %v794_v29 = vunpack.c.l.b16 %v236_v16 }
  0x59   :  { %v2126_v39 = vpack.c.b16 %v795_v30, %v794_v29  ;;  %v1792_v29 = vld [vmem:[#allocation8 + $0x170] sm:$0xf0] }
  0xb8   :  { %v672_v54 = vpop.f32.mrf.mxu1 }
  0xb9   :  { %v673_v58 = vadd.f32 %v672_v54, %v2089_v55 }
  0xbb   :  { %v720_v6 = vpack.c.bf16 %v673_v58, %v673_v58  ;;  %v755_v58 = vunpack.c.l.b16 %v147_v47 }
  0xbd   :  { %v731_v13 = vunpack.c.l.b16 %v720_v6  ;;  %v2145_v6 = vpack.c.b16 %v755_v58, %v754_v57  ;;  %v1710_v57 = vld [vmem:[#allocation8 + $0x158] sm:$0xf]  ;;  %v1790_v58 = vld [vmem:[#allocation8 + $0x160] sm:$0xf0] }
  0xbf   :  { %v691_v0 = vpop.f32.mrf.mxu2 }
  0xc0   :  { %v710_v1 = vpop.f32.mrf.mxu3  ;;  %v674_v3 = vpop.f32.mrf.mxu1  ;;  %v692_v10 = vadd.f32 %v691_v0, %v2106_v2  ;;  %v2139_v0 = vpack.c.b16 %v863_v53, %v862_v52  ;;  %v1788_v52 = vld [vmem:[#allocation8 + $0x154] sm:$0xf]  ;;  %v1704_v53 = vld [vmem:[#allocation8 + $0x15c] sm:$0xf0] }
  0xc1   :  { %v675_v7 = vadd.f32 %v674_v3, %v2089_v55  ;;  %v711_v8 = vadd.f32 %v710_v1, %v2100_v61 }
  0xc2   :  { %v788_v21 = vpack.c.bf16 %v692_v10, %v692_v10 }
  0xc3   :  { %v721_v9 = vpack.c.bf16 %v675_v7, %v675_v7  ;;  %v856_v15 = vpack.c.bf16 %v711_v8, %v711_v8 }
  0xc4   :  { %v799_v31 = vunpack.c.l.b16 %v788_v21  ;;  %v130_v21 = vpop.xlane.xlu0 %129 }
  0xc5   :  { %v732_v14 = vunpack.c.l.b16 %v721_v9  ;;  %v867_v26 = vunpack.c.l.b16 %v856_v15 }
  0xc7   :  { %v693_v17 = vpop.f32.mrf.mxu2  ;;  %v733_v19 = vpack.c.b16 %v732_v14, %v731_v13  ;;  %v823_v13 = vunpack.c.l.b16 %v239_v4  ;;  %v1692_v4 = vld [vmem:[#allocation8 + $0x144] sm:$0xf0] }
  0xc8   :  { %v712_v18 = vpop.f32.mrf.mxu3  ;;  %v694_v22 = vadd.f32 %v693_v17, %v2106_v2  ;;  %v677_v23 = vpop.f32.mrf.mxu1  ;;  %v330_v17 = vpack.c.bf16 %v2098_v60, %v2098_v60 }
  0xc9   :  { %v713_v24 = vadd.f32 %v712_v18, %v2100_v61  ;;  %745 = vmatpush.bf16.msrb.mxu0 %v733_v19  ;;  %v678_v34 = vadd.f32 %v677_v23, %v2089_v55  ;;  %v2167_v23 = vmax.f32 %v130_v21, 1.0  ;;  %v1782_v21 = vld [vmem:[#allocation8 + $0x124] sm:$0xf] }
  0xca   :  { %v789_v27 = vpack.c.bf16 %v694_v22, %v694_v22  ;;  %v890_v19 = vunpack.c.l.b16 %v330_v17  ;;  %v2165_v22 = vpop.f32.mrf.mxu0 }
  0xcb   :  { %v857_v28 = vpack.c.bf16 %v713_v24, %v713_v24  ;;  %v722_v48 = vpack.c.bf16 %v678_v34, %v678_v34  ;;  %v314_v24 = vpop.xlane.xlu2 %313  ;;  %1813 = vrcp.f32 %v2167_v23  ;;  %v1722_v34 = vld [vmem:[#allocation8 + $0x170] sm:$0xf]  ;;  %vm153_vm13 = vweird.f32 %v2167_v23 }
  0xcc   :  { %v800_v32 = vunpack.c.l.b16 %v789_v27  ;;  %1589 = vmatmul.msk.bf16.vlgmr.msrb.gmra.mxu0 %vm127_vm1, %v2119_v25  ;;  %v1769_v27 = vld [vmem:[#allocation7 + $0x78] sm:$0xff]  ;;  %v1723_v40 = vor.u32 %v1793_v38, %v1722_v34  ;;  %v157_v34 = vand.u32 2147483647, %v2167_v23  ;;  %v159_v38 = vand.u32 2147483648, %v2167_v23 }
  0xcd   :  { %v868_v33 = vunpack.c.l.b16 %v857_v28  ;;  %v759_v62 = vunpack.c.l.b16 %v722_v48  ;;  %v1714_v28 = vld [vmem:[#allocation8 + $0x168] sm:$0xf] }
  0xce   :  { %v801_v36 = vpack.c.b16 %v800_v32, %v799_v31  ;;  %v1715_v31 = vor.u32 %v1792_v29, %v1714_v28  ;;  %v1791_v32 = vld [vmem:[#allocation8 + $0x16c] sm:$0xf]  ;;  %v1686_v29 = vld [vmem:[#allocation8 + $0x128] sm:$0xf]  ;;  %vm2236_vm0 = vcmp.eq.f32.partialorder %v157_v34, 8.507059e+37 }
  0xcf   :  { %v869_v35 = vpack.c.b16 %v868_v33, %v867_v26  ;;  %v696_v41 = vpop.f32.mrf.mxu2  ;;  %v133_v26 = vpop.xlane.xlu0 %132  ;;  %v1716_v33 = vld [vmem:[#allocation8 + $0x174] sm:$0xf0] }
  0xd0   :  { %v715_v42 = vpop.f32.mrf.mxu3  ;;  %813 = vmatpush.bf16.msrb.mxu2 %v801_v36  ;;  %v679_v44 = vpop.f32.mrf.mxu1  ;;  %v697_v43 = vadd.f32 %v696_v41, %v2106_v2  ;;  %v1719_v36 = vor.u32 %v1791_v32, %v1716_v33  ;;  %v2207_v32 = vld [vmem:[%s2620_s3] ss:$0 sm:$0xff] }
  0xd1   :  { %881 = vmatpush.bf16.msra.mxu0 %v869_v35  ;;  %v680_v51 = vadd.f32 %v679_v44, %v2089_v55  ;;  %v716_v37 = vadd.f32 %v715_v42, %v2100_v61  ;;  %v2175_v35 = vmax.f32 %v133_v26, 1.0  ;;  %v2177_v41 = vpop.eup %1813  ;;  %v2179_v42 = vmax.f32 %v314_v24, 1.0  ;;  %v1702_v44 = vld [vmem:[#allocation8 + $0x150] sm:$0xf] }
  0xd2   :  { %v790_v5 = vpack.c.bf16 %v697_v43, %v697_v43  ;;  %v2172_v30 = vpop.f32.mrf.mxu0  ;;  %v1707_v43 = vor.u32 %v1788_v52, %v1704_v53  ;;  %vm154_vm14 = vweird.f32 %v2177_v41  ;;  %v1779_v52 = vld [vmem:[#allocation8 + $0x10c] sm:$0xf]  ;;  %v1668_v53 = vld [vmem:[#allocation8 + $0x114] sm:$0xf0] }
  0xd3   :  { %v723_v54 = vpack.c.bf16 %v680_v51, %v680_v51  ;;  %1591 = vmatmul.msk.bf16.vlgmr.msrb.gmra.mxu2 %vm127_vm1, %v2126_v39  ;;  %v858_v63 = vpack.c.bf16 %v716_v37, %v716_v37  ;;  %v2182_v48 = vpop.xlane.xlu2 %316  ;;  %v1768_v51 = vld [vmem:[#allocation7 + $0x70] sm:$0xff]  ;;  %v1703_v37 = vor.u32 %v1789_v45, %v1702_v44  ;;  %v1666_v44 = vld [vmem:[#allocation8 + $0x108] sm:$0xf]  ;;  %vm2228_vm15 = vmor %vm153_vm13, %vm154_vm14  ;;  %vm168_vm4 = vweird.f32 %v2175_v35 }
  0xd4   :  { %v827_v49 = vunpack.c.l.b16 %v790_v5  ;;  %1018 = vmatpush.bf16.msra.mxu2 %v1769_v27  ;;  %v1698_v5 = vld [vmem:[#allocation8 + $0x140] sm:$0xf]  ;;  %v1780_v45 = vld [vmem:[#allocation8 + $0x110] sm:$0xf0]  ;;  %vm337_vm7 = vweird.f32 %v2179_v42 }
  0xd5   :  { %v760_v46 = vunpack.c.l.b16 %v723_v54  ;;  %v895_v9 = vunpack.c.l.b16 %v858_v63  ;;  %1226 = vmatpush.bf16.msrb.mxu0 %v1719_v36  ;;  %v149_v54 = vmul.f32 %v2177_v41, %v2167_v23  ;;  %v1690_v63 = vld [vmem:[#allocation8 + $0x138] sm:$0xf]  ;;  %v1654_v23 = vld [vmem:[#allocation8 + $0xf0] sm:$0xf] }
  0xd7   :  { %v698_v55 = vpop.f32.mrf.mxu2  ;;  %v761_v3 = vpack.c.b16 %v760_v46, %v759_v62  ;;  %v1711_v46 = vor.u32 %v1790_v58, %v1710_v57  ;;  %v1671_v58 = vor.u32 %v1779_v52, %v1668_v53 }
  0xd8   :  { %v717_v1 = vpop.f32.mrf.mxu3  ;;  %v699_v7 = vadd.f32 %v698_v55, %v2106_v2  ;;  %v2153_v2 = vpack.c.b16 %v823_v13, %v822_v12  ;;  %1019 = vmatpush.bf16.msra.mxu2 %v1768_v51  ;;  %v1785_v55 = vld [vmem:[#allocation8 + $0x13c] sm:$0xf]  ;;  %v1787_v12 = vld [vmem:[#allocation8 + $0x148] sm:$0xf0] }
  0xd9   :  { %v718_v8 = vadd.f32 %v717_v1, %v2100_v61  ;;  %773 = vmatpush.bf16.msrb.mxu1 %v761_v3  ;;  %v331_v61 = vpack.c.bf16 %v2096_v59, %v2096_v59  ;;  %v222_v59 = vpop.xlane.xlu1 %221  ;;  %1227 = vmatpush.bf16.msrb.mxu0 %v1707_v43  ;;  %v1767_v1 = vld [vmem:[#allocation7 + $0x68] sm:$0xff]  ;;  %v1691_v3 = vor.u32 %v1786_v50, %v1690_v63  ;;  %v1765_v51 = vld [vmem:[#allocation7 + $0x58] sm:$0xff] }
  0xda   :  { %v791_v10 = vpack.c.bf16 %v699_v7, %v699_v7  ;;  %v2170_v60 = vmax.f32 %v222_v59, 1.0  ;;  %v2189_v7 = vpop.f32.mrf.mxu0  ;;  %v1680_v59 = vld [vmem:[#allocation8 + $0x12c] sm:$0xf0]  ;;  %v1781_v63 = vld [vmem:[#allocation8 + $0x118] sm:$0xf0] }
  0xdb   :  { %v859_v11 = vpack.c.bf16 %v718_v8, %v718_v8  ;;  %v891_v18 = vunpack.c.l.b16 %v331_v61  ;;  %v136_v8 = vpop.xlane.xlu0 %135  ;;  %v1683_v28 = vor.u32 %v1782_v21, %v1680_v59  ;;  %v228_v33 = vpop.xlane.xlu2 %227 }
  0xdc   :  { %v828_v14 = vunpack.c.l.b16 %v791_v10  ;;  %1590 = vmatmul.msk.bf16.vlgmr.msrb.gmra.mxu1 %vm127_vm1, %v2145_v6  ;;  %1593 = vmatmul.msk.bf16.vlgmr.msra.gmra.mxu0 %vm127_vm1, %v2139_v0  ;;  %1815 = vrcp.f32 %v2170_v60  ;;  %v2199_v61 = vmax.f32 %v136_v8, 1.0  ;;  %v2244_v8 = vadd.f32 %v2207_v32, %v2165_v22 }
  0xdd   :  { %v896_v15 = vunpack.c.l.b16 %v859_v11  ;;  %v2161_v20 = vpack.c.b16 %v891_v18, %v890_v19  ;;  %1817 = vrcp.f32 %v2175_v35  ;;  %v1695_v11 = vor.u32 %v1785_v55, %v1692_v4  ;;  %1020 = vmatpush.bf16.msra.mxu2 %v1767_v1  ;;  %v1766_v18 = vld [vmem:[#allocation7 + $0x60] sm:$0xff] }
  0xde   :  { %v829_v16 = vpack.c.b16 %v828_v14, %v827_v49  ;;  %1819 = vrcp.f32 %v2179_v42  ;;  %v1699_v49 = vor.u32 %v1787_v12, %v1698_v5  ;;  %v2240_v4 = vor.u32 1.1754944e-38, %v159_v38  ;;  %v1777_v12 = vld [vmem:[#allocation8 + $0xf8] sm:$0xf0] }
  0xdf   :  { %v897_v56 = vpack.c.b16 %v896_v15, %v895_v9  ;;  %v150_v9 = vsub.f32 1.0, %v149_v54  ;;  %1228 = vmatpush.bf16.msrb.mxu0 %v1695_v11  ;;  %v1678_v15 = vld [vmem:[#allocation8 + $0x120] sm:$0xf]  ;;  %v1764_v11 = vld [vmem:[#allocation7 + $0x50] sm:$0xff]  ;;  %vm245_vm2 = vweird.f32 %v2170_v60  ;;  %v174_v38 = vand.u32 2147483648, %v2175_v35 }
  0xe0   :  { %841 = vmatpush.bf16.msrb.mxu3 %v829_v16 }
  0xe1   :  { %909 = vmatpush.bf16.msra.mxu1 %v897_v56  ;;  %v225_v47 = vpop.xlane.xlu1 %224  ;;  %v1783_v56 = vld [vmem:[#allocation8 + $0x128] sm:$0xf0]  ;;  %v151_v24 = vmul.f32 %v2177_v41, %v150_v9  ;;  %1021 = vmatpush.bf16.msra.mxu2 %v1766_v18  ;;  %v2248_v9 = vadd.f32 %v2207_v32, %v2172_v30  ;;  %v1656_v18 = vld [vmem:[#allocation8 + $0xfc] sm:$0xf0] }
  0xe2   :  { %v2186_v62 = vpop.eup %1815  ;;  %v2195_v14 = vmax.f32 %v225_v47, 1.0  ;;  %v1679_v19 = vor.u32 %v1783_v56, %v1678_v15  ;;  %v2217_v47 = vmax.f32 %v2182_v48, 1.0  ;;  %v2232_v55 = vpop.f32.mrf.mxu0 }
  0xe3   :  { %1592 = vmatmul.msk.bf16.vlgmr.msrb.gmra.mxu3 %vm127_vm1, %v2153_v2  ;;  %v241_v10 = vmul.f32 %v2186_v62, %v2170_v60  ;;  %v2193_v13 = vpop.eup %1817  ;;  %1229 = vmatpush.bf16.msrb.mxu0 %v1683_v28  ;;  %v2221_v54 = vadd.f32 %v2177_v41, %v151_v24  ;;  %vm246_vm3 = vweird.f32 %v2186_v62  ;;  %v249_v24 = vand.u32 2147483647, %v2170_v60  ;;  %v231_v34 = vpop.xlane.xlu0 %230 }
  0xe4   :  { %1207 = vmatpush.bf16.msra.mxu3 %v1715_v31  ;;  %v2197_v16 = vpop.eup %1819  ;;  %v164_v26 = vmul.f32 %v2193_v13, %v2175_v35  ;;  %v1784_v31 = vld [vmem:[#allocation8 + $0x130] sm:$0xf0]  ;;  %1821 = vrcp.f32 %v2195_v14  ;;  %vm169_vm5 = vweird.f32 %v2193_v13  ;;  %vm2290_vm6 = vmor %vm245_vm2, %vm246_vm3  ;;  %vm260_vm14 = vweird.f32 %v2195_v14 }
  0xe5   :  { %1245 = vmatpush.bf16.msrb.mxu1 %v1723_v40  ;;  %v242_v27 = vsub.f32 1.0, %v241_v10  ;;  %v1687_v36 = vor.u32 %v1784_v31, %v1686_v29  ;;  %v333_v40 = vmul.f32 %v2197_v16, %v2179_v42  ;;  %1823 = vrcp.f32 %v2199_v61  ;;  %1022 = vmatpush.bf16.msra.mxu2 %v1765_v51  ;;  %v1642_v31 = vld [vmem:[#allocation8 + $0xd8] sm:$0xf]  ;;  %vm2306_vm8 = vmor %vm168_vm4, %vm169_vm5 }
  0xe6   :  { %v165_v43 = vsub.f32 1.0, %v164_v26  ;;  %1825 = vrcp.f32 %v2217_v47  ;;  %v251_v10 = vand.u32 2147483648, %v2170_v60  ;;  %v156_v22 = vsel %vm2228_vm15, %v2177_v41, %v2221_v54  ;;  %v1778_v41 = vld [vmem:[#allocation8 + $0x100] sm:$0xf0]  ;;  %v1644_v54 = vld [vmem:[#allocation8 + $0xe4] sm:$0xf0] }
  0xe7   :  { %v243_v57 = vmul.f32 %v2186_v62, %v242_v27  ;;  %v334_v5 = vsub.f32 1.0, %v333_v40  ;;  %1230 = vmatpush.bf16.msrb.mxu0 %v1671_v58  ;;  %v2267_v27 = vmax.f32 %v228_v33, 1.0  ;;  %v1763_v33 = vld [vmem:[#allocation7 + $0x48] sm:$0xff]  ;;  %v172_v58 = vand.u32 2147483647, %v2175_v35 }
  0xe8   :  { %1208 = vmatpush.bf16.msra.mxu3 %v1703_v37  ;;  %v1667_v37 = vor.u32 %v1780_v45, %v1666_v44  ;;  %v166_v56 = vmul.f32 %v2193_v13, %v165_v43  ;;  %v1774_v44 = vld [vmem:[#allocation8 + $0xe0] sm:$0xf0]  ;;  %v1773_v45 = vld [vmem:[#allocation8 + $0xdc] sm:$0xf]  ;;  %v1650_v43 = vld [vmem:[#allocation8 + $0xe0] sm:$0xf]  ;;  %vm338_vm9 = vweird.f32 %v2197_v16 }
  0xe9   :  { %1246 = vmatpush.bf16.msrb.mxu1 %v1711_v46  ;;  %v139_v17 = vpop.xlane.xlu1 %138  ;;  %v1674_v46 = vld [vmem:[#allocation8 + $0x110] sm:$0xf]  ;;  %v2260_v30 = vadd.f32 %v2186_v62, %v243_v57  ;;  %1023 = vmatpush.bf16.msra.mxu2 %v1764_v11  ;;  %v335_v28 = vmul.f32 %v2197_v16, %v334_v5  ;;  %v1643_v53 = vor.u32 %v1774_v44, %v1642_v31  ;;  %vm2333_vm10 = vmor %vm337_vm7, %vm338_vm9  ;;  %vm2342_vm11 = vcmp.eq.f32.partialorder %v172_v58, 8.507059e+37 }
  0xea   :  { %v1675_v50 = vor.u32 %v1781_v63, %v1674_v46  ;;  %v2234_v1 = vmax.f32 %v139_v17, 1.0  ;;  %v2252_v15 = vpop.eup %1821  ;;  %v1655_v17 = vor.u32 %v1777_v12, %v1654_v23  ;;  %v341_v63 = vand.u32 2147483647, %v2179_v42 }
  0xeb   :  { %v2262_v21 = vpop.eup %1823  ;;  %v256_v40 = vmul.f32 %v2252_v15, %v2195_v14  ;;  %v1647_v48 = vor.u32 %v1773_v45, %v1644_v54  ;;  %v2298_v23 = vmax.f32 %v231_v34, 1.0  ;;  %vm2348_vm12 = vcmp.eq.f32.partialorder %v249_v24, 8.507059e+37 }
  0xec   :  { %1594 = vmatmul.msk.bf16.vlgmr.msra.gmra.mxu1 %vm127_vm1, %v2161_v20  ;;  %1209 = vmatpush.bf16.msra.mxu3 %v1691_v3  ;;  %1827 = vrcp.f32 %v2234_v1  ;;  %v179_v52 = vmul.f32 %v2262_v21, %v2199_v61  ;;  %v2283_v57 = vpop.eup %1825  ;;  %v1772_v3 = vld [vmem:[#allocation8 + $0xd0] sm:$0xf0]  ;;  %vm2364_vm13 = vcmp.eq.f32.partialorder %v341_v63, 8.507059e+37  ;;  %vm261_vm15 = vweird.f32 %v2252_v15 }
  0xed   :  { %1247 = vmatpush.bf16.msrb.mxu1 %v1699_v49  ;;  %v1776_v49 = vld [vmem:[#allocation8 + $0xf4] sm:$0xf]  ;;  %1024 = vmatpush.bf16.msra.mxu2 %v1763_v33  ;;  %1829 = vrcp.f32 %v2267_v27  ;;  %v257_v35 = vsub.f32 1.0, %v256_v40  ;;  %v1638_v33 = vld [vmem:[#allocation8 + $0xc8] sm:$0xf]  ;;  %v343_v40 = vand.u32 2147483648, %v2179_v42  ;;  %vm184_vm2 = vweird.f32 %v2262_v21  ;;  %vm2394_vm3 = vmor %vm260_vm14, %vm261_vm15 }
  0xee   :  { %v1659_v26 = vor.u32 %v1776_v49, %v1656_v18  ;;  %v2315_v18 = vsel %vm2236_vm0, %v2240_v4, %v156_v22  ;;  %v180_v31 = vsub.f32 1.0, %v179_v52  ;;  %v248_v4 = vsel %vm2290_vm6, %v2186_v62, %v2260_v30 }
  0xef   :  { %v252_v22 = vor.u32 1.1754944e-38, %v251_v10  ;;  %v1639_v44 = vor.u32 %v1772_v3, %v1638_v33  ;;  %v175_v10 = vor.u32 1.1754944e-38, %v174_v38  ;;  %v258_v42 = vmul.f32 %v2252_v15, %v257_v35 }
  0xf0   :  { %1210 = vmatpush.bf16.msra.mxu3 %v1679_v19  ;;  %v1662_v19 = vld [vmem:[#allocation8 + $0xf8] sm:$0xf]  ;;  %1231 = vmatpush.bf16.msrb.mxu0 %v1659_v26  ;;  %v1770_v26 = vld [vmem:[#allocation8 + $0xc4] sm:$0xf]  ;;  %v181_v60 = vmul.f32 %v2262_v21, %v180_v31  ;;  %v344_v54 = vor.u32 1.1754944e-38, %v343_v40  ;;  %vm183_vm0 = vweird.f32 %v2199_v61  ;;  %v266_v46 = vand.u32 2147483648, %v2195_v14 }
  0xf1   :  { %1248 = vmatpush.bf16.msrb.mxu1 %v1687_v36  ;;  %v320_v59 = vpop.xlane.xlu1 %319  ;;  %v1663_v29 = vor.u32 %v1778_v41, %v1662_v19  ;;  %v323_v36 = vpop.xlane.xlu2 %322  ;;  %v2318_v19 = vadd.f32 %v2197_v16, %v335_v28  ;;  %v1632_v41 = vld [vmem:[#allocation8 + $0xcc] sm:$0xf0]  ;;  %v259_v63 = vadd.f32 %v2252_v15, %v258_v42  ;;  %vm2414_vm4 = vmor %vm183_vm0, %vm184_vm2  ;;  %vm352_vm6 = vweird.f32 %v2217_v47 }
  0xf2   :  { %v2276_v51 = vmax.f32 %v320_v59, 1.0  ;;  %v2300_v11 = vmax.f32 %v323_v36, 1.0  ;;  %v1762_v59 = vld [vmem:[#allocation7 + $0x40] sm:$0xff]  ;;  %v1635_v36 = vor.u32 %v1770_v26, %v1632_v41  ;;  %v267_v33 = vor.u32 1.1754944e-38, %v266_v46 }
  0xf3   :  { %1025 = vmatpush.bf16.msra.mxu2 %v1762_v59  ;;  %v340_v24 = vsel %vm2333_vm10, %v2197_v16, %v2318_v19  ;;  %v187_v16 = vand.u32 2147483647, %v2199_v61  ;;  %vm198_vm9 = vweird.f32 %v2234_v1 }
  0xf4   :  { %1211 = vmatpush.bf16.msra.mxu3 %v1667_v37  ;;  %v2279_v37 = vadd.f32 %v2193_v13, %v166_v56  ;;  %v1630_v56 = vld [vmem:[#allocation8 + $0xc0] sm:$0xf]  ;;  %1232 = vmatpush.bf16.msrb.mxu0 %v1647_v48  ;;  %1831 = vrcp.f32 %v2276_v51  ;;  %v264_v48 = vand.u32 2147483647, %v2195_v14  ;;  %vm367_vm15 = vweird.f32 %v2276_v51 }
  0xf5   :  { %1249 = vmatpush.bf16.msrb.mxu1 %v1675_v50  ;;  %v1775_v50 = vld [vmem:[#allocation8 + $0xe8] sm:$0xf0]  ;;  %1833 = vrcp.f32 %v2298_v23  ;;  %vm2420_vm5 = vcmp.eq.f32.partialorder %v187_v16, 8.507059e+37 }
  0xf6   :  { %v1651_v49 = vor.u32 %v1775_v50, %v1650_v43  ;;  %v171_v62 = vsel %vm2306_vm8, %v2193_v13, %v2279_v37  ;;  %v348_v13 = vmul.f32 %v2283_v57, %v2217_v47  ;;  %1835 = vrcp.f32 %v2300_v11 }
  0xf7   :  { %v2408_v41 = vsel %vm2342_vm11, %v175_v10, %v171_v62  ;;  %vm265_vm7 = vcmp.eq.f32.partialorder %v264_v48, 8.507059e+37  ;;  %vm353_vm8 = vweird.f32 %v2283_v57 }
  0xf8   :  { %1212 = vmatpush.bf16.msra.mxu3 %v1655_v17  ;;  %v1771_v17 = vld [vmem:[#allocation8 + $0xc8] sm:$0xf0]  ;;  %1233 = vmatpush.bf16.msrb.mxu0 %v1635_v36  ;;  %v349_v12 = vsub.f32 1.0, %v348_v13  ;;  %v2426_v36 = vsel %vm2364_vm13, %v344_v54, %v340_v24  ;;  %v356_v13 = vand.u32 2147483647, %v2217_v47  ;;  %vm2461_vm11 = vmor %vm352_vm6, %vm353_vm8  ;;  %vm290_vm8 = vweird.f32 %v2298_v23 }
  0xf9   :  { %1250 = vmatpush.bf16.msrb.mxu1 %v1663_v29  ;;  %v2320_v29 = vpop.eup %1827  ;;  %v1631_v34 = vor.u32 %v1771_v17, %v1630_v56  ;;  %v2387_v56 = vsel %vm2348_vm12, %v252_v22, %v248_v4  ;;  %v2390_v17 = vadd.f32 %v2262_v21, %v181_v60  ;;  %vm275_vm12 = vweird.f32 %v2267_v27 }
  0xfa   :  { %v194_v52 = vmul.f32 %v2320_v29, %v2234_v1  ;;  %v2368_v37 = vpop.eup %1829  ;;  %v350_v22 = vmul.f32 %v2283_v57, %v349_v12  ;;  %vm199_vm10 = vweird.f32 %v2320_v29  ;;  %vm2470_vm14 = vcmp.eq.f32.partialorder %v356_v13, 8.507059e+37 }
  0xfb   :  { %v2373_v43 = vpop.eup %1831  ;;  %v271_v35 = vmul.f32 %v2368_v37, %v2267_v27  ;;  %vm276_vm13 = vweird.f32 %v2368_v37  ;;  %vm2480_vm2 = vmor %vm198_vm9, %vm199_vm10 }
  0xfc   :  { %1213 = vmatpush.bf16.msra.mxu3 %v1643_v53  ;;  %v189_v53 = vand.u32 2147483648, %v2199_v61  ;;  %v195_v50 = vsub.f32 1.0, %v194_v52  ;;  %v2400_v59 = vpop.eup %1833  ;;  %v363_v26 = vmul.f32 %v2373_v43, %v2276_v51  ;;  %v263_v61 = vsel %vm2394_vm3, %v2252_v15, %v259_v63  ;;  %vm2501_vm3 = vmor %vm275_vm12, %vm276_vm13 }
  0xfd   :  { %1251 = vmatpush.bf16.msrb.mxu1 %v1651_v49  ;;  %v2383_v49 = vadd.f32 %v2207_v32, %v2189_v7  ;;  %v286_v28 = vmul.f32 %v2400_v59, %v2298_v23  ;;  %v272_v62 = vsub.f32 1.0, %v271_v35  ;;  %v2447_v52 = vsel %vm265_vm7, %v267_v33, %v263_v61 }
  0xfe   :  { %v190_v31 = vor.u32 1.1754944e-38, %v189_v53  ;;  %v196_v4 = vmul.f32 %v2320_v29, %v195_v50  ;;  %v364_v10 = vsub.f32 1.0, %v363_v26  ;;  %v351_v38 = vadd.f32 %v2283_v57, %v350_v22 }
  0xff   :  { %v202_v53 = vand.u32 2147483647, %v2234_v1  ;;  %v273_v16 = vmul.f32 %v2368_v37, %v272_v62  ;;  %vm368_vm0 = vweird.f32 %v2373_v43  ;;  %v279_v35 = vand.u32 2147483647, %v2267_v27 }
 0x100   :  { %1214 = vmatpush.bf16.msra.mxu3 %v1631_v34  ;;  %v2418_v34 = vpop.eup %1835  ;;  %v2454_v24 = vadd.f32 %v2320_v29, %v196_v4  ;;  %v365_v48 = vmul.f32 %v2373_v43, %v364_v10  ;;  %v355_v19 = vsel %vm2461_vm11, %v2283_v57, %v351_v38  ;;  %v373_v33 = vand.u32 2147483648, %v2276_v51 }
 0x101   :  { %1252 = vmatpush.bf16.msrb.mxu1 %v1639_v44  ;;  %v186_v44 = vsel %vm2414_vm4, %v2262_v21, %v2390_v17  ;;  %v2444_v15 = vmul.f32 %v2418_v34, %v2300_v11  ;;  %v358_v21 = vand.u32 2147483648, %v2217_v47  ;;  %v274_v14 = vadd.f32 %v2368_v37, %v273_v16  ;;  %vm2520_vm4 = vmor %vm367_vm15, %vm368_vm0 }
 0x102   :  { %v2495_v4 = vsel %vm2420_vm5, %v190_v31, %v186_v44  ;;  %v366_v22 = vadd.f32 %v2373_v43, %v365_v48  ;;  %v204_v31 = vand.u32 2147483648, %v2234_v1  ;;  %vm2525_vm5 = vcmp.eq.f32.partialorder %v202_v53, 8.507059e+37 }
 0x103   :  { %v359_v47 = vor.u32 1.1754944e-38, %v358_v21  ;;  %v379_v62 = vsub.f32 1.0, %v2444_v15  ;;  %vm280_vm6 = vcmp.eq.f32.partialorder %v279_v35, 8.507059e+37  ;;  %vm291_vm9 = vweird.f32 %v2400_v59 }
 0x104   :  { %v370_v15 = vsel %vm2520_vm4, %v2373_v43, %v366_v22  ;;  %v205_v38 = vor.u32 1.1754944e-38, %v204_v31  ;;  %vm2554_vm10 = vmor %vm290_vm8, %vm291_vm9  ;;  %vm382_vm11 = vweird.f32 %v2300_v11  ;;  %vm383_vm12 = vweird.f32 %v2418_v34 }
 0x105   :  { %v493_v22 = vadd.f32 %v2207_v32, %v2232_v55 }
 0x149   :  { %v2296_v5 = vpop.f32.mrf.mxu0 }
 0x14a   :  { %v780_v7 = vmul.f32 %v2296_v5, %v2315_v18 }
 0x14c   :  { %v784_v30 = vadd.f32 %v780_v7, %v2244_v8  ;;  %v281_v7 = vand.u32 2147483648, %v2267_v27 }
 0x14e   :  { %v282_v10 = vor.u32 1.1754944e-38, %v281_v7 }
 0x151   :  { %v749_v58 = vpop.f32.mrf.mxu0 }
 0x152   :  { %v781_v46 = vmul.f32 %v749_v58, %v2408_v41 }
 0x154   :  { %v785_v61 = vadd.f32 %v781_v46, %v2248_v9  ;;  %v201_v9 = vsel %vm2480_vm2, %v2320_v29, %v2454_v24 }
 0x156   :  { %v815_v3 = vpop.f32.mrf.mxu2 }
 0x157   :  { %v848_v40 = vmul.f32 %v815_v3, %v2387_v56  ;;  %v287_v3 = vsub.f32 1.0, %v286_v28  ;;  %v2514_v28 = vsel %vm2470_vm14, %v359_v47, %v355_v19  ;;  %v388_v19 = vand.u32 2147483648, %v2300_v11  ;;  %vm2571_vm14 = vmor %vm382_vm11, %vm383_vm12 }
 0x159   :  { %v775_v45 = vpop.f32.mrf.mxu1  ;;  %v883_v42 = vpop.f32.mrf.mxu0  ;;  %v852_v60 = vadd.f32 %v848_v40, %v784_v30  ;;  %v371_v40 = vand.u32 2147483647, %v2276_v51  ;;  %v374_v51 = vor.u32 1.1754944e-38, %v373_v33  ;;  %v288_v13 = vmul.f32 %v2400_v59, %v287_v3 }
 0x15a   :  { %v916_v8 = vmul.f32 %v883_v42, %v2426_v36  ;;  %v278_v42 = vsel %vm2501_vm3, %v2368_v37, %v274_v14  ;;  %v782_v21 = vmul.f32 %v775_v45, %v2495_v4  ;;  %v380_v37 = vmul.f32 %v2418_v34, %v379_v62 }
 0x15b   :  { %vm372_vm7 = vcmp.eq.f32.partialorder %v371_v40, 8.507059e+37  ;;  %v2542_v54 = vsel %vm280_vm6, %v282_v10, %v278_v42  ;;  %v289_v43 = vadd.f32 %v2400_v59, %v288_v13  ;;  %v2566_v14 = vsel %vm2525_vm5, %v205_v38, %v201_v9 }
 0x15c   :  { %v920_v63 = vadd.f32 %v916_v8, %v852_v60  ;;  %v296_v8 = vand.u32 2147483648, %v2298_v23  ;;  %v2545_v46 = vsel %vm372_vm7, %v374_v51, %v370_v15  ;;  %v786_v48 = vadd.f32 %v782_v21, %v2383_v49  ;;  %v1071_v21 = vld [vmem:[#allocation10 + $0x3] sm:$0x7] }
 0x15d   :  { %v381_v58 = vadd.f32 %v2418_v34, %v380_v37  ;;  %v386_v49 = vand.u32 2147483647, %v2300_v11  ;;  %v293_v33 = vsel %vm2554_vm10, %v2400_v59, %v289_v43  ;;  %v389_v40 = vor.u32 1.1754944e-38, %v388_v19 }
 0x15e   :  { %v924_v12 = vmax.f32 %v920_v63, 0.0  ;;  %v817_v17 = vpop.f32.mrf.mxu2  ;;  %v294_v63 = vand.u32 2147483647, %v2298_v23  ;;  %v1073_v38 = vperm.slane %v1071_v21, 0 }
 0x15f   :  { %v849_v26 = vmul.f32 %v817_v17, %v2447_v52  ;;  %v297_v17 = vor.u32 1.1754944e-38, %v296_v8  ;;  %v385_v59 = vsel %vm2571_vm14, %v2418_v34, %v381_v58  ;;  %vm387_vm15 = vcmp.eq.f32.partialorder %v386_v49, 8.507059e+37 }
 0x160   :  { %928 = vst [vmem:[#allocation11 + $0x8] sm:$0xff] %v924_v12  ;;  %v932_v24 = vpack.c.bf16 %v924_v12, %v924_v12  ;;  %vm295_vm13 = vcmp.eq.f32.partialorder %v294_v63, 8.507059e+37  ;;  %v2584_v62 = vsel %vm387_vm15, %v389_v40, %v385_v59  ;;  %v1074_v8 = vperm.slane %v1071_v21, 1 }
 0x161   :  { %v777_v5 = vpop.f32.mrf.mxu1  ;;  %v885_v27 = vpop.f32.mrf.mxu0  ;;  %v853_v30 = vadd.f32 %v849_v26, %v785_v61  ;;  %v2578_v9 = vsel %vm295_vm13, %v297_v17, %v293_v33 }
 0x162   :  { %v917_v1 = vmul.f32 %v885_v27, %v2514_v28  ;;  %v962_v35 = vunpack.c.l.b16 %v932_v24  ;;  %v783_v11 = vmul.f32 %v777_v5, %v2566_v14 }
 0x164   :  { %v921_v60 = vadd.f32 %v917_v1, %v853_v30  ;;  %v787_v5 = vadd.f32 %v783_v11, %v493_v22 }
 0x166   :  { %v925_v53 = vmax.f32 %v921_v60, 0.0  ;;  %v843_v45 = vpop.f32.mrf.mxu3 }
 0x167   :  { %v850_v16 = vmul.f32 %v843_v45, %v2542_v54 }
 0x168   :  { %929 = vst [vmem:[#allocation11 + $0x20] sm:$0xff] %v925_v53  ;;  %v933_v50 = vpack.c.bf16 %v925_v53, %v925_v53  ;;  %v1075_v53 = vperm.slane %v1071_v21, 2 }
 0x169   :  { %v911_v12 = vpop.f32.mrf.mxu1  ;;  %v854_v26 = vadd.f32 %v850_v16, %v786_v48 }
 0x16a   :  { %v963_v7 = vunpack.c.l.b16 %v933_v50  ;;  %v918_v23 = vmul.f32 %v911_v12, %v2545_v46 }
 0x16c   :  { %v922_v61 = vadd.f32 %v918_v23, %v854_v26  ;;  %v966_v57 = vpack.c.b16 %v963_v7, %v962_v35 }
 0x16e   :  { %v926_v31 = vmax.f32 %v922_v61, 0.0  ;;  %v845_v27 = vpop.f32.mrf.mxu3  ;;  %1026 = vmatmul.bf16.vlgmr.msra.gmra.mxu2 %v966_v57  ;;  %1215 = vmatmul.bf16.vlgmr.msra.gmra.mxu3 %v966_v57 }
 0x16f   :  { %v851_v44 = vmul.f32 %v845_v27, %v2578_v9  ;;  %1234 = vmatmul.bf16.vlgmr.msrb.gmra.mxu0 %v966_v57  ;;  %1253 = vmatmul.bf16.vlgmr.msrb.gmra.mxu1 %v966_v57 }
 0x170   :  { %930 = vst [vmem:[#allocation11 + $0x38] sm:$0xff] %v926_v31  ;;  %v934_v1 = vpack.c.bf16 %v926_v31, %v926_v31 }
 0x171   :  { %v913_v32 = vpop.f32.mrf.mxu1  ;;  %v855_v55 = vadd.f32 %v851_v44, %v787_v5 }
 0x172   :  { %v919_v30 = vmul.f32 %v913_v32, %v2584_v62  ;;  %v964_v51 = vunpack.c.l.b16 %v934_v1 }
 0x174   :  { %v923_v29 = vadd.f32 %v919_v30, %v855_v55 }
 0x176   :  { %v927_v10 = vmax.f32 %v923_v29, 0.0 }
 0x178   :  { %931 = vst [vmem:[#allocation11 + $0x50] sm:$0xff] %v927_v10  ;;  %v935_v42 = vpack.c.bf16 %v927_v10, %v927_v10 }
 0x17a   :  { %v965_v34 = vunpack.c.l.b16 %v935_v42 }
 0x17c   :  { %v967_v13 = vpack.c.b16 %v965_v34, %v964_v51 }
 0x17e   :  { %1031 = vmatmul.bf16.gmra.mxu2 %v967_v13  ;;  %1220 = vmatmul.bf16.gmra.mxu3 %v967_v13 }
 0x17f   :  { %1239 = vmatmul.bf16.gmra.mxu0 %v967_v13  ;;  %1258 = vmatmul.bf16.gmra.mxu1 %v967_v13 }
 0x1ec   :  { %v1235_v60 = vpop.f32.mrf.mxu0  ;;  %v1254_v15 = vpop.f32.mrf.mxu1 }
 0x1ed   :  { %v1236_v37 = vadd.f32 %v1235_v60, %v1074_v8  ;;  %v1255_v47 = vadd.f32 %v1254_v15, %v1075_v53 }
 0x1ef   :  { %v1316_v43 = vpack.c.bf16 %v1236_v37, %v1236_v37  ;;  %v1368_v26 = vpack.c.bf16 %v1255_v47, %v1255_v47 }
 0x1f1   :  { %v1216_v24 = vpop.f32.mrf.mxu3  ;;  %v1322_v17 = vunpack.c.l.b16 %v1316_v43  ;;  %v1374_v40 = vunpack.c.l.b16 %v1368_v26 }
 0x1f2   :  { %v1217_v50 = vadd.f32 %v1216_v24, %v1073_v38 }
 0x1f4   :  { %v1237_v45 = vpop.f32.mrf.mxu0  ;;  %v1256_v16 = vpop.f32.mrf.mxu1  ;;  %v1264_v35 = vpack.c.bf16 %v1217_v50, %v1217_v50 }
 0x1f5   :  { %v1238_v63 = vadd.f32 %v1237_v45, %v1074_v8  ;;  %v1257_v48 = vadd.f32 %v1256_v16, %v1075_v53 }
 0x1f6   :  { %v1270_v57 = vunpack.c.l.b16 %v1264_v35 }
 0x1f7   :  { %v1317_v12 = vpack.c.bf16 %v1238_v63, %v1238_v63  ;;  %v1369_v49 = vpack.c.bf16 %v1257_v48, %v1257_v48 }
 0x1f9   :  { %v1323_v58 = vunpack.c.l.b16 %v1317_v12  ;;  %v1218_v19 = vpop.f32.mrf.mxu3  ;;  %v1375_v61 = vunpack.c.l.b16 %v1369_v49 }
 0x1fa   :  { %v1219_v7 = vadd.f32 %v1218_v19, %v1073_v38 }
 0x1fb   :  { %v1324_v23 = vpack.c.b16 %v1323_v58, %v1322_v17  ;;  %v1376_v27 = vpack.c.b16 %v1375_v61, %v1374_v40 }
 0x1fc   :  { %v1265_v33 = vpack.c.bf16 %v1219_v7, %v1219_v7  ;;  %v1240_v3 = vpop.f32.mrf.mxu0  ;;  %v1259_v11 = vpop.f32.mrf.mxu1 }
 0x1fd   :  { %1333 = vmatpush.bf16.msra.mxu0 %v1324_v23  ;;  %v1241_v59 = vadd.f32 %v1240_v3, %v1074_v8  ;;  %v1260_v10 = vadd.f32 %v1259_v11, %v1075_v53 }
 0x1fe   :  { %v1271_v22 = vunpack.c.l.b16 %v1265_v33 }
 0x1ff   :  { %v1318_v55 = vpack.c.bf16 %v1241_v59, %v1241_v59  ;;  %v1370_v15 = vpack.c.bf16 %v1260_v10, %v1260_v10 }
 0x200   :  { %v1272_v31 = vpack.c.b16 %v1271_v22, %v1270_v57  ;;  %1726 = vmatmul.msk.bf16.vlgmr.msra.gmra.mxu0 %vm127_vm1, %v2126_v39 }
 0x201   :  { %v1221_v44 = vpop.f32.mrf.mxu3  ;;  %v1342_v51 = vunpack.c.l.b16 %v1318_v55  ;;  %v1394_v43 = vunpack.c.l.b16 %v1370_v15 }
 0x202   :  { %1281 = vmatpush.bf16.msrb.mxu2 %v1272_v31  ;;  %v1222_v1 = vadd.f32 %v1221_v44, %v1073_v38 }
 0x204   :  { %v1242_v5 = vpop.f32.mrf.mxu0  ;;  %v1261_v32 = vpop.f32.mrf.mxu1  ;;  %v1266_v21 = vpack.c.bf16 %v1222_v1, %v1222_v1 }
 0x205   :  { %v1243_v30 = vadd.f32 %v1242_v5, %v1074_v8  ;;  %v1262_v29 = vadd.f32 %v1261_v32, %v1075_v53  ;;  %1724 = vmatmul.msk.bf16.vlgmr.msrb.gmra.mxu2 %vm127_vm1, %v2119_v25 }
 0x206   :  { %1385 = vmatpush.bf16.msra.mxu2 %v1376_v27  ;;  %v1290_v16 = vunpack.c.l.b16 %v1266_v21 }
 0x207   :  { %v1319_v42 = vpack.c.bf16 %v1243_v30, %v1243_v30  ;;  %v1371_v13 = vpack.c.bf16 %v1262_v29, %v1262_v29 }
 0x209   :  { %v1343_v34 = vunpack.c.l.b16 %v1319_v42  ;;  %v1223_v39 = vpop.f32.mrf.mxu3  ;;  %v1395_v45 = vunpack.c.l.b16 %v1371_v13 }
 0x20a   :  { %v1224_v60 = vadd.f32 %v1223_v39, %v1073_v38  ;;  %v1027_v38 = vpop.f32.mrf.mxu2 }
 0x20b   :  { %v1344_v37 = vpack.c.b16 %v1343_v34, %v1342_v51  ;;  %v1396_v25 = vpack.c.b16 %v1395_v45, %v1394_v43 }
 0x20c   :  { %v1267_v24 = vpack.c.bf16 %v1224_v60, %v1224_v60 }
 0x20d   :  { %1353 = vmatpush.bf16.msra.mxu1 %v1344_v37 }
 0x20e   :  { %v1291_v8 = vunpack.c.l.b16 %v1267_v24 }
 0x210   :  { %v1292_v63 = vpack.c.b16 %v1291_v8, %v1290_v16  ;;  %1727 = vmatmul.msk.bf16.vlgmr.msra.gmra.mxu1 %vm127_vm1, %v2153_v2  ;;  %v1812_v2 = vld [vmem:[%s2620_s3 + $0x1] ss:$0 sm:$0xff]  ;;  %s2003_s3 = smov [#allocation11]  }
 0x211   :  { %s1432_s29 = sshll.u32 %s2003_s3, 4  ;;  %s1433_s29 = int_to_ptr.vmem [resolvable:$true] %s1432_s29 }
 0x212   :  { %1301 = vmatpush.bf16.msrb.mxu3 %v1292_v63  ;;  %v1029_v53 = vpop.f32.mrf.mxu2 }
 0x213   :  { %v1030_v23 = vadd.f32 %v1812_v2, %v1029_v53 }
 0x215   :  { %1725 = vmatmul.msk.bf16.vlgmr.msrb.gmra.mxu3 %vm127_vm1, %v2145_v6  ;;  %1728 = vmatmul.msk.bf16.vlgmr.msra.gmra.mxu2 %vm127_vm1, %v2139_v0  ;;  %v1028_v6 = vadd.f32 %v1812_v2, %v1027_v38 }
 0x216   :  { %1405 = vmatpush.bf16.msra.mxu3 %v1396_v25 }
 0x21a   :  { %v1032_v48 = vpop.f32.mrf.mxu2 }
 0x222   :  { %v1034_v50 = vpop.f32.mrf.mxu2 }
 0x223   :  { %v1035_v29 = vadd.f32 %v1812_v2, %v1034_v50 }
 0x225   :  { %1729 = vmatmul.msk.bf16.vlgmr.msra.gmra.mxu3 %vm127_vm1, %v2161_v20 }
 0x27d   :  { %v1335_v58 = vpop.f32.mrf.mxu0 }
 0x27e   :  { %v1360_v0 = vmul.f32 %v1335_v58, %v2387_v56 }
 0x285   :  { %v1337_v3 = vpop.f32.mrf.mxu0 }
 0x286   :  { %v1361_v57 = vmul.f32 %v1337_v3, %v2447_v52 }
 0x288   :  { %v1283_v47 = vpop.f32.mrf.mxu2 }
 0x289   :  { %v1308_v17 = vmul.f32 %v1283_v47, %v2315_v18 }
 0x28b   :  { %v1312_v49 = vadd.f32 %v1308_v17, %v1028_v6 }
 0x28d   :  { %v1364_v7 = vadd.f32 %v1360_v0, %v1312_v49  ;;  %v1355_v27 = vpop.f32.mrf.mxu1 }
 0x28e   :  { %v1362_v5 = vmul.f32 %v1355_v27, %v2542_v54 }
 0x290   :  { %v1285_v12 = vpop.f32.mrf.mxu2 }
 0x291   :  { %v1309_v20 = vmul.f32 %v1285_v12, %v2408_v41  ;;  %v1033_v41 = vadd.f32 %v1812_v2, %v1032_v48 }
 0x293   :  { %v1313_v11 = vadd.f32 %v1309_v20, %v1030_v23 }
 0x295   :  { %v1365_v56 = vadd.f32 %v1361_v57, %v1313_v11 }
 0x298   :  { %v1303_v19 = vpop.f32.mrf.mxu3  ;;  %v1387_v35 = vpop.f32.mrf.mxu2 }
 0x299   :  { %v1412_v26 = vmul.f32 %v1387_v35, %v2426_v36  ;;  %v1310_v40 = vmul.f32 %v1303_v19, %v2495_v4  ;;  %v1357_v4 = vpop.f32.mrf.mxu1 }
 0x29b   :  { %v1416_v33 = vadd.f32 %v1412_v26, %v1364_v7  ;;  %v1314_v44 = vadd.f32 %v1310_v40, %v1033_v41 }
 0x29d   :  { %v1420_v61 = vmax.f32 %v1416_v33, 0.0  ;;  %v1366_v52 = vadd.f32 %v1362_v5, %v1314_v44 }
 0x29f   :  { %1424 = vst [vmem:[#allocation11 + $0x10] sm:$0xff] %v1420_v61 }
 0x2a0   :  { %v1305_v18 = vpop.f32.mrf.mxu3  ;;  %v1389_v22 = vpop.f32.mrf.mxu2 }
 0x2a1   :  { %v1413_v31 = vmul.f32 %v1389_v22, %v2514_v28  ;;  %v1311_v55 = vmul.f32 %v1305_v18, %v2566_v14  ;;  %v1363_v28 = vmul.f32 %v1357_v4, %v2578_v9 }
 0x2a3   :  { %v1417_v59 = vadd.f32 %v1413_v31, %v1365_v56  ;;  %v1315_v10 = vadd.f32 %v1311_v55, %v1035_v29 }
 0x2a5   :  { %v1421_v36 = vmax.f32 %v1417_v59, 0.0  ;;  %v1367_v34 = vadd.f32 %v1363_v28, %v1315_v10 }
 0x2a7   :  { %1425 = vst [vmem:[#allocation11 + $0x28] sm:$0xff] %v1421_v36 }
 0x2a8   :  { %v1407_v32 = vpop.f32.mrf.mxu3 }
 0x2a9   :  { %v1414_v30 = vmul.f32 %v1407_v32, %v2545_v46 }
 0x2ab   :  { %v1418_v1 = vadd.f32 %v1414_v30, %v1366_v52 }
 0x2ad   :  { %v1422_v42 = vmax.f32 %v1418_v1, 0.0 }
 0x2af   :  { %1426 = vst [vmem:[#allocation11 + $0x40] sm:$0xff] %v1422_v42 }
 0x2b0   :  { %v1409_v51 = vpop.f32.mrf.mxu3 }
 0x2b1   :  { %v1415_v13 = vmul.f32 %v1409_v51, %v2584_v62 }
 0x2b3   :  { %v1419_v54 = vadd.f32 %v1415_v13, %v1367_v34 }
 0x2b5   :  { %v1423_v46 = vmax.f32 %v1419_v54, 0.0 }
 0x2b7   :  { %1427 = vst [vmem:[#allocation11 + $0x58] sm:$0xff] %v1423_v46 }
 0x2b8   :  { %1440 = dma.vmem_to_hbm [thread:$0]  %s1433_s29, 1536, %s1435_s8, [#allocation4], %s2004_s9, %s2004_s9, %s2005_s10  }
 0x2b9   :  { %1987 = dma.done.wait [#allocation4], 1536  }
 0x2ba   :  { %1988 = vsyncadd [#allocation4], 4294965760 }
 0x2bb   :  { %1445 = vsyncpa [#allocation3], 1 }
 0x2bc   :  { %1446 = vsyncpa [#allocation6], 1 }
 0x2bd   :  { %1447 = vsyncpa [#allocation9], 1 }
 0x2be   :  { %1448 = vsyncpa [#allocation4], 1 }

// kernel: tpu_custom_call.1
= control target key start
LH: loop header
LB: loop body
LE: loop exit
PB: predicated region body
PF: predicated region fallthrough
CT: control target
= control target key end

     0   :  { %11 = vsyncpa [#allocation3], 0  ;;  %s2617_s0 = inlined_call_operand.hbm [shape: f32[2,16,128], index: 0, kind: input, shape index: {}]   ;;  %s2618_s1 = inlined_call_operand.hbm [shape: s32[2,16,16], index: 1, kind: input, shape index: {}]   ;;  %s2619_s2 = inlined_call_operand.hbm [shape: bf16[2,128,128], index: 2, kind: input, shape index: {}]   ;;  %s2620_s3 = inlined_call_operand.vmem [shape: f32[2,1,128], index: 3, kind: input, shape index: {}]   ;;  %s2621_s4 = inlined_call_operand.hbm [shape: bf16[2,128,384], index: 4, kind: input, shape index: {}]   ;;  %s2622_s5 = inlined_call_operand.hbm [shape: f32[2,1,384], index: 5, kind: input, shape index: {}]   ;;  %s2623_s6 = inlined_call_operand.hbm [shape: f32[2,16,384], index: 6, kind: output, shape index: {}]  }
   0x1   :  { %12 = vsyncpa [#allocation6], 0 }
   0x2   :  { %13 = vsyncpa [#allocation9], 0 }
   0x3   :  { %14 = vsyncpa [#allocation4], 0  ;;  %s32_s23 = sshll.u32 %s2618_s1, 4  ;;  %s1989_s24 = smov [#allocation5]   ;;  %s33_s23 = int_to_ptr.hbm [resolvable:$true] %s32_s23 }
   0x4   :  { %s34_s25 = sshll.u32 %s1989_s24, 4  ;;  %s60_s28 = sshll.u32 %s2621_s4, 4  ;;  %s35_s25 = int_to_ptr.vmem [resolvable:$true] %s34_s25  ;;  %s61_s28 = int_to_ptr.hbm [resolvable:$true] %s60_s28 }
   0x5   :  { %s1990_s29 = smov 128   ;;  %s1991_s30 = smov 8  }
   0x6   :  { %40 = dma.hbm_to_vmem [thread:$0]  %s33_s23, 512, %s35_s25, [#allocation6], %s1990_s29, %s1990_s29, %s1991_s30  }
   0x7   :  { %s1992_s7 = smov [#allocation8]   ;;  %s1993_s9 = smov 192  }
   0x8   :  { %s62_s8 = sshll.u32 %s1992_s7, 4  ;;  %s1994_s10 = smov 12   ;;  %s63_s8 = int_to_ptr.vmem [resolvable:$true] %s62_s8 }
   0x9   :  { %68 = dma.hbm_to_vmem [thread:$0]  %s61_s28, 6144, %s63_s8, [#allocation9], %s1993_s9, %s1993_s9, %s1994_s10  }
   0xa   :  { %s19_s12 = sshll.u32 %s2617_s0, 4  ;;  %s1995_s13 = smov [#allocation2]   ;;  %s20_s12 = int_to_ptr.hbm [resolvable:$true] %s19_s12 }
   0xb   :  { %s21_s14 = sshll.u32 %s1995_s13, 4  ;;  %s45_s16 = sshll.u32 %s2619_s2, 4  ;;  %s22_s14 = int_to_ptr.vmem [resolvable:$true] %s21_s14  ;;  %s46_s16 = int_to_ptr.hbm [resolvable:$true] %s45_s16 }
   0xc   :  { %27 = dma.hbm_to_vmem [thread:$0]  %s20_s12, 512, %s22_s14, [#allocation3], %s1990_s29, %s1990_s29, %s1991_s30  }
   0xd   :  { %s1996_s17 = smov [#allocation7]   ;;  %s1997_s19 = smov 64  }
   0xe   :  { %s47_s18 = sshll.u32 %s1996_s17, 4  ;;  %s1998_s20 = smov 4   ;;  %s48_s18 = int_to_ptr.vmem [resolvable:$true] %s47_s18 }
   0xf   :  { %53 = dma.hbm_to_vmem [thread:$0]  %s46_s16, 2048, %s48_s18, [#allocation6], %s1997_s19, %s1997_s19, %s1998_s20  }
  0x10   :  { %s73_s0 = sshll.u32 %s2622_s5, 4  ;;  %s1999_s23 = smov [#allocation10]   ;;  %s74_s0 = int_to_ptr.hbm [resolvable:$true] %s73_s0 }
  0x11   :  { %s75_s24 = sshll.u32 %s1999_s23, 4  ;;  %s2000_s25 = smov 48   ;;  %s76_s24 = int_to_ptr.vmem [resolvable:$true] %s75_s24 }
  0x12   :  { %s2001_s26 = smov 3  }
  0x13   :  { %81 = dma.hbm_to_vmem [thread:$0]  %s74_s0, 96, %s76_s24, [#allocation9], %s2000_s25, %s2000_s25, %s2001_s26  }
  0x14   :  { %1981 = dma.done.wait [#allocation3], 512  }
  0x15   :  { %1982 = vsyncadd [#allocation3], 4294966784 }
  0x16   :  { %1983 = dma.done.wait [#allocation6], 2560  }
  0x17   :  { %1984 = vsyncadd [#allocation6], 4294964736 }
  0x18   :  { %1985 = dma.done.wait [#allocation9], 6240  }
  0x19   :  { %1986 = vsyncadd [#allocation9], 4294961056  ;;  %v1579_v0 = vld [vmem:[#allocation8 + $0xa8] sm:$0xf]  ;;  %v1760_v1 = vld [vmem:[#allocation8 + $0xb0] sm:$0xf0] }
  0x1a   :  { %v1759_v2 = vld [vmem:[#allocation8 + $0xac] sm:$0xf]  ;;  %v1580_v3 = vor.u32 %v1760_v1, %v1579_v0  ;;  %v1581_v4 = vld [vmem:[#allocation8 + $0xb4] sm:$0xf0]  ;;  %v1587_v5 = vld [vmem:[#allocation8 + $0xb0] sm:$0xf] }
  0x1b   :  { %v1761_v6 = vld [vmem:[#allocation8 + $0xb8] sm:$0xf0]  ;;  %v1584_v7 = vor.u32 %v1759_v2, %v1581_v4  ;;  %v1567_v9 = vld [vmem:[#allocation8 + $0x90] sm:$0xf]  ;;  %v1756_v11 = vld [vmem:[#allocation8 + $0x94] sm:$0xf] }
  0x1c   :  { %v1588_v8 = vor.u32 %v1761_v6, %v1587_v5  ;;  %v1757_v10 = vld [vmem:[#allocation8 + $0x98] sm:$0xf0]  ;;  %663 = vmatpush.bf16.msra.mxu1 %v1580_v3  ;;  %v1569_v13 = vld [vmem:[#allocation8 + $0x9c] sm:$0xf0]  ;;  %v1575_v14 = vld [vmem:[#allocation8 + $0x98] sm:$0xf] }
  0x1d   :  { %v1568_v12 = vor.u32 %v1757_v10, %v1567_v9  ;;  %v1758_v15 = vld [vmem:[#allocation8 + $0xa0] sm:$0xf0]  ;;  %682 = vmatpush.bf16.msra.mxu2 %v1584_v7  ;;  %v1572_v16 = vor.u32 %v1756_v11, %v1569_v13  ;;  %v1555_v18 = vld [vmem:[#allocation8 + $0x78] sm:$0xf]  ;;  %v1753_v20 = vld [vmem:[#allocation8 + $0x7c] sm:$0xf] }
  0x1e   :  { %701 = vmatpush.bf16.msra.mxu3 %v1588_v8  ;;  %v1576_v17 = vor.u32 %v1758_v15, %v1575_v14  ;;  %v1754_v19 = vld [vmem:[#allocation8 + $0x80] sm:$0xf0]  ;;  %v1557_v21 = vld [vmem:[#allocation8 + $0x84] sm:$0xf0]  ;;  %v1563_v22 = vld [vmem:[#allocation8 + $0x80] sm:$0xf] }
  0x1f   :  { %v1755_v23 = vld [vmem:[#allocation8 + $0x88] sm:$0xf0]  ;;  %v1556_v24 = vor.u32 %v1754_v19, %v1555_v18  ;;  %v1560_v25 = vor.u32 %v1753_v20, %v1557_v21  ;;  %v1543_v27 = vld [vmem:[#allocation8 + $0x60] sm:$0xf]  ;;  %v1750_v29 = vld [vmem:[#allocation8 + $0x64] sm:$0xf] }
  0x20   :  { %664 = vmatpush.bf16.msra.mxu1 %v1568_v12  ;;  %v1564_v26 = vor.u32 %v1755_v23, %v1563_v22  ;;  %v1751_v28 = vld [vmem:[#allocation8 + $0x68] sm:$0xf0]  ;;  %v1545_v30 = vld [vmem:[#allocation8 + $0x6c] sm:$0xf0]  ;;  %v1551_v31 = vld [vmem:[#allocation8 + $0x68] sm:$0xf] }
  0x21   :  { %683 = vmatpush.bf16.msra.mxu2 %v1572_v16  ;;  %v1752_v32 = vld [vmem:[#allocation8 + $0x70] sm:$0xf0]  ;;  %v1544_v33 = vor.u32 %v1751_v28, %v1543_v27  ;;  %v1548_v34 = vor.u32 %v1750_v29, %v1545_v30  ;;  %v1531_v36 = vld [vmem:[#allocation8 + $0x48] sm:$0xf]  ;;  %v1747_v38 = vld [vmem:[#allocation8 + $0x4c] sm:$0xf] }
  0x22   :  { %702 = vmatpush.bf16.msra.mxu3 %v1576_v17  ;;  %v1552_v35 = vor.u32 %v1752_v32, %v1551_v31  ;;  %v1748_v37 = vld [vmem:[#allocation8 + $0x50] sm:$0xf0]  ;;  %v1533_v39 = vld [vmem:[#allocation8 + $0x54] sm:$0xf0]  ;;  %v1539_v40 = vld [vmem:[#allocation8 + $0x50] sm:$0xf] }
  0x23   :  { %v1749_v41 = vld [vmem:[#allocation8 + $0x58] sm:$0xf0]  ;;  %v1519_v42 = vld [vmem:[#allocation8 + $0x30] sm:$0xf]  ;;  %v1532_v43 = vor.u32 %v1748_v37, %v1531_v36  ;;  %v1744_v45 = vld [vmem:[#allocation8 + $0x34] sm:$0xf]  ;;  %v1536_v47 = vor.u32 %v1747_v38, %v1533_v39 }
  0x24   :  { %665 = vmatpush.bf16.msra.mxu1 %v1556_v24  ;;  %v1745_v44 = vld [vmem:[#allocation8 + $0x38] sm:$0xf0]  ;;  %v1521_v46 = vld [vmem:[#allocation8 + $0x3c] sm:$0xf0]  ;;  %v1540_v48 = vor.u32 %v1749_v41, %v1539_v40  ;;  %v1527_v49 = vld [vmem:[#allocation8 + $0x38] sm:$0xf] }
  0x25   :  { %684 = vmatpush.bf16.msra.mxu2 %v1560_v25  ;;  %v1746_v50 = vld [vmem:[#allocation8 + $0x40] sm:$0xf0]  ;;  %v104_v52 = vld [vmem:[#allocation2 + $0x8] sm:$0xff]  ;;  %v1507_v53 = vld [vmem:[#allocation8 + $0x18] sm:$0xf]  ;;  %v1520_v55 = vor.u32 %v1745_v44, %v1519_v42  ;;  %v1524_v59 = vor.u32 %v1744_v45, %v1521_v46  ;;  %v2002_v31 = vmov 0.0  }
  0x26   :  { %703 = vmatpush.bf16.msra.mxu3 %v1564_v26  ;;  %v103_v51 = vld [vmem:[#allocation2] sm:$0xff]  ;;  %108 = vst [vmem:[#allocation11 + $0x18] sm:$0xff] %v104_v52  ;;  %v105_v54 = vld [vmem:[#allocation2 + $0x10] sm:$0xff]  ;;  %v106_v57 = vld [vmem:[#allocation2 + $0x18] sm:$0xff]  ;;  %v1528_v60 = vor.u32 %v1746_v50, %v1527_v49  ;;  %v393_v3 = vpack.c.bf16 %v104_v52, %v104_v52  ;;  %vm127_vm1 = vcmask 130048   ;;  %s1434_s8 = sshll.u32 %s2623_s6, 4  ;;  %s1435_s8 = int_to_ptr.hbm [resolvable:$true] %s1434_s8 }
  0x27   :  { %107 = vst [vmem:[#allocation11] sm:$0xff] %v103_v51  ;;  %v1742_v56 = vld [vmem:[#allocation8 + $0x20] sm:$0xf0]  ;;  %v1737_v58 = vld [vmem:[#allocation7 + $0x38] sm:$0xff]  ;;  %v1509_v62 = vld [vmem:[#allocation8 + $0x24] sm:$0xf0]  ;;  %v392_v2 = vpack.c.bf16 %v103_v51, %v103_v51  ;;  %v394_v23 = vpack.c.bf16 %v105_v54, %v105_v54  ;;  %v395_v24 = vpack.c.bf16 %v106_v57, %v106_v57 }
  0x28   :  { %666 = vmatpush.bf16.msra.mxu1 %v1544_v33  ;;  %109 = vst [vmem:[#allocation11 + $0x30] sm:$0xff] %v105_v54  ;;  %v1741_v61 = vld [vmem:[#allocation8 + $0x1c] sm:$0xf]  ;;  %v1515_v63 = vld [vmem:[#allocation8 + $0x20] sm:$0xf]  ;;  %476 = vmatpush.bf16.msra.mxu0 %v1737_v58  ;;  %v1736_v1 = vld [vmem:[#allocation7 + $0x30] sm:$0xff]  ;;  %v1508_v4 = vor.u32 %v1742_v56, %v1507_v53  ;;  %v421_v15 = vunpack.c.l.b16 %v393_v3 }
  0x29   :  { %685 = vmatpush.bf16.msra.mxu2 %v1548_v34  ;;  %110 = vst [vmem:[#allocation11 + $0x48] sm:$0xff] %v106_v57  ;;  %v1743_v0 = vld [vmem:[#allocation8 + $0x28] sm:$0xf0]  ;;  %v1495_v5 = vld [vmem:[#allocation8] sm:$0xf]  ;;  %v1512_v6 = vor.u32 %v1741_v61, %v1509_v62  ;;  %v420_v14 = vunpack.c.l.b16 %v392_v2  ;;  %v1733_v21 = vld [vmem:[#allocation7 + $0x18] sm:$0xff]  ;;  %v422_v26 = vunpack.c.l.b16 %v394_v23  ;;  %v423_v27 = vunpack.c.l.b16 %v395_v24 }
  0x2a   :  { %704 = vmatpush.bf16.msra.mxu3 %v1552_v35  ;;  %v1516_v7 = vor.u32 %v1743_v0, %v1515_v63  ;;  %v1739_v8 = vld [vmem:[#allocation8 + $0x8] sm:$0xf0]  ;;  %v1738_v9 = vld [vmem:[#allocation8 + $0x4] sm:$0xf]  ;;  %v1497_v10 = vld [vmem:[#allocation8 + $0xc] sm:$0xf0] }
  0x2b   :  { %v1503_v11 = vld [vmem:[#allocation8 + $0x8] sm:$0xf]  ;;  %v1740_v12 = vld [vmem:[#allocation8 + $0x10] sm:$0xf0]  ;;  %v1496_v16 = vor.u32 %v1739_v8, %v1495_v5  ;;  %v1500_v17 = vor.u32 %v1738_v9, %v1497_v10  ;;  %v1734_v19 = vld [vmem:[#allocation7 + $0x20] sm:$0xff]  ;;  %v424_v20 = vpack.c.b16 %v421_v15, %v420_v14  ;;  %v425_v29 = vpack.c.b16 %v423_v27, %v422_v26  ;;  %s2004_s9 = smov 384  }
  0x2c   :  { %667 = vmatpush.bf16.msra.mxu1 %v1532_v43  ;;  %477 = vmatpush.bf16.msra.mxu0 %v1736_v1  ;;  %v1735_v13 = vld [vmem:[#allocation7 + $0x28] sm:$0xff]  ;;  %v1504_v18 = vor.u32 %v1740_v12, %v1503_v11  ;;  %v1732_v22 = vld [vmem:[#allocation7 + $0x10] sm:$0xff]  ;;  %v1730_v28 = vld [vmem:[#allocation7] sm:$0xff]  ;;  %s2005_s10 = smov 24  }
  0x2d   :  { %686 = vmatpush.bf16.msra.mxu2 %v1536_v47  ;;  %v1731_v25 = vld [vmem:[#allocation7 + $0x8] sm:$0xff]  ;;  %v111_v30 = vld [vmem:[#allocation5] sm:$0xff]  ;;  %v113_v45 = vld [vmem:[#allocation5 + $0x10] sm:$0xff] }
  0x2e   :  { %705 = vmatpush.bf16.msra.mxu3 %v1540_v48  ;;  %vm115_vm0 = vcmp.eq.s32.totalorder %v111_v30, 1  ;;  %vm208_vm2 = vcmp.eq.s32.totalorder %v111_v30, 2  ;;  %vm300_vm3 = vcmp.eq.s32.totalorder %v111_v30, 3  ;;  %v112_v36 = vld [vmem:[#allocation5 + $0x8] sm:$0xff]  ;;  %vm117_vm7 = vcmp.eq.s32.totalorder %v113_v45, 1  ;;  %v114_v48 = vld [vmem:[#allocation5 + $0x18] sm:$0xff] }
  0x2f   :  { %v2056_v32 = vsel %vm115_vm0, 1.0, %v2002_v31  ;;  %v2060_v34 = vsel %vm208_vm2, 1.0, %v2002_v31  ;;  %v2064_v37 = vsel %vm300_vm3, 1.0, %v2002_v31  ;;  %vm116_vm4 = vcmp.eq.s32.totalorder %v112_v36, 1  ;;  %v527_v51 = vld [vmem:[#allocation10] sm:$0x7] }
  0x30   :  { %668 = vmatpush.bf16.msra.mxu1 %v1520_v55  ;;  %478 = vmatpush.bf16.msra.mxu0 %v1735_v13  ;;  %v128_v33 = vsel %vm127_vm1, %v2056_v32, 0.0  ;;  %v220_v35 = vsel %vm127_vm1, %v2060_v34, 0.0  ;;  %v312_v38 = vsel %vm127_vm1, %v2064_v37, 0.0  ;;  %v1450_v39 = vsel %vm116_vm4, 1.0, %v2002_v31 }
  0x31   :  { %687 = vmatpush.bf16.msra.mxu2 %v1524_v59  ;;  %129 = vadd.xlane.f32.xlu0 %v128_v33  ;;  %v131_v40 = vsel %vm127_vm1, %v1450_v39, 0.0  ;;  %vm209_vm5 = vcmp.eq.s32.totalorder %v112_v36, 2  ;;  %vm301_vm6 = vcmp.eq.s32.totalorder %v112_v36, 3  ;;  %v2077_v46 = vsel %vm117_vm7, 1.0, %v2002_v31 }
  0x32   :  { %706 = vmatpush.bf16.msra.mxu3 %v1528_v60  ;;  %221 = vadd.xlane.f32.xlu1 %v220_v35  ;;  %v2069_v41 = vsel %vm209_vm5, 1.0, %v2002_v31  ;;  %v2073_v43 = vsel %vm301_vm6, 1.0, %v2002_v31  ;;  %v134_v47 = vsel %vm127_vm1, %v2077_v46, 0.0  ;;  %vm210_vm8 = vcmp.eq.s32.totalorder %v113_v45, 2 }
  0x33   :  { %313 = vadd.xlane.f32.xlu2 %v312_v38  ;;  %v223_v42 = vsel %vm127_vm1, %v2069_v41, 0.0  ;;  %v315_v44 = vsel %vm127_vm1, %v2073_v43, 0.0  ;;  %vm118_vm9 = vcmp.eq.s32.totalorder %v114_v48, 1  ;;  %v2081_v49 = vsel %vm210_vm8, 1.0, %v2002_v31 }
  0x34   :  { %669 = vmatpush.bf16.msra.mxu1 %v1508_v4  ;;  %479 = vmatpush.bf16.msra.mxu0 %v1734_v19  ;;  %v2083_v50 = vsel %vm118_vm9, 1.0, %v2002_v31  ;;  %v226_v52 = vsel %vm127_vm1, %v2081_v49, 0.0  ;;  %v2089_v55 = vperm.slane %v527_v51, 0  ;;  %vm211_vm10 = vcmp.eq.s32.totalorder %v114_v48, 2 }
  0x35   :  { %688 = vmatpush.bf16.msra.mxu2 %v1512_v6  ;;  %v137_v53 = vsel %vm127_vm1, %v2083_v50, 0.0  ;;  %v2091_v56 = vsel %vm211_vm10, 1.0, %v2002_v31  ;;  %vm303_vm11 = vcmp.eq.s32.totalorder %v114_v48, 3  ;;  %vm302_vm12 = vcmp.eq.s32.totalorder %v113_v45, 3 }
  0x36   :  { %707 = vmatpush.bf16.msra.mxu3 %v1516_v7  ;;  %v229_v57 = vsel %vm127_vm1, %v2091_v56, 0.0  ;;  %v2096_v59 = vsel %vm303_vm11, 1.0, %v2002_v31  ;;  %v2098_v60 = vsel %vm302_vm12, 1.0, %v2002_v31  ;;  %v2100_v61 = vperm.slane %v527_v51, 2 }
  0x37   :  { %v321_v62 = vsel %vm127_vm1, %v2096_v59, 0.0  ;;  %v318_v63 = vsel %vm127_vm1, %v2098_v60, 0.0  ;;  %v2106_v2 = vperm.slane %v527_v51, 1  ;;  %v144_v4 = vpack.c.bf16 %v2056_v32, %v2056_v32 }
  0x38   :  { %670 = vmatpush.bf16.msra.mxu1 %v1496_v16  ;;  %480 = vmatpush.bf16.msra.mxu0 %v1733_v21  ;;  %v145_v5 = vpack.c.bf16 %v1450_v39, %v1450_v39  ;;  %v236_v16 = vpack.c.bf16 %v2060_v34, %v2060_v34  ;;  %v328_v38 = vpack.c.bf16 %v2064_v37, %v2064_v37 }
  0x39   :  { %689 = vmatpush.bf16.msra.mxu2 %v1500_v17  ;;  %132 = vadd.xlane.f32.xlu0 %v131_v40  ;;  %v726_v11 = vunpack.c.l.b16 %v144_v4  ;;  %v329_v40 = vpack.c.bf16 %v2073_v43, %v2073_v43  ;;  %v146_v45 = vpack.c.bf16 %v2077_v46, %v2077_v46  ;;  %v239_v4 = vpack.c.bf16 %v2091_v56, %v2091_v56 }
  0x3a   :  { %708 = vmatpush.bf16.msra.mxu3 %v1504_v18  ;;  %224 = vadd.xlane.f32.xlu1 %v223_v42  ;;  %v727_v12 = vunpack.c.l.b16 %v145_v5 }
  0x3b   :  { %671 = vmatmul.bf16.vlgmr.msra.gmra.mxu1 %v424_v20  ;;  %316 = vadd.xlane.f32.xlu2 %v315_v44 }
  0x3c   :  { %690 = vmatmul.bf16.vlgmr.msra.gmra.mxu2 %v424_v20  ;;  %481 = vmatpush.bf16.msra.mxu0 %v1732_v22 }
  0x3d   :  { %709 = vmatmul.bf16.vlgmr.msra.gmra.mxu3 %v424_v20 }
  0x40   :  { %482 = vmatpush.bf16.msra.mxu0 %v1731_v25  ;;  %v2119_v25 = vpack.c.b16 %v727_v12, %v726_v11 }
  0x41   :  { %135 = vadd.xlane.f32.xlu0 %v134_v47  ;;  %v147_v47 = vpack.c.bf16 %v2083_v50, %v2083_v50  ;;  %v238_v50 = vpack.c.bf16 %v2081_v49, %v2081_v49 }
  0x42   :  { %138 = vadd.xlane.f32.xlu1 %v137_v53  ;;  %v863_v53 = vunpack.c.l.b16 %v329_v40 }
  0x43   :  { %227 = vadd.xlane.f32.xlu2 %v226_v52  ;;  %v862_v52 = vunpack.c.l.b16 %v328_v38  ;;  %v822_v12 = vunpack.c.l.b16 %v238_v50  ;;  %v1793_v38 = vld [vmem:[#allocation8 + $0x178] sm:$0xf0]  ;;  %v1786_v50 = vld [vmem:[#allocation8 + $0x140] sm:$0xf0] }
  0x44   :  { %483 = vmatpush.bf16.msra.mxu0 %v1730_v28 }
  0x47   :  { %484 = vmatmul.bf16.vlgmr.msra.gmra.mxu0 %v424_v20  ;;  %v237_v20 = vpack.c.bf16 %v2069_v41, %v2069_v41 }
  0x49   :  { %230 = vadd.xlane.f32.xlu0 %v229_v57  ;;  %v795_v30 = vunpack.c.l.b16 %v237_v20  ;;  %v754_v57 = vunpack.c.l.b16 %v146_v45  ;;  %v1789_v45 = vld [vmem:[#allocation8 + $0x158] sm:$0xf0] }
  0x4a   :  { %319 = vadd.xlane.f32.xlu1 %v318_v63 }
  0x4b   :  { %676 = vmatmul.bf16.gmra.mxu1 %v425_v29  ;;  %322 = vadd.xlane.f32.xlu2 %v321_v62 }
  0x4c   :  { %695 = vmatmul.bf16.gmra.mxu2 %v425_v29 }
  0x4d   :  { %714 = vmatmul.bf16.gmra.mxu3 %v425_v29 }
  0x57   :  { %489 = vmatmul.bf16.gmra.mxu0 %v425_v29  ;;  %v794_v29 = vunpack.c.l.b16 %v236_v16 }
  0x59   :  { %v2126_v39 = vpack.c.b16 %v795_v30, %v794_v29  ;;  %v1792_v29 = vld [vmem:[#allocation8 + $0x170] sm:$0xf0] }
  0xb8   :  { %v672_v54 = vpop.f32.mrf.mxu1 }
  0xb9   :  { %v673_v58 = vadd.f32 %v672_v54, %v2089_v55 }
  0xbb   :  { %v720_v6 = vpack.c.bf16 %v673_v58, %v673_v58  ;;  %v755_v58 = vunpack.c.l.b16 %v147_v47 }
  0xbd   :  { %v731_v13 = vunpack.c.l.b16 %v720_v6  ;;  %v2145_v6 = vpack.c.b16 %v755_v58, %v754_v57  ;;  %v1710_v57 = vld [vmem:[#allocation8 + $0x158] sm:$0xf]  ;;  %v1790_v58 = vld [vmem:[#allocation8 + $0x160] sm:$0xf0] }
  0xbf   :  { %v691_v0 = vpop.f32.mrf.mxu2 }
  0xc0   :  { %v710_v1 = vpop.f32.mrf.mxu3  ;;  %v674_v3 = vpop.f32.mrf.mxu1  ;;  %v692_v10 = vadd.f32 %v691_v0, %v2106_v2  ;;  %v2139_v0 = vpack.c.b16 %v863_v53, %v862_v52  ;;  %v1788_v52 = vld [vmem:[#allocation8 + $0x154] sm:$0xf]  ;;  %v1704_v53 = vld [vmem:[#allocation8 + $0x15c] sm:$0xf0] }
  0xc1   :  { %v675_v7 = vadd.f32 %v674_v3, %v2089_v55  ;;  %v711_v8 = vadd.f32 %v710_v1, %v2100_v61 }
  0xc2   :  { %v788_v21 = vpack.c.bf16 %v692_v10, %v692_v10 }
  0xc3   :  { %v721_v9 = vpack.c.bf16 %v675_v7, %v675_v7  ;;  %v856_v15 = vpack.c.bf16 %v711_v8, %v711_v8 }
  0xc4   :  { %v799_v31 = vunpack.c.l.b16 %v788_v21  ;;  %v130_v21 = vpop.xlane.xlu0 %129 }
  0xc5   :  { %v732_v14 = vunpack.c.l.b16 %v721_v9  ;;  %v867_v26 = vunpack.c.l.b16 %v856_v15 }
  0xc7   :  { %v693_v17 = vpop.f32.mrf.mxu2  ;;  %v733_v19 = vpack.c.b16 %v732_v14, %v731_v13  ;;  %v823_v13 = vunpack.c.l.b16 %v239_v4  ;;  %v1692_v4 = vld [vmem:[#allocation8 + $0x144] sm:$0xf0] }
  0xc8   :  { %v712_v18 = vpop.f32.mrf.mxu3  ;;  %v694_v22 = vadd.f32 %v693_v17, %v2106_v2  ;;  %v677_v23 = vpop.f32.mrf.mxu1  ;;  %v330_v17 = vpack.c.bf16 %v2098_v60, %v2098_v60 }
  0xc9   :  { %v713_v24 = vadd.f32 %v712_v18, %v2100_v61  ;;  %745 = vmatpush.bf16.msrb.mxu0 %v733_v19  ;;  %v678_v34 = vadd.f32 %v677_v23, %v2089_v55  ;;  %v2167_v23 = vmax.f32 %v130_v21, 1.0  ;;  %v1782_v21 = vld [vmem:[#allocation8 + $0x124] sm:$0xf] }
  0xca   :  { %v789_v27 = vpack.c.bf16 %v694_v22, %v694_v22  ;;  %v890_v19 = vunpack.c.l.b16 %v330_v17  ;;  %v2165_v22 = vpop.f32.mrf.mxu0 }
  0xcb   :  { %v857_v28 = vpack.c.bf16 %v713_v24, %v713_v24  ;;  %v722_v48 = vpack.c.bf16 %v678_v34, %v678_v34  ;;  %v314_v24 = vpop.xlane.xlu2 %313  ;;  %1813 = vrcp.f32 %v2167_v23  ;;  %v1722_v34 = vld [vmem:[#allocation8 + $0x170] sm:$0xf]  ;;  %vm153_vm13 = vweird.f32 %v2167_v23 }
  0xcc   :  { %v800_v32 = vunpack.c.l.b16 %v789_v27  ;;  %1589 = vmatmul.msk.bf16.vlgmr.msrb.gmra.mxu0 %vm127_vm1, %v2119_v25  ;;  %v1769_v27 = vld [vmem:[#allocation7 + $0x78] sm:$0xff]  ;;  %v1723_v40 = vor.u32 %v1793_v38, %v1722_v34  ;;  %v157_v34 = vand.u32 2147483647, %v2167_v23  ;;  %v159_v38 = vand.u32 2147483648, %v2167_v23 }
  0xcd   :  { %v868_v33 = vunpack.c.l.b16 %v857_v28  ;;  %v759_v62 = vunpack.c.l.b16 %v722_v48  ;;  %v1714_v28 = vld [vmem:[#allocation8 + $0x168] sm:$0xf] }
  0xce   :  { %v801_v36 = vpack.c.b16 %v800_v32, %v799_v31  ;;  %v1715_v31 = vor.u32 %v1792_v29, %v1714_v28  ;;  %v1791_v32 = vld [vmem:[#allocation8 + $0x16c] sm:$0xf]  ;;  %v1686_v29 = vld [vmem:[#allocation8 + $0x128] sm:$0xf]  ;;  %vm2236_vm0 = vcmp.eq.f32.partialorder %v157_v34, 8.507059e+37 }
  0xcf   :  { %v869_v35 = vpack.c.b16 %v868_v33, %v867_v26  ;;  %v696_v41 = vpop.f32.mrf.mxu2  ;;  %v133_v26 = vpop.xlane.xlu0 %132  ;;  %v1716_v33 = vld [vmem:[#allocation8 + $0x174] sm:$0xf0] }
  0xd0   :  { %v715_v42 = vpop.f32.mrf.mxu3  ;;  %813 = vmatpush.bf16.msrb.mxu2 %v801_v36  ;;  %v679_v44 = vpop.f32.mrf.mxu1  ;;  %v697_v43 = vadd.f32 %v696_v41, %v2106_v2  ;;  %v1719_v36 = vor.u32 %v1791_v32, %v1716_v33  ;;  %v2207_v32 = vld [vmem:[%s2620_s3] ss:$0 sm:$0xff] }
  0xd1   :  { %881 = vmatpush.bf16.msra.mxu0 %v869_v35  ;;  %v680_v51 = vadd.f32 %v679_v44, %v2089_v55  ;;  %v716_v37 = vadd.f32 %v715_v42, %v2100_v61  ;;  %v2175_v35 = vmax.f32 %v133_v26, 1.0  ;;  %v2177_v41 = vpop.eup %1813  ;;  %v2179_v42 = vmax.f32 %v314_v24, 1.0  ;;  %v1702_v44 = vld [vmem:[#allocation8 + $0x150] sm:$0xf] }
  0xd2   :  { %v790_v5 = vpack.c.bf16 %v697_v43, %v697_v43  ;;  %v2172_v30 = vpop.f32.mrf.mxu0  ;;  %v1707_v43 = vor.u32 %v1788_v52, %v1704_v53  ;;  %vm154_vm14 = vweird.f32 %v2177_v41  ;;  %v1779_v52 = vld [vmem:[#allocation8 + $0x10c] sm:$0xf]  ;;  %v1668_v53 = vld [vmem:[#allocation8 + $0x114] sm:$0xf0] }
  0xd3   :  { %v723_v54 = vpack.c.bf16 %v680_v51, %v680_v51  ;;  %1591 = vmatmul.msk.bf16.vlgmr.msrb.gmra.mxu2 %vm127_vm1, %v2126_v39  ;;  %v858_v63 = vpack.c.bf16 %v716_v37, %v716_v37  ;;  %v2182_v48 = vpop.xlane.xlu2 %316  ;;  %v1768_v51 = vld [vmem:[#allocation7 + $0x70] sm:$0xff]  ;;  %v1703_v37 = vor.u32 %v1789_v45, %v1702_v44  ;;  %v1666_v44 = vld [vmem:[#allocation8 + $0x108] sm:$0xf]  ;;  %vm2228_vm15 = vmor %vm153_vm13, %vm154_vm14  ;;  %vm168_vm4 = vweird.f32 %v2175_v35 }
  0xd4   :  { %v827_v49 = vunpack.c.l.b16 %v790_v5  ;;  %1018 = vmatpush.bf16.msra.mxu2 %v1769_v27  ;;  %v1698_v5 = vld [vmem:[#allocation8 + $0x140] sm:$0xf]  ;;  %v1780_v45 = vld [vmem:[#allocation8 + $0x110] sm:$0xf0]  ;;  %vm337_vm7 = vweird.f32 %v2179_v42 }
  0xd5   :  { %v760_v46 = vunpack.c.l.b16 %v723_v54  ;;  %v895_v9 = vunpack.c.l.b16 %v858_v63  ;;  %1226 = vmatpush.bf16.msrb.mxu0 %v1719_v36  ;;  %v149_v54 = vmul.f32 %v2177_v41, %v2167_v23  ;;  %v1690_v63 = vld [vmem:[#allocation8 + $0x138] sm:$0xf]  ;;  %v1654_v23 = vld [vmem:[#allocation8 + $0xf0] sm:$0xf] }
  0xd7   :  { %v698_v55 = vpop.f32.mrf.mxu2  ;;  %v761_v3 = vpack.c.b16 %v760_v46, %v759_v62  ;;  %v1711_v46 = vor.u32 %v1790_v58, %v1710_v57  ;;  %v1671_v58 = vor.u32 %v1779_v52, %v1668_v53 }
  0xd8   :  { %v717_v1 = vpop.f32.mrf.mxu3  ;;  %v699_v7 = vadd.f32 %v698_v55, %v2106_v2  ;;  %v2153_v2 = vpack.c.b16 %v823_v13, %v822_v12  ;;  %1019 = vmatpush.bf16.msra.mxu2 %v1768_v51  ;;  %v1785_v55 = vld [vmem:[#allocation8 + $0x13c] sm:$0xf]  ;;  %v1787_v12 = vld [vmem:[#allocation8 + $0x148] sm:$0xf0] }
  0xd9   :  { %v718_v8 = vadd.f32 %v717_v1, %v2100_v61  ;;  %773 = vmatpush.bf16.msrb.mxu1 %v761_v3  ;;  %v331_v61 = vpack.c.bf16 %v2096_v59, %v2096_v59  ;;  %v222_v59 = vpop.xlane.xlu1 %221  ;;  %1227 = vmatpush.bf16.msrb.mxu0 %v1707_v43  ;;  %v1767_v1 = vld [vmem:[#allocation7 + $0x68] sm:$0xff]  ;;  %v1691_v3 = vor.u32 %v1786_v50, %v1690_v63  ;;  %v1765_v51 = vld [vmem:[#allocation7 + $0x58] sm:$0xff] }
  0xda   :  { %v791_v10 = vpack.c.bf16 %v699_v7, %v699_v7  ;;  %v2170_v60 = vmax.f32 %v222_v59, 1.0  ;;  %v2189_v7 = vpop.f32.mrf.mxu0  ;;  %v1680_v59 = vld [vmem:[#allocation8 + $0x12c] sm:$0xf0]  ;;  %v1781_v63 = vld [vmem:[#allocation8 + $0x118] sm:$0xf0] }
  0xdb   :  { %v859_v11 = vpack.c.bf16 %v718_v8, %v718_v8  ;;  %v891_v18 = vunpack.c.l.b16 %v331_v61  ;;  %v136_v8 = vpop.xlane.xlu0 %135  ;;  %v1683_v28 = vor.u32 %v1782_v21, %v1680_v59  ;;  %v228_v33 = vpop.xlane.xlu2 %227 }
  0xdc   :  { %v828_v14 = vunpack.c.l.b16 %v791_v10  ;;  %1590 = vmatmul.msk.bf16.vlgmr.msrb.gmra.mxu1 %vm127_vm1, %v2145_v6  ;;  %1593 = vmatmul.msk.bf16.vlgmr.msra.gmra.mxu0 %vm127_vm1, %v2139_v0  ;;  %1815 = vrcp.f32 %v2170_v60  ;;  %v2199_v61 = vmax.f32 %v136_v8, 1.0  ;;  %v2244_v8 = vadd.f32 %v2207_v32, %v2165_v22 }
  0xdd   :  { %v896_v15 = vunpack.c.l.b16 %v859_v11  ;;  %v2161_v20 = vpack.c.b16 %v891_v18, %v890_v19  ;;  %1817 = vrcp.f32 %v2175_v35  ;;  %v1695_v11 = vor.u32 %v1785_v55, %v1692_v4  ;;  %1020 = vmatpush.bf16.msra.mxu2 %v1767_v1  ;;  %v1766_v18 = vld [vmem:[#allocation7 + $0x60] sm:$0xff] }
  0xde   :  { %v829_v16 = vpack.c.b16 %v828_v14, %v827_v49  ;;  %1819 = vrcp.f32 %v2179_v42  ;;  %v1699_v49 = vor.u32 %v1787_v12, %v1698_v5  ;;  %v2240_v4 = vor.u32 1.1754944e-38, %v159_v38  ;;  %v1777_v12 = vld [vmem:[#allocation8 + $0xf8] sm:$0xf0] }
  0xdf   :  { %v897_v56 = vpack.c.b16 %v896_v15, %v895_v9  ;;  %v150_v9 = vsub.f32 1.0, %v149_v54  ;;  %1228 = vmatpush.bf16.msrb.mxu0 %v1695_v11  ;;  %v1678_v15 = vld [vmem:[#allocation8 + $0x120] sm:$0xf]  ;;  %v1764_v11 = vld [vmem:[#allocation7 + $0x50] sm:$0xff]  ;;  %vm245_vm2 = vweird.f32 %v2170_v60  ;;  %v174_v38 = vand.u32 2147483648, %v2175_v35 }
  0xe0   :  { %841 = vmatpush.bf16.msrb.mxu3 %v829_v16 }
  0xe1   :  { %909 = vmatpush.bf16.msra.mxu1 %v897_v56  ;;  %v225_v47 = vpop.xlane.xlu1 %224  ;;  %v1783_v56 = vld [vmem:[#allocation8 + $0x128] sm:$0xf0]  ;;  %v151_v24 = vmul.f32 %v2177_v41, %v150_v9  ;;  %1021 = vmatpush.bf16.msra.mxu2 %v1766_v18  ;;  %v2248_v9 = vadd.f32 %v2207_v32, %v2172_v30  ;;  %v1656_v18 = vld [vmem:[#allocation8 + $0xfc] sm:$0xf0] }
  0xe2   :  { %v2186_v62 = vpop.eup %1815  ;;  %v2195_v14 = vmax.f32 %v225_v47, 1.0  ;;  %v1679_v19 = vor.u32 %v1783_v56, %v1678_v15  ;;  %v2217_v47 = vmax.f32 %v2182_v48, 1.0  ;;  %v2232_v55 = vpop.f32.mrf.mxu0 }
  0xe3   :  { %1592 = vmatmul.msk.bf16.vlgmr.msrb.gmra.mxu3 %vm127_vm1, %v2153_v2  ;;  %v241_v10 = vmul.f32 %v2186_v62, %v2170_v60  ;;  %v2193_v13 = vpop.eup %1817  ;;  %1229 = vmatpush.bf16.msrb.mxu0 %v1683_v28  ;;  %v2221_v54 = vadd.f32 %v2177_v41, %v151_v24  ;;  %vm246_vm3 = vweird.f32 %v2186_v62  ;;  %v249_v24 = vand.u32 2147483647, %v2170_v60  ;;  %v231_v34 = vpop.xlane.xlu0 %230 }
  0xe4   :  { %1207 = vmatpush.bf16.msra.mxu3 %v1715_v31  ;;  %v2197_v16 = vpop.eup %1819  ;;  %v164_v26 = vmul.f32 %v2193_v13, %v2175_v35  ;;  %v1784_v31 = vld [vmem:[#allocation8 + $0x130] sm:$0xf0]  ;;  %1821 = vrcp.f32 %v2195_v14  ;;  %vm169_vm5 = vweird.f32 %v2193_v13  ;;  %vm2290_vm6 = vmor %vm245_vm2, %vm246_vm3  ;;  %vm260_vm14 = vweird.f32 %v2195_v14 }
  0xe5   :  { %1245 = vmatpush.bf16.msrb.mxu1 %v1723_v40  ;;  %v242_v27 = vsub.f32 1.0, %v241_v10  ;;  %v1687_v36 = vor.u32 %v1784_v31, %v1686_v29  ;;  %v333_v40 = vmul.f32 %v2197_v16, %v2179_v42  ;;  %1823 = vrcp.f32 %v2199_v61  ;;  %1022 = vmatpush.bf16.msra.mxu2 %v1765_v51  ;;  %v1642_v31 = vld [vmem:[#allocation8 + $0xd8] sm:$0xf]  ;;  %vm2306_vm8 = vmor %vm168_vm4, %vm169_vm5 }
  0xe6   :  { %v165_v43 = vsub.f32 1.0, %v164_v26  ;;  %1825 = vrcp.f32 %v2217_v47  ;;  %v251_v10 = vand.u32 2147483648, %v2170_v60  ;;  %v156_v22 = vsel %vm2228_vm15, %v2177_v41, %v2221_v54  ;;  %v1778_v41 = vld [vmem:[#allocation8 + $0x100] sm:$0xf0]  ;;  %v1644_v54 = vld [vmem:[#allocation8 + $0xe4] sm:$0xf0] }
  0xe7   :  { %v243_v57 = vmul.f32 %v2186_v62, %v242_v27  ;;  %v334_v5 = vsub.f32 1.0, %v333_v40  ;;  %1230 = vmatpush.bf16.msrb.mxu0 %v1671_v58  ;;  %v2267_v27 = vmax.f32 %v228_v33, 1.0  ;;  %v1763_v33 = vld [vmem:[#allocation7 + $0x48] sm:$0xff]  ;;  %v172_v58 = vand.u32 2147483647, %v2175_v35 }
  0xe8   :  { %1208 = vmatpush.bf16.msra.mxu3 %v1703_v37  ;;  %v1667_v37 = vor.u32 %v1780_v45, %v1666_v44  ;;  %v166_v56 = vmul.f32 %v2193_v13, %v165_v43  ;;  %v1774_v44 = vld [vmem:[#allocation8 + $0xe0] sm:$0xf0]  ;;  %v1773_v45 = vld [vmem:[#allocation8 + $0xdc] sm:$0xf]  ;;  %v1650_v43 = vld [vmem:[#allocation8 + $0xe0] sm:$0xf]  ;;  %vm338_vm9 = vweird.f32 %v2197_v16 }
  0xe9   :  { %1246 = vmatpush.bf16.msrb.mxu1 %v1711_v46  ;;  %v139_v17 = vpop.xlane.xlu1 %138  ;;  %v1674_v46 = vld [vmem:[#allocation8 + $0x110] sm:$0xf]  ;;  %v2260_v30 = vadd.f32 %v2186_v62, %v243_v57  ;;  %1023 = vmatpush.bf16.msra.mxu2 %v1764_v11  ;;  %v335_v28 = vmul.f32 %v2197_v16, %v334_v5  ;;  %v1643_v53 = vor.u32 %v1774_v44, %v1642_v31  ;;  %vm2333_vm10 = vmor %vm337_vm7, %vm338_vm9  ;;  %vm2342_vm11 = vcmp.eq.f32.partialorder %v172_v58, 8.507059e+37 }
  0xea   :  { %v1675_v50 = vor.u32 %v1781_v63, %v1674_v46  ;;  %v2234_v1 = vmax.f32 %v139_v17, 1.0  ;;  %v2252_v15 = vpop.eup %1821  ;;  %v1655_v17 = vor.u32 %v1777_v12, %v1654_v23  ;;  %v341_v63 = vand.u32 2147483647, %v2179_v42 }
  0xeb   :  { %v2262_v21 = vpop.eup %1823  ;;  %v256_v40 = vmul.f32 %v2252_v15, %v2195_v14  ;;  %v1647_v48 = vor.u32 %v1773_v45, %v1644_v54  ;;  %v2298_v23 = vmax.f32 %v231_v34, 1.0  ;;  %vm2348_vm12 = vcmp.eq.f32.partialorder %v249_v24, 8.507059e+37 }
  0xec   :  { %1594 = vmatmul.msk.bf16.vlgmr.msra.gmra.mxu1 %vm127_vm1, %v2161_v20  ;;  %1209 = vmatpush.bf16.msra.mxu3 %v1691_v3  ;;  %1827 = vrcp.f32 %v2234_v1  ;;  %v179_v52 = vmul.f32 %v2262_v21, %v2199_v61  ;;  %v2283_v57 = vpop.eup %1825  ;;  %v1772_v3 = vld [vmem:[#allocation8 + $0xd0] sm:$0xf0]  ;;  %vm2364_vm13 = vcmp.eq.f32.partialorder %v341_v63, 8.507059e+37  ;;  %vm261_vm15 = vweird.f32 %v2252_v15 }
  0xed   :  { %1247 = vmatpush.bf16.msrb.mxu1 %v1699_v49  ;;  %v1776_v49 = vld [vmem:[#allocation8 + $0xf4] sm:$0xf]  ;;  %1024 = vmatpush.bf16.msra.mxu2 %v1763_v33  ;;  %1829 = vrcp.f32 %v2267_v27  ;;  %v257_v35 = vsub.f32 1.0, %v256_v40  ;;  %v1638_v33 = vld [vmem:[#allocation8 + $0xc8] sm:$0xf]  ;;  %v343_v40 = vand.u32 2147483648, %v2179_v42  ;;  %vm184_vm2 = vweird.f32 %v2262_v21  ;;  %vm2394_vm3 = vmor %vm260_vm14, %vm261_vm15 }
  0xee   :  { %v1659_v26 = vor.u32 %v1776_v49, %v1656_v18  ;;  %v2315_v18 = vsel %vm2236_vm0, %v2240_v4, %v156_v22  ;;  %v180_v31 = vsub.f32 1.0, %v179_v52  ;;  %v248_v4 = vsel %vm2290_vm6, %v2186_v62, %v2260_v30 }
  0xef   :  { %v252_v22 = vor.u32 1.1754944e-38, %v251_v10  ;;  %v1639_v44 = vor.u32 %v1772_v3, %v1638_v33  ;;  %v175_v10 = vor.u32 1.1754944e-38, %v174_v38  ;;  %v258_v42 = vmul.f32 %v2252_v15, %v257_v35 }
  0xf0   :  { %1210 = vmatpush.bf16.msra.mxu3 %v1679_v19  ;;  %v1662_v19 = vld [vmem:[#allocation8 + $0xf8] sm:$0xf]  ;;  %1231 = vmatpush.bf16.msrb.mxu0 %v1659_v26  ;;  %v1770_v26 = vld [vmem:[#allocation8 + $0xc4] sm:$0xf]  ;;  %v181_v60 = vmul.f32 %v2262_v21, %v180_v31  ;;  %v344_v54 = vor.u32 1.1754944e-38, %v343_v40  ;;  %vm183_vm0 = vweird.f32 %v2199_v61  ;;  %v266_v46 = vand.u32 2147483648, %v2195_v14 }
  0xf1   :  { %1248 = vmatpush.bf16.msrb.mxu1 %v1687_v36  ;;  %v320_v59 = vpop.xlane.xlu1 %319  ;;  %v1663_v29 = vor.u32 %v1778_v41, %v1662_v19  ;;  %v323_v36 = vpop.xlane.xlu2 %322  ;;  %v2318_v19 = vadd.f32 %v2197_v16, %v335_v28  ;;  %v1632_v41 = vld [vmem:[#allocation8 + $0xcc] sm:$0xf0]  ;;  %v259_v63 = vadd.f32 %v2252_v15, %v258_v42  ;;  %vm2414_vm4 = vmor %vm183_vm0, %vm184_vm2  ;;  %vm352_vm6 = vweird.f32 %v2217_v47 }
  0xf2   :  { %v2276_v51 = vmax.f32 %v320_v59, 1.0  ;;  %v2300_v11 = vmax.f32 %v323_v36, 1.0  ;;  %v1762_v59 = vld [vmem:[#allocation7 + $0x40] sm:$0xff]  ;;  %v1635_v36 = vor.u32 %v1770_v26, %v1632_v41  ;;  %v267_v33 = vor.u32 1.1754944e-38, %v266_v46 }
  0xf3   :  { %1025 = vmatpush.bf16.msra.mxu2 %v1762_v59  ;;  %v340_v24 = vsel %vm2333_vm10, %v2197_v16, %v2318_v19  ;;  %v187_v16 = vand.u32 2147483647, %v2199_v61  ;;  %vm198_vm9 = vweird.f32 %v2234_v1 }
  0xf4   :  { %1211 = vmatpush.bf16.msra.mxu3 %v1667_v37  ;;  %v2279_v37 = vadd.f32 %v2193_v13, %v166_v56  ;;  %v1630_v56 = vld [vmem:[#allocation8 + $0xc0] sm:$0xf]  ;;  %1232 = vmatpush.bf16.msrb.mxu0 %v1647_v48  ;;  %1831 = vrcp.f32 %v2276_v51  ;;  %v264_v48 = vand.u32 2147483647, %v2195_v14  ;;  %vm367_vm15 = vweird.f32 %v2276_v51 }
  0xf5   :  { %1249 = vmatpush.bf16.msrb.mxu1 %v1675_v50  ;;  %v1775_v50 = vld [vmem:[#allocation8 + $0xe8] sm:$0xf0]  ;;  %1833 = vrcp.f32 %v2298_v23  ;;  %vm2420_vm5 = vcmp.eq.f32.partialorder %v187_v16, 8.507059e+37 }
  0xf6   :  { %v1651_v49 = vor.u32 %v1775_v50, %v1650_v43  ;;  %v171_v62 = vsel %vm2306_vm8, %v2193_v13, %v2279_v37  ;;  %v348_v13 = vmul.f32 %v2283_v57, %v2217_v47  ;;  %1835 = vrcp.f32 %v2300_v11 }
  0xf7   :  { %v2408_v41 = vsel %vm2342_vm11, %v175_v10, %v171_v62  ;;  %vm265_vm7 = vcmp.eq.f32.partialorder %v264_v48, 8.507059e+37  ;;  %vm353_vm8 = vweird.f32 %v2283_v57 }
  0xf8   :  { %1212 = vmatpush.bf16.msra.mxu3 %v1655_v17  ;;  %v1771_v17 = vld [vmem:[#allocation8 + $0xc8] sm:$0xf0]  ;;  %1233 = vmatpush.bf16.msrb.mxu0 %v1635_v36  ;;  %v349_v12 = vsub.f32 1.0, %v348_v13  ;;  %v2426_v36 = vsel %vm2364_vm13, %v344_v54, %v340_v24  ;;  %v356_v13 = vand.u32 2147483647, %v2217_v47  ;;  %vm2461_vm11 = vmor %vm352_vm6, %vm353_vm8  ;;  %vm290_vm8 = vweird.f32 %v2298_v23 }
  0xf9   :  { %1250 = vmatpush.bf16.msrb.mxu1 %v1663_v29  ;;  %v2320_v29 = vpop.eup %1827  ;;  %v1631_v34 = vor.u32 %v1771_v17, %v1630_v56  ;;  %v2387_v56 = vsel %vm2348_vm12, %v252_v22, %v248_v4  ;;  %v2390_v17 = vadd.f32 %v2262_v21, %v181_v60  ;;  %vm275_vm12 = vweird.f32 %v2267_v27 }
  0xfa   :  { %v194_v52 = vmul.f32 %v2320_v29, %v2234_v1  ;;  %v2368_v37 = vpop.eup %1829  ;;  %v350_v22 = vmul.f32 %v2283_v57, %v349_v12  ;;  %vm199_vm10 = vweird.f32 %v2320_v29  ;;  %vm2470_vm14 = vcmp.eq.f32.partialorder %v356_v13, 8.507059e+37 }
  0xfb   :  { %v2373_v43 = vpop.eup %1831  ;;  %v271_v35 = vmul.f32 %v2368_v37, %v2267_v27  ;;  %vm276_vm13 = vweird.f32 %v2368_v37  ;;  %vm2480_vm2 = vmor %vm198_vm9, %vm199_vm10 }
  0xfc   :  { %1213 = vmatpush.bf16.msra.mxu3 %v1643_v53  ;;  %v189_v53 = vand.u32 2147483648, %v2199_v61  ;;  %v195_v50 = vsub.f32 1.0, %v194_v52  ;;  %v2400_v59 = vpop.eup %1833  ;;  %v363_v26 = vmul.f32 %v2373_v43, %v2276_v51  ;;  %v263_v61 = vsel %vm2394_vm3, %v2252_v15, %v259_v63  ;;  %vm2501_vm3 = vmor %vm275_vm12, %vm276_vm13 }
  0xfd   :  { %1251 = vmatpush.bf16.msrb.mxu1 %v1651_v49  ;;  %v2383_v49 = vadd.f32 %v2207_v32, %v2189_v7  ;;  %v286_v28 = vmul.f32 %v2400_v59, %v2298_v23  ;;  %v272_v62 = vsub.f32 1.0, %v271_v35  ;;  %v2447_v52 = vsel %vm265_vm7, %v267_v33, %v263_v61 }
  0xfe   :  { %v190_v31 = vor.u32 1.1754944e-38, %v189_v53  ;;  %v196_v4 = vmul.f32 %v2320_v29, %v195_v50  ;;  %v364_v10 = vsub.f32 1.0, %v363_v26  ;;  %v351_v38 = vadd.f32 %v2283_v57, %v350_v22 }
  0xff   :  { %v202_v53 = vand.u32 2147483647, %v2234_v1  ;;  %v273_v16 = vmul.f32 %v2368_v37, %v272_v62  ;;  %vm368_vm0 = vweird.f32 %v2373_v43  ;;  %v279_v35 = vand.u32 2147483647, %v2267_v27 }
 0x100   :  { %1214 = vmatpush.bf16.msra.mxu3 %v1631_v34  ;;  %v2418_v34 = vpop.eup %1835  ;;  %v2454_v24 = vadd.f32 %v2320_v29, %v196_v4  ;;  %v365_v48 = vmul.f32 %v2373_v43, %v364_v10  ;;  %v355_v19 = vsel %vm2461_vm11, %v2283_v57, %v351_v38  ;;  %v373_v33 = vand.u32 2147483648, %v2276_v51 }
 0x101   :  { %1252 = vmatpush.bf16.msrb.mxu1 %v1639_v44  ;;  %v186_v44 = vsel %vm2414_vm4, %v2262_v21, %v2390_v17  ;;  %v2444_v15 = vmul.f32 %v2418_v34, %v2300_v11  ;;  %v358_v21 = vand.u32 2147483648, %v2217_v47  ;;  %v274_v14 = vadd.f32 %v2368_v37, %v273_v16  ;;  %vm2520_vm4 = vmor %vm367_vm15, %vm368_vm0 }
 0x102   :  { %v2495_v4 = vsel %vm2420_vm5, %v190_v31, %v186_v44  ;;  %v366_v22 = vadd.f32 %v2373_v43, %v365_v48  ;;  %v204_v31 = vand.u32 2147483648, %v2234_v1  ;;  %vm2525_vm5 = vcmp.eq.f32.partialorder %v202_v53, 8.507059e+37 }
 0x103   :  { %v359_v47 = vor.u32 1.1754944e-38, %v358_v21  ;;  %v379_v62 = vsub.f32 1.0, %v2444_v15  ;;  %vm280_vm6 = vcmp.eq.f32.partialorder %v279_v35, 8.507059e+37  ;;  %vm291_vm9 = vweird.f32 %v2400_v59 }
 0x104   :  { %v370_v15 = vsel %vm2520_vm4, %v2373_v43, %v366_v22  ;;  %v205_v38 = vor.u32 1.1754944e-38, %v204_v31  ;;  %vm2554_vm10 = vmor %vm290_vm8, %vm291_vm9  ;;  %vm382_vm11 = vweird.f32 %v2300_v11  ;;  %vm383_vm12 = vweird.f32 %v2418_v34 }
 0x105   :  { %v493_v22 = vadd.f32 %v2207_v32, %v2232_v55 }
 0x149   :  { %v2296_v5 = vpop.f32.mrf.mxu0 }
 0x14a   :  { %v780_v7 = vmul.f32 %v2296_v5, %v2315_v18 }
 0x14c   :  { %v784_v30 = vadd.f32 %v780_v7, %v2244_v8  ;;  %v281_v7 = vand.u32 2147483648, %v2267_v27 }
 0x14e   :  { %v282_v10 = vor.u32 1.1754944e-38, %v281_v7 }
 0x151   :  { %v749_v58 = vpop.f32.mrf.mxu0 }
 0x152   :  { %v781_v46 = vmul.f32 %v749_v58, %v2408_v41 }
 0x154   :  { %v785_v61 = vadd.f32 %v781_v46, %v2248_v9  ;;  %v201_v9 = vsel %vm2480_vm2, %v2320_v29, %v2454_v24 }
 0x156   :  { %v815_v3 = vpop.f32.mrf.mxu2 }
 0x157   :  { %v848_v40 = vmul.f32 %v815_v3, %v2387_v56  ;;  %v287_v3 = vsub.f32 1.0, %v286_v28  ;;  %v2514_v28 = vsel %vm2470_vm14, %v359_v47, %v355_v19  ;;  %v388_v19 = vand.u32 2147483648, %v2300_v11  ;;  %vm2571_vm14 = vmor %vm382_vm11, %vm383_vm12 }
 0x159   :  { %v775_v45 = vpop.f32.mrf.mxu1  ;;  %v883_v42 = vpop.f32.mrf.mxu0  ;;  %v852_v60 = vadd.f32 %v848_v40, %v784_v30  ;;  %v371_v40 = vand.u32 2147483647, %v2276_v51  ;;  %v374_v51 = vor.u32 1.1754944e-38, %v373_v33  ;;  %v288_v13 = vmul.f32 %v2400_v59, %v287_v3 }
 0x15a   :  { %v916_v8 = vmul.f32 %v883_v42, %v2426_v36  ;;  %v278_v42 = vsel %vm2501_vm3, %v2368_v37, %v274_v14  ;;  %v782_v21 = vmul.f32 %v775_v45, %v2495_v4  ;;  %v380_v37 = vmul.f32 %v2418_v34, %v379_v62 }
 0x15b   :  { %vm372_vm7 = vcmp.eq.f32.partialorder %v371_v40, 8.507059e+37  ;;  %v2542_v54 = vsel %vm280_vm6, %v282_v10, %v278_v42  ;;  %v289_v43 = vadd.f32 %v2400_v59, %v288_v13  ;;  %v2566_v14 = vsel %vm2525_vm5, %v205_v38, %v201_v9 }
 0x15c   :  { %v920_v63 = vadd.f32 %v916_v8, %v852_v60  ;;  %v296_v8 = vand.u32 2147483648, %v2298_v23  ;;  %v2545_v46 = vsel %vm372_vm7, %v374_v51, %v370_v15  ;;  %v786_v48 = vadd.f32 %v782_v21, %v2383_v49  ;;  %v1071_v21 = vld [vmem:[#allocation10 + $0x3] sm:$0x7] }
 0x15d   :  { %v381_v58 = vadd.f32 %v2418_v34, %v380_v37  ;;  %v386_v49 = vand.u32 2147483647, %v2300_v11  ;;  %v293_v33 = vsel %vm2554_vm10, %v2400_v59, %v289_v43  ;;  %v389_v40 = vor.u32 1.1754944e-38, %v388_v19 }
 0x15e   :  { %v924_v12 = vmax.f32 %v920_v63, 0.0  ;;  %v817_v17 = vpop.f32.mrf.mxu2  ;;  %v294_v63 = vand.u32 2147483647, %v2298_v23  ;;  %v1073_v38 = vperm.slane %v1071_v21, 0 }
 0x15f   :  { %v849_v26 = vmul.f32 %v817_v17, %v2447_v52  ;;  %v297_v17 = vor.u32 1.1754944e-38, %v296_v8  ;;  %v385_v59 = vsel %vm2571_vm14, %v2418_v34, %v381_v58  ;;  %vm387_vm15 = vcmp.eq.f32.partialorder %v386_v49, 8.507059e+37 }
 0x160   :  { %928 = vst [vmem:[#allocation11 + $0x8] sm:$0xff] %v924_v12  ;;  %v932_v24 = vpack.c.bf16 %v924_v12, %v924_v12  ;;  %vm295_vm13 = vcmp.eq.f32.partialorder %v294_v63, 8.507059e+37  ;;  %v2584_v62 = vsel %vm387_vm15, %v389_v40, %v385_v59  ;;  %v1074_v8 = vperm.slane %v1071_v21, 1 }
 0x161   :  { %v777_v5 = vpop.f32.mrf.mxu1  ;;  %v885_v27 = vpop.f32.mrf.mxu0  ;;  %v853_v30 = vadd.f32 %v849_v26, %v785_v61  ;;  %v2578_v9 = vsel %vm295_vm13, %v297_v17, %v293_v33 }
 0x162   :  { %v917_v1 = vmul.f32 %v885_v27, %v2514_v28  ;;  %v962_v35 = vunpack.c.l.b16 %v932_v24  ;;  %v783_v11 = vmul.f32 %v777_v5, %v2566_v14 }
 0x164   :  { %v921_v60 = vadd.f32 %v917_v1, %v853_v30  ;;  %v787_v5 = vadd.f32 %v783_v11, %v493_v22 }
 0x166   :  { %v925_v53 = vmax.f32 %v921_v60, 0.0  ;;  %v843_v45 = vpop.f32.mrf.mxu3 }
 0x167   :  { %v850_v16 = vmul.f32 %v843_v45, %v2542_v54 }
 0x168   :  { %929 = vst [vmem:[#allocation11 + $0x20] sm:$0xff] %v925_v53  ;;  %v933_v50 = vpack.c.bf16 %v925_v53, %v925_v53  ;;  %v1075_v53 = vperm.slane %v1071_v21, 2 }
 0x169   :  { %v911_v12 = vpop.f32.mrf.mxu1  ;;  %v854_v26 = vadd.f32 %v850_v16, %v786_v48 }
 0x16a   :  { %v963_v7 = vunpack.c.l.b16 %v933_v50  ;;  %v918_v23 = vmul.f32 %v911_v12, %v2545_v46 }
 0x16c   :  { %v922_v61 = vadd.f32 %v918_v23, %v854_v26  ;;  %v966_v57 = vpack.c.b16 %v963_v7, %v962_v35 }
 0x16e   :  { %v926_v31 = vmax.f32 %v922_v61, 0.0  ;;  %v845_v27 = vpop.f32.mrf.mxu3  ;;  %1026 = vmatmul.bf16.vlgmr.msra.gmra.mxu2 %v966_v57  ;;  %1215 = vmatmul.bf16.vlgmr.msra.gmra.mxu3 %v966_v57 }
 0x16f   :  { %v851_v44 = vmul.f32 %v845_v27, %v2578_v9  ;;  %1234 = vmatmul.bf16.vlgmr.msrb.gmra.mxu0 %v966_v57  ;;  %1253 = vmatmul.bf16.vlgmr.msrb.gmra.mxu1 %v966_v57 }
 0x170   :  { %930 = vst [vmem:[#allocation11 + $0x38] sm:$0xff] %v926_v31  ;;  %v934_v1 = vpack.c.bf16 %v926_v31, %v926_v31 }
 0x171   :  { %v913_v32 = vpop.f32.mrf.mxu1  ;;  %v855_v55 = vadd.f32 %v851_v44, %v787_v5 }
 0x172   :  { %v919_v30 = vmul.f32 %v913_v32, %v2584_v62  ;;  %v964_v51 = vunpack.c.l.b16 %v934_v1 }
 0x174   :  { %v923_v29 = vadd.f32 %v919_v30, %v855_v55 }
 0x176   :  { %v927_v10 = vmax.f32 %v923_v29, 0.0 }
 0x178   :  { %931 = vst [vmem:[#allocation11 + $0x50] sm:$0xff] %v927_v10  ;;  %v935_v42 = vpack.c.bf16 %v927_v10, %v927_v10 }
 0x17a   :  { %v965_v34 = vunpack.c.l.b16 %v935_v42 }
 0x17c   :  { %v967_v13 = vpack.c.b16 %v965_v34, %v964_v51 }
 0x17e   :  { %1031 = vmatmul.bf16.gmra.mxu2 %v967_v13  ;;  %1220 = vmatmul.bf16.gmra.mxu3 %v967_v13 }
 0x17f   :  { %1239 = vmatmul.bf16.gmra.mxu0 %v967_v13  ;;  %1258 = vmatmul.bf16.gmra.mxu1 %v967_v13 }
 0x1ec   :  { %v1235_v60 = vpop.f32.mrf.mxu0  ;;  %v1254_v15 = vpop.f32.mrf.mxu1 }
 0x1ed   :  { %v1236_v37 = vadd.f32 %v1235_v60, %v1074_v8  ;;  %v1255_v47 = vadd.f32 %v1254_v15, %v1075_v53 }
 0x1ef   :  { %v1316_v43 = vpack.c.bf16 %v1236_v37, %v1236_v37  ;;  %v1368_v26 = vpack.c.bf16 %v1255_v47, %v1255_v47 }
 0x1f1   :  { %v1216_v24 = vpop.f32.mrf.mxu3  ;;  %v1322_v17 = vunpack.c.l.b16 %v1316_v43  ;;  %v1374_v40 = vunpack.c.l.b16 %v1368_v26 }
 0x1f2   :  { %v1217_v50 = vadd.f32 %v1216_v24, %v1073_v38 }
 0x1f4   :  { %v1237_v45 = vpop.f32.mrf.mxu0  ;;  %v1256_v16 = vpop.f32.mrf.mxu1  ;;  %v1264_v35 = vpack.c.bf16 %v1217_v50, %v1217_v50 }
 0x1f5   :  { %v1238_v63 = vadd.f32 %v1237_v45, %v1074_v8  ;;  %v1257_v48 = vadd.f32 %v1256_v16, %v1075_v53 }
 0x1f6   :  { %v1270_v57 = vunpack.c.l.b16 %v1264_v35 }
 0x1f7   :  { %v1317_v12 = vpack.c.bf16 %v1238_v63, %v1238_v63  ;;  %v1369_v49 = vpack.c.bf16 %v1257_v48, %v1257_v48 }
 0x1f9   :  { %v1323_v58 = vunpack.c.l.b16 %v1317_v12  ;;  %v1218_v19 = vpop.f32.mrf.mxu3  ;;  %v1375_v61 = vunpack.c.l.b16 %v1369_v49 }
 0x1fa   :  { %v1219_v7 = vadd.f32 %v1218_v19, %v1073_v38 }
 0x1fb   :  { %v1324_v23 = vpack.c.b16 %v1323_v58, %v1322_v17  ;;  %v1376_v27 = vpack.c.b16 %v1375_v61, %v1374_v40 }
 0x1fc   :  { %v1265_v33 = vpack.c.bf16 %v1219_v7, %v1219_v7  ;;  %v1240_v3 = vpop.f32.mrf.mxu0  ;;  %v1259_v11 = vpop.f32.mrf.mxu1 }
 0x1fd   :  { %1333 = vmatpush.bf16.msra.mxu0 %v1324_v23  ;;  %v1241_v59 = vadd.f32 %v1240_v3, %v1074_v8  ;;  %v1260_v10 = vadd.f32 %v1259_v11, %v1075_v53 }
 0x1fe   :  { %v1271_v22 = vunpack.c.l.b16 %v1265_v33 }
 0x1ff   :  { %v1318_v55 = vpack.c.bf16 %v1241_v59, %v1241_v59  ;;  %v1370_v15 = vpack.c.bf16 %v1260_v10, %v1260_v10 }
 0x200   :  { %v1272_v31 = vpack.c.b16 %v1271_v22, %v1270_v57  ;;  %1726 = vmatmul.msk.bf16.vlgmr.msra.gmra.mxu0 %vm127_vm1, %v2126_v39 }
 0x201   :  { %v1221_v44 = vpop.f32.mrf.mxu3  ;;  %v1342_v51 = vunpack.c.l.b16 %v1318_v55  ;;  %v1394_v43 = vunpack.c.l.b16 %v1370_v15 }
 0x202   :  { %1281 = vmatpush.bf16.msrb.mxu2 %v1272_v31  ;;  %v1222_v1 = vadd.f32 %v1221_v44, %v1073_v38 }
 0x204   :  { %v1242_v5 = vpop.f32.mrf.mxu0  ;;  %v1261_v32 = vpop.f32.mrf.mxu1  ;;  %v1266_v21 = vpack.c.bf16 %v1222_v1, %v1222_v1 }
 0x205   :  { %v1243_v30 = vadd.f32 %v1242_v5, %v1074_v8  ;;  %v1262_v29 = vadd.f32 %v1261_v32, %v1075_v53  ;;  %1724 = vmatmul.msk.bf16.vlgmr.msrb.gmra.mxu2 %vm127_vm1, %v2119_v25 }
 0x206   :  { %1385 = vmatpush.bf16.msra.mxu2 %v1376_v27  ;;  %v1290_v16 = vunpack.c.l.b16 %v1266_v21 }
 0x207   :  { %v1319_v42 = vpack.c.bf16 %v1243_v30, %v1243_v30  ;;  %v1371_v13 = vpack.c.bf16 %v1262_v29, %v1262_v29 }
 0x209   :  { %v1343_v34 = vunpack.c.l.b16 %v1319_v42  ;;  %v1223_v39 = vpop.f32.mrf.mxu3  ;;  %v1395_v45 = vunpack.c.l.b16 %v1371_v13 }
 0x20a   :  { %v1224_v60 = vadd.f32 %v1223_v39, %v1073_v38  ;;  %v1027_v38 = vpop.f32.mrf.mxu2 }
 0x20b   :  { %v1344_v37 = vpack.c.b16 %v1343_v34, %v1342_v51  ;;  %v1396_v25 = vpack.c.b16 %v1395_v45, %v1394_v43 }
 0x20c   :  { %v1267_v24 = vpack.c.bf16 %v1224_v60, %v1224_v60 }
 0x20d   :  { %1353 = vmatpush.bf16.msra.mxu1 %v1344_v37 }
 0x20e   :  { %v1291_v8 = vunpack.c.l.b16 %v1267_v24 }
 0x210   :  { %v1292_v63 = vpack.c.b16 %v1291_v8, %v1290_v16  ;;  %1727 = vmatmul.msk.bf16.vlgmr.msra.gmra.mxu1 %vm127_vm1, %v2153_v2  ;;  %v1812_v2 = vld [vmem:[%s2620_s3 + $0x1] ss:$0 sm:$0xff]  ;;  %s2003_s3 = smov [#allocation11]  }
 0x211   :  { %s1432_s29 = sshll.u32 %s2003_s3, 4  ;;  %s1433_s29 = int_to_ptr.vmem [resolvable:$true] %s1432_s29 }
 0x212   :  { %1301 = vmatpush.bf16.msrb.mxu3 %v1292_v63  ;;  %v1029_v53 = vpop.f32.mrf.mxu2 }
 0x213   :  { %v1030_v23 = vadd.f32 %v1812_v2, %v1029_v53 }
 0x215   :  { %1725 = vmatmul.msk.bf16.vlgmr.msrb.gmra.mxu3 %vm127_vm1, %v2145_v6  ;;  %1728 = vmatmul.msk.bf16.vlgmr.msra.gmra.mxu2 %vm127_vm1, %v2139_v0  ;;  %v1028_v6 = vadd.f32 %v1812_v2, %v1027_v38 }
 0x216   :  { %1405 = vmatpush.bf16.msra.mxu3 %v1396_v25 }
 0x21a   :  { %v1032_v48 = vpop.f32.mrf.mxu2 }
 0x222   :  { %v1034_v50 = vpop.f32.mrf.mxu2 }
 0x223   :  { %v1035_v29 = vadd.f32 %v1812_v2, %v1034_v50 }
 0x225   :  { %1729 = vmatmul.msk.bf16.vlgmr.msra.gmra.mxu3 %vm127_vm1, %v2161_v20 }
 0x27d   :  { %v1335_v58 = vpop.f32.mrf.mxu0 }
 0x27e   :  { %v1360_v0 = vmul.f32 %v1335_v58, %v2387_v56 }
 0x285   :  { %v1337_v3 = vpop.f32.mrf.mxu0 }
 0x286   :  { %v1361_v57 = vmul.f32 %v1337_v3, %v2447_v52 }
 0x288   :  { %v1283_v47 = vpop.f32.mrf.mxu2 }
 0x289   :  { %v1308_v17 = vmul.f32 %v1283_v47, %v2315_v18 }
 0x28b   :  { %v1312_v49 = vadd.f32 %v1308_v17, %v1028_v6 }
 0x28d   :  { %v1364_v7 = vadd.f32 %v1360_v0, %v1312_v49  ;;  %v1355_v27 = vpop.f32.mrf.mxu1 }
 0x28e   :  { %v1362_v5 = vmul.f32 %v1355_v27, %v2542_v54 }
 0x290   :  { %v1285_v12 = vpop.f32.mrf.mxu2 }
 0x291   :  { %v1309_v20 = vmul.f32 %v1285_v12, %v2408_v41  ;;  %v1033_v41 = vadd.f32 %v1812_v2, %v1032_v48 }
 0x293   :  { %v1313_v11 = vadd.f32 %v1309_v20, %v1030_v23 }
 0x295   :  { %v1365_v56 = vadd.f32 %v1361_v57, %v1313_v11 }
 0x298   :  { %v1303_v19 = vpop.f32.mrf.mxu3  ;;  %v1387_v35 = vpop.f32.mrf.mxu2 }
 0x299   :  { %v1412_v26 = vmul.f32 %v1387_v35, %v2426_v36  ;;  %v1310_v40 = vmul.f32 %v1303_v19, %v2495_v4  ;;  %v1357_v4 = vpop.f32.mrf.mxu1 }
 0x29b   :  { %v1416_v33 = vadd.f32 %v1412_v26, %v1364_v7  ;;  %v1314_v44 = vadd.f32 %v1310_v40, %v1033_v41 }
 0x29d   :  { %v1420_v61 = vmax.f32 %v1416_v33, 0.0  ;;  %v1366_v52 = vadd.f32 %v1362_v5, %v1314_v44 }
 0x29f   :  { %1424 = vst [vmem:[#allocation11 + $0x10] sm:$0xff] %v1420_v61 }
 0x2a0   :  { %v1305_v18 = vpop.f32.mrf.mxu3  ;;  %v1389_v22 = vpop.f32.mrf.mxu2 }
 0x2a1   :  { %v1413_v31 = vmul.f32 %v1389_v22, %v2514_v28  ;;  %v1311_v55 = vmul.f32 %v1305_v18, %v2566_v14  ;;  %v1363_v28 = vmul.f32 %v1357_v4, %v2578_v9 }
 0x2a3   :  { %v1417_v59 = vadd.f32 %v1413_v31, %v1365_v56  ;;  %v1315_v10 = vadd.f32 %v1311_v55, %v1035_v29 }
 0x2a5   :  { %v1421_v36 = vmax.f32 %v1417_v59, 0.0  ;;  %v1367_v34 = vadd.f32 %v1363_v28, %v1315_v10 }
 0x2a7   :  { %1425 = vst [vmem:[#allocation11 + $0x28] sm:$0xff] %v1421_v36 }
 0x2a8   :  { %v1407_v32 = vpop.f32.mrf.mxu3 }
 0x2a9   :  { %v1414_v30 = vmul.f32 %v1407_v32, %v2545_v46 }
 0x2ab   :  { %v1418_v1 = vadd.f32 %v1414_v30, %v1366_v52 }
 0x2ad   :  { %v1422_v42 = vmax.f32 %v1418_v1, 0.0 }
 0x2af   :  { %1426 = vst [vmem:[#allocation11 + $0x40] sm:$0xff] %v1422_v42 }
 0x2b0   :  { %v1409_v51 = vpop.f32.mrf.mxu3 }
 0x2b1   :  { %v1415_v13 = vmul.f32 %v1409_v51, %v2584_v62 }
 0x2b3   :  { %v1419_v54 = vadd.f32 %v1415_v13, %v1367_v34 }
 0x2b5   :  { %v1423_v46 = vmax.f32 %v1419_v54, 0.0 }
 0x2b7   :  { %1427 = vst [vmem:[#allocation11 + $0x58] sm:$0xff] %v1423_v46 }
 0x2b8   :  { %1440 = dma.vmem_to_hbm [thread:$0]  %s1433_s29, 1536, %s1435_s8, [#allocation4], %s2004_s9, %s2004_s9, %s2005_s10  }
 0x2b9   :  { %1987 = dma.done.wait [#allocation4], 1536  }
 0x2ba   :  { %1988 = vsyncadd [#allocation4], 4294965760 }
 0x2bb   :  { %1445 = vsyncpa [#allocation3], 1 }
 0x2bc   :  { %1446 = vsyncpa [#allocation6], 1 }
 0x2bd   :  { %1447 = vsyncpa [#allocation9], 1 }
 0x2be   :  { %1448 = vsyncpa [#allocation4], 1 }

</bundles_post_ra>
